<compile_context>
chip_gen: v7x
topology: tpu7x:2x2x1
jax: 0.10.0
libtpu: 0.0.40
codegen_flags: <defaults>
</compile_context>

<pallas_src>
import jax
import jax.numpy as jnp
from jax import lax
from jax.experimental import pallas as pl
from jax.experimental.pallas import tpu as pltpu

EPS = 1e-5


def _fused_kernel(x1_ref, x2_ref, w_ref, g1_ref, b1_ref, g2_ref, b2_ref, o_ref):
    # x1_ref, x2_ref : (P, Cin)   f32   -- resident (constant block index)
    # w_ref          : (Cin, TN)  bf16  -- per-step weight tile (pipelined)
    # g1/b1          : (1, Cin)   f32   -- lane-major BN1 affine params
    # g2/b2          : (1, TN)    f32   -- lane-major BN2 affine param tiles
    # o_ref          : (P, TN)    f32   -- lane-dense output tile

    # --- BatchNorm2d(448) (train mode, batch stats over P) + residual add ---
    # Recomputed every grid step so the Cout axis stays "parallel" (megacore-safe).
    x1 = x1_ref[...]
    mean1 = jnp.mean(x1, axis=0, keepdims=True)                          # (1, Cin)
    var1 = jnp.mean(x1 * x1, axis=0, keepdims=True) - mean1 * mean1
    scale1 = lax.rsqrt(var1 + EPS) * g1_ref[...]
    shift1 = b1_ref[...] - mean1 * scale1
    z = x2_ref[...] + x1 * scale1 + shift1                               # (P, Cin) f32

    # --- 1x1 conv for this Cout tile: (P, Cin) @ (Cin, TN) on the MXU ---
    # bf16 inputs (native MXU format), f32 accumulate.
    c = jnp.dot(z.astype(w_ref.dtype), w_ref[...],
                preferred_element_type=jnp.float32)                      # (P, TN) f32

    # --- BatchNorm2d(1792) (train mode) folded to per-channel scale/shift ---
    mean2 = jnp.mean(c, axis=0, keepdims=True)                           # (1, TN)
    var2 = jnp.mean(c * c, axis=0, keepdims=True) - mean2 * mean2
    scale2 = lax.rsqrt(var2 + EPS) * g2_ref[...]
    shift2 = b2_ref[...] - mean2 * scale2
    o_ref[...] = c * scale2 + shift2


def fused_bn_add_conv_bn(x478, x494, conv_w, g1, b1, g2, b2,
                         *, tile_cout=896, matmul_dtype=jnp.bfloat16):
    """x478, x494: (N, Cin, H, W) NCHW.  conv_w: (Cout, Cin, 1, 1).  Returns NCHW (N, Cout, H, W)."""
    N, Cin, H, W = x478.shape
    Cout = conv_w.shape[0]
    P = N * H * W

    def to_pc(x):
        # NCHW -> (N*H*W, Cin): channels on the lane axis (lane-dense), tiny copy.
        return jnp.transpose(x, (0, 2, 3, 1)).reshape(P, Cin).astype(jnp.float32)

    x1 = to_pc(x478)
    x2 = to_pc(x494)
    # One-off weight transpose to (Cin, Cout) so the MXU K axis is contiguous;
    # bf16 halves the dominant HBM weight read.
    w = jnp.transpose(conv_w.reshape(Cout, Cin)).astype(matmul_dtype)

    # Largest Cout tile <= tile_cout that divides Cout and is a multiple of 128
    # (lane-dense tiles, small balanced grid).  For Cout=1792, tile_cout=896 -> grid=(2,).
    tn = None
    t = min(tile_cout, Cout)
    while t >= 128:
        if Cout % t == 0 and t % 128 == 0:
            tn = t
            break
        t -= 128
    if tn is None:
        tn = Cout
    grid = (Cout // tn,)

    out = pl.pallas_call(
        _fused_kernel,
        out_shape=jax.ShapeDtypeStruct((P, Cout), jnp.float32),
        grid_spec=pltpu.PrefetchScalarGridSpec(
            num_scalar_prefetch=0,
            grid=grid,
            in_specs=[
                pl.BlockSpec((P, Cin), lambda j: (0, 0)),    # x1 (resident across grid)
                pl.BlockSpec((P, Cin), lambda j: (0, 0)),    # x2 (resident across grid)
                pl.BlockSpec((Cin, tn), lambda j: (0, j)),   # weight tile (double-buffered)
                pl.BlockSpec((1, Cin), lambda j: (0, 0)),    # gamma1 (lane-major)
                pl.BlockSpec((1, Cin), lambda j: (0, 0)),    # beta1
                pl.BlockSpec((1, tn), lambda j: (0, j)),     # gamma2 tile
                pl.BlockSpec((1, tn), lambda j: (0, j)),     # beta2 tile
            ],
            out_specs=pl.BlockSpec((P, tn), lambda j: (0, j)),   # lane-dense output tile
        ),
        compiler_params=pltpu.CompilerParams(
            dimension_semantics=("parallel",),               # v7x: 2 steps -> one per TC
            vmem_limit_bytes=16 * 1024 * 1024,               # actual footprint ~3 MiB
        ),
    )(x1, x2, w,
      g1.reshape(1, Cin).astype(jnp.float32), b1.reshape(1, Cin).astype(jnp.float32),
      g2.reshape(1, Cout).astype(jnp.float32), b2.reshape(1, Cout).astype(jnp.float32))

    # (P, Cout) -> NCHW
    return jnp.transpose(out.reshape(N, H, W, Cout), (0, 3, 1, 2))


def reference(x478, x494, conv_w, g1, b1, g2, b2):
    """Pure-JAX f32 reference mirroring train-mode PyTorch forward (for sanity check)."""
    def bn(x, g, b):
        mean = jnp.mean(x, axis=(0, 2, 3), keepdims=True)
        var = jnp.mean((x - mean) ** 2, axis=(0, 2, 3), keepdims=True)
        return (x - mean) * lax.rsqrt(var + EPS) * g.reshape(1, -1, 1, 1) + b.reshape(1, -1, 1, 1)

    y = bn(x478, g1, b1)
    z = x494 + y
    c = lax.conv_general_dilated(z, conv_w, window_strides=(1, 1), padding="VALID",
                                 dimension_numbers=("NCHW", "OIHW", "NCHW"))
    return bn(c, g2, b2)


if __name__ == "__main__":
    key = jax.random.PRNGKey(0)
    k1, k2, k3, k4, k5, k6, k7 = jax.random.split(key, 7)

    N, Cin, H, W, Cout = 1, 448, 7, 7, 1792  # shapes fixed by the module

    x478 = jax.random.normal(k1, (N, Cin, H, W), dtype=jnp.float32)
    x494 = jax.random.normal(k2, (N, Cin, H, W), dtype=jnp.float32)
    conv_w = jax.random.normal(k3, (Cout, Cin, 1, 1), dtype=jnp.float32) * 0.05
    g1 = jax.random.normal(k4, (Cin,), dtype=jnp.float32) * 0.1 + 1.0
    b1 = jax.random.normal(k5, (Cin,), dtype=jnp.float32) * 0.1
    g2 = jax.random.normal(k6, (Cout,), dtype=jnp.float32) * 0.1 + 1.0
    b2 = jax.random.normal(k7, (Cout,), dtype=jnp.float32) * 0.1

    fn = jax.jit(fused_bn_add_conv_bn)
    out = jax.block_until_ready(fn(x478, x494, conv_w, g1, b1, g2, b2))

    ref = jax.block_until_ready(reference(x478, x494, conv_w, g1, b1, g2, b2))
    assert out.shape == (N, Cout, H, W), out.shape
    # Tolerance accounts for the bf16 matmul inputs (f32 accumulate + BN2
    # renormalization keep the error small); f32 end-to-end was < 1e-3.
    err = float(jnp.max(jnp.abs(out - ref)))
    assert err < 5e-2, err

    print("KERNEL_OK")
</pallas_src>

<mosaic_0001>
module attributes {stable_mosaic.version = 11 : i64} {
  func.func @_fused_kernel(%arg0: i32, %arg1: memref<49x448xf32, #tpu.memory_space<vmem>>, %arg2: memref<49x448xf32, #tpu.memory_space<vmem>>, %arg3: memref<448x896xbf16, #tpu.memory_space<vmem>>, %arg4: memref<1x448xf32, #tpu.memory_space<vmem>>, %arg5: memref<1x448xf32, #tpu.memory_space<vmem>>, %arg6: memref<1x896xf32, #tpu.memory_space<vmem>>, %arg7: memref<1x896xf32, #tpu.memory_space<vmem>>, %arg8: memref<49x896xf32, #tpu.memory_space<vmem>>) attributes {dimension_semantics = [#tpu.dimension_semantics<parallel>], iteration_bounds = array<i64: 2>, scalar_prefetch = 0 : i64, scratch_operands = 0 : i64, tpu.core_type = #tpu.core_type<tc>, window_params = [{pipeline_mode = #tpu.pipeline_mode<synchronous>, transform_indices = @transform_0, window_bounds = array<i64: 49, 448>}, {pipeline_mode = #tpu.pipeline_mode<synchronous>, transform_indices = @transform_1, window_bounds = array<i64: 49, 448>}, {transform_indices = @transform_2, window_bounds = array<i64: 448, 896>}, {pipeline_mode = #tpu.pipeline_mode<synchronous>, transform_indices = @transform_3, window_bounds = array<i64: 1, 448>}, {pipeline_mode = #tpu.pipeline_mode<synchronous>, transform_indices = @transform_4, window_bounds = array<i64: 1, 448>}, {transform_indices = @transform_5, window_bounds = array<i64: 1, 896>}, {transform_indices = @transform_6, window_bounds = array<i64: 1, 896>}, {transform_indices = @transform_7, window_bounds = array<i64: 49, 896>}]} {
    %c0 = arith.constant 0 : index
    %c0_0 = arith.constant 0 : index
    %0 = vector.load %arg1[%c0, %c0_0] : memref<49x448xf32, #tpu.memory_space<vmem>>, vector<49x448xf32>
    %cst = arith.constant dense<0.000000e+00> : vector<448xf32>
    %1 = vector.multi_reduction <add>, %0, %cst [0] : vector<49x448xf32> to vector<448xf32>
    %2 = vector.shape_cast %1 : vector<448xf32> to vector<1x448xf32>
    %cst_1 = arith.constant 4.900000e+01 : f32
    %3 = vector.broadcast %cst_1 : f32 to vector<1x448xf32>
    %4 = arith.divf %2, %3 : vector<1x448xf32>
    %5 = arith.mulf %0, %0 : vector<49x448xf32>
    %cst_2 = arith.constant dense<0.000000e+00> : vector<448xf32>
    %6 = vector.multi_reduction <add>, %5, %cst_2 [0] : vector<49x448xf32> to vector<448xf32>
    %7 = vector.shape_cast %6 : vector<448xf32> to vector<1x448xf32>
    %cst_3 = arith.constant 4.900000e+01 : f32
    %8 = vector.broadcast %cst_3 : f32 to vector<1x448xf32>
    %9 = arith.divf %7, %8 : vector<1x448xf32>
    %10 = arith.mulf %4, %4 : vector<1x448xf32>
    %11 = arith.subf %9, %10 : vector<1x448xf32>
    %cst_4 = arith.constant 9.99999974E-6 : f32
    %12 = vector.broadcast %cst_4 : f32 to vector<1x448xf32>
    %13 = arith.addf %11, %12 : vector<1x448xf32>
    %14 = math.rsqrt %13 : vector<1x448xf32>
    %c0_5 = arith.constant 0 : index
    %c0_6 = arith.constant 0 : index
    %15 = vector.load %arg4[%c0_5, %c0_6] : memref<1x448xf32, #tpu.memory_space<vmem>>, vector<1x448xf32>
    %16 = arith.mulf %14, %15 : vector<1x448xf32>
    %c0_7 = arith.constant 0 : index
    %c0_8 = arith.constant 0 : index
    %17 = vector.load %arg5[%c0_7, %c0_8] : memref<1x448xf32, #tpu.memory_space<vmem>>, vector<1x448xf32>
    %18 = arith.mulf %4, %16 : vector<1x448xf32>
    %19 = arith.subf %17, %18 : vector<1x448xf32>
    %c0_9 = arith.constant 0 : index
    %c0_10 = arith.constant 0 : index
    %20 = vector.load %arg2[%c0_9, %c0_10] : memref<49x448xf32, #tpu.memory_space<vmem>>, vector<49x448xf32>
    %21 = vector.broadcast %16 : vector<1x448xf32> to vector<49x448xf32>
    %22 = arith.mulf %0, %21 : vector<49x448xf32>
    %23 = arith.addf %20, %22 : vector<49x448xf32>
    %24 = vector.broadcast %19 : vector<1x448xf32> to vector<49x448xf32>
    %25 = arith.addf %23, %24 : vector<49x448xf32>
    %26 = arith.truncf %25 : vector<49x448xf32> to vector<49x448xbf16>
    %c0_11 = arith.constant 0 : index
    %c0_12 = arith.constant 0 : index
    %27 = vector.load %arg3[%c0_11, %c0_12] : memref<448x896xbf16, #tpu.memory_space<vmem>>, vector<448x896xbf16>
    %cst_13 = arith.constant dense<0.000000e+00> : vector<49x896xf32>
    %28 = tpu.matmul %26, %27, %cst_13 {dimension_numbers = #tpu.dot_dimension_numbers<[1], [0], [0], [1], [0, 0, 1, 1], [], []>} : vector<49x448xbf16>, vector<448x896xbf16>, vector<49x896xf32> -> vector<49x896xf32>
    %cst_14 = arith.constant dense<0.000000e+00> : vector<896xf32>
    %29 = vector.multi_reduction <add>, %28, %cst_14 [0] : vector<49x896xf32> to vector<896xf32>
    %30 = vector.shape_cast %29 : vector<896xf32> to vector<1x896xf32>
    %cst_15 = arith.constant 4.900000e+01 : f32
    %31 = vector.broadcast %cst_15 : f32 to vector<1x896xf32>
    %32 = arith.divf %30, %31 : vector<1x896xf32>
    %33 = arith.mulf %28, %28 : vector<49x896xf32>
    %cst_16 = arith.constant dense<0.000000e+00> : vector<896xf32>
    %34 = vector.multi_reduction <add>, %33, %cst_16 [0] : vector<49x896xf32> to vector<896xf32>
    %35 = vector.shape_cast %34 : vector<896xf32> to vector<1x896xf32>
    %cst_17 = arith.constant 4.900000e+01 : f32
    %36 = vector.broadcast %cst_17 : f32 to vector<1x896xf32>
    %37 = arith.divf %35, %36 : vector<1x896xf32>
    %38 = arith.mulf %32, %32 : vector<1x896xf32>
    %39 = arith.subf %37, %38 : vector<1x896xf32>
    %cst_18 = arith.constant 9.99999974E-6 : f32
    %40 = vector.broadcast %cst_18 : f32 to vector<1x896xf32>
    %41 = arith.addf %39, %40 : vector<1x896xf32>
    %42 = math.rsqrt %41 : vector<1x896xf32>
    %c0_19 = arith.constant 0 : index
    %c0_20 = arith.constant 0 : index
    %43 = vector.load %arg6[%c0_19, %c0_20] : memref<1x896xf32, #tpu.memory_space<vmem>>, vector<1x896xf32>
    %44 = arith.mulf %42, %43 : vector<1x896xf32>
    %c0_21 = arith.constant 0 : index
    %c0_22 = arith.constant 0 : index
    %45 = vector.load %arg7[%c0_21, %c0_22] : memref<1x896xf32, #tpu.memory_space<vmem>>, vector<1x896xf32>
    %46 = arith.mulf %32, %44 : vector<1x896xf32>
    %47 = arith.subf %45, %46 : vector<1x896xf32>
    %48 = vector.broadcast %44 : vector<1x896xf32> to vector<49x896xf32>
    %49 = arith.mulf %28, %48 : vector<49x896xf32>
    %50 = vector.broadcast %47 : vector<1x896xf32> to vector<49x896xf32>
    %51 = arith.addf %49, %50 : vector<49x896xf32>
    %c0_23 = arith.constant 0 : index
    %c0_24 = arith.constant 0 : index
    %52 = vector.load %arg8[%c0_23, %c0_24] : memref<49x896xf32, #tpu.memory_space<vmem>>, vector<49x896xf32>
    tpu.vector_store %arg8[%c0_23, %c0_24], %51 {strides = array<i32>} : memref<49x896xf32, #tpu.memory_space<vmem>>, vector<49x896xf32>,
    return
  }
  func.func @transform_0(%arg0: i32) -> (i32, i32) {
    %c0_i32 = arith.constant 0 : i32
    %c0_i32_0 = arith.constant 0 : i32
    %c0_i32_1 = arith.constant 0 : i32
    return %c0_i32, %c0_i32_0 : i32, i32
  }
  func.func @transform_1(%arg0: i32) -> (i32, i32) {
    %c0_i32 = arith.constant 0 : i32
    %c0_i32_0 = arith.constant 0 : i32
    %c0_i32_1 = arith.constant 0 : i32
    return %c0_i32, %c0_i32_0 : i32, i32
  }
  func.func @transform_2(%arg0: i32) -> (i32, i32) {
    %c0_i32 = arith.constant 0 : i32
    %c0_i32_0 = arith.constant 0 : i32
    return %c0_i32, %arg0 : i32, i32
  }
  func.func @transform_3(%arg0: i32) -> (i32, i32) {
    %c0_i32 = arith.constant 0 : i32
    %c0_i32_0 = arith.constant 0 : i32
    %c0_i32_1 = arith.constant 0 : i32
    return %c0_i32, %c0_i32_0 : i32, i32
  }
  func.func @transform_4(%arg0: i32) -> (i32, i32) {
    %c0_i32 = arith.constant 0 : i32
    %c0_i32_0 = arith.constant 0 : i32
    %c0_i32_1 = arith.constant 0 : i32
    return %c0_i32, %c0_i32_0 : i32, i32
  }
  func.func @transform_5(%arg0: i32) -> (i32, i32) {
    %c0_i32 = arith.constant 0 : i32
    %c0_i32_0 = arith.constant 0 : i32
    return %c0_i32, %arg0 : i32, i32
  }
  func.func @transform_6(%arg0: i32) -> (i32, i32) {
    %c0_i32 = arith.constant 0 : i32
    %c0_i32_0 = arith.constant 0 : i32
    return %c0_i32, %arg0 : i32, i32
  }
  func.func @transform_7(%arg0: i32) -> (i32, i32) {
    %c0_i32 = arith.constant 0 : i32
    %c0_i32_0 = arith.constant 0 : i32
    return %c0_i32, %arg0 : i32, i32
  }
}

</mosaic_0001>

<bundles_post_ra>
// kernel: fused_bn_add_conv_bn.1
= control target key start
LH: loop header
LB: loop body
LE: loop exit
PB: predicated region body
PF: predicated region fallthrough
CT: control target
= control target key end

     0   :  { %s4637_s24 = smov 0   ;;  %s4639_s25 = smov 0   ;;  %s6701_s0 = inlined_call_operand.vmem [shape: f32[49,448], index: 0, kind: input, shape index: {}]   ;;  %s6702_s1 = inlined_call_operand.vmem [shape: f32[49,448], index: 1, kind: input, shape index: {}]   ;;  %s6703_s2 = inlined_call_operand.vmem [shape: bf16[448,1792], index: 2, kind: input, shape index: {}]   ;;  %s6704_s3 = inlined_call_operand.vmem [shape: f32[1,448], index: 3, kind: input, shape index: {}]   ;;  %s6705_s4 = inlined_call_operand.vmem [shape: f32[1,448], index: 4, kind: input, shape index: {}]   ;;  %s6706_s5 = inlined_call_operand.vmem [shape: f32[1,1792], index: 5, kind: input, shape index: {}]   ;;  %s6707_s6 = inlined_call_operand.vmem [shape: f32[1,1792], index: 6, kind: input, shape index: {}]   ;;  %s6708_s7 = inlined_call_operand.vmem [shape: f32[49,1792], index: 7, kind: output, shape index: {}]  }
   0x1   :  { %s4641_s26 = smov 0  }
   0x2 LB: > { %s4653_s27 = sadd.s32 4294967295, %s4593_s26   ;;  %s4656_s28 = sadd.s32 1, %s4593_s26   ;;  %s4593_s26 = sphi %s4641_s26, %s6773_s26   ;;  %s4589_s25 = sphi %s4639_s25, %s6772_s25   ;;  %s4585_s24 = sphi %s4637_s24, %s6771_s24  }
   0x3   : > { %s63_s29 = ssub.s32 %s4593_s26, %s4656_s28  ;;  %s66_s30 = sadd.s32 1, %s4589_s25 }
   0x4   : > { %p64_p0 = scmp.eq.s32.totalorder %s63_s29, 0  ;;  %p73_p1 = scmp.ne.s32.totalorder %s4589_s25, %s4585_s24 }
   0x5   : > { %p74_p2 = scmp.eq.s32.totalorder %s4593_s26, 0  ;;  %p197_p3 = scmp.eq.s32.totalorder %s4653_s27, 1 }
   0x6   : > { %s4666_s8 = scalar_select %p64_p0, %s4589_s25, %s66_s30  }
   0x7   : > { %p75_p4 = por %p74_p2, %p73_p1  ;;  %p4668_p5 = por %p197_p3, %p73_p1 }
   0x8   : > { %p3810_p6 = scmp.ge.s32.totalorder %s4593_s26, 2 }
   0xa   : > { %231 = sbr.rel (%p3810_p6) target bundleno = 143 (0x8f), region = 32 }
  0x11   : > { %234 = sbr.rel (!%p75_p4) target bundleno = 143 (0x8f), region = 36  ;;  %s236_s10 = sand.u32 (%p75_p4), 1, %s4589_s25  }
  0x12   : > { %s4140_s11 = smul.u32 (%p75_p4), 28, %s4593_s26 }
  0x13   : > { %s4230_s12 = smul.u32 (%p75_p4), 1568, %s236_s10 }
  0x14   : > { %s4678_s15 = scalar_lea.vmem (%p75_p4), %s6703_s2, %s4140_s11 }
  0x15   : > { %v256_v0 = vld [vmem:[%s4678_s15] sm:$0xff] (%p75_p4)  ;;  %v258_v1 = vld [vmem:[%s4678_s15 + $0x8] sm:$0xff] (%p75_p4)  ;;  %v260_v2 = vld [vmem:[%s4678_s15 + $0x10] sm:$0xff] (%p75_p4)  ;;  %s4683_s16 = scalar_lea.vmem (%p75_p4), [#allocation2], %s4230_s12 }
  0x16   : > { %257 = vst [vmem:[%s4683_s16] sm:$0xff] (%p75_p4), %v256_v0  ;;  %259 = vst [vmem:[%s4683_s16 + $0x8] sm:$0xff] (%p75_p4), %v258_v1  ;;  %v262_v3 = vld [vmem:[%s4678_s15 + $0x38] sm:$0xff] (%p75_p4)  ;;  %v264_v4 = vld [vmem:[%s4678_s15 + $0x40] sm:$0xff] (%p75_p4) }
  0x17   : > { %261 = vst [vmem:[%s4683_s16 + $0x10] sm:$0xff] (%p75_p4), %v260_v2  ;;  %v266_v5 = vld [vmem:[%s4678_s15 + $0x48] sm:$0xff] (%p75_p4)  ;;  %263 = vst [vmem:[%s4683_s16 + $0x1c] sm:$0xff] (%p75_p4), %v262_v3  ;;  %v268_v6 = vld [vmem:[%s4678_s15 + $0x70] sm:$0xff] (%p75_p4) }
  0x18   : > { %265 = vst [vmem:[%s4683_s16 + $0x24] sm:$0xff] %v264_v4  ;;  %267 = vst [vmem:[%s4683_s16 + $0x2c] sm:$0xff] %v266_v5  ;;  %v270_v7 = vld [vmem:[%s4678_s15 + $0x78] sm:$0xff]  ;;  %v272_v8 = vld [vmem:[%s4678_s15 + $0x80] sm:$0xff] }
  0x19   : > { %269 = vst [vmem:[%s4683_s16 + $0x38] sm:$0xff] %v268_v6  ;;  %271 = vst [vmem:[%s4683_s16 + $0x40] sm:$0xff] %v270_v7  ;;  %v274_v9 = vld [vmem:[%s4678_s15 + $0xa8] sm:$0xff]  ;;  %v276_v10 = vld [vmem:[%s4678_s15 + $0xb0] sm:$0xff] }
  0x1a   : > { %273 = vst [vmem:[%s4683_s16 + $0x48] sm:$0xff] %v272_v8  ;;  %v278_v11 = vld [vmem:[%s4678_s15 + $0xb8] sm:$0xff]  ;;  %275 = vst [vmem:[%s4683_s16 + $0x54] sm:$0xff] %v274_v9  ;;  %v280_v12 = vld [vmem:[%s4678_s15 + $0xe0] sm:$0xff] }
  0x1b   : > { %277 = vst [vmem:[%s4683_s16 + $0x5c] sm:$0xff] %v276_v10  ;;  %279 = vst [vmem:[%s4683_s16 + $0x64] sm:$0xff] %v278_v11  ;;  %v282_v13 = vld [vmem:[%s4678_s15 + $0xe8] sm:$0xff]  ;;  %v284_v14 = vld [vmem:[%s4678_s15 + $0xf0] sm:$0xff] }
  0x1c   : > { %281 = vst [vmem:[%s4683_s16 + $0x70] sm:$0xff] %v280_v12  ;;  %283 = vst [vmem:[%s4683_s16 + $0x78] sm:$0xff] %v282_v13  ;;  %v286_v15 = vld [vmem:[%s4678_s15 + $0x118] sm:$0xff]  ;;  %v288_v16 = vld [vmem:[%s4678_s15 + $0x120] sm:$0xff] }
  0x1d   : > { %285 = vst [vmem:[%s4683_s16 + $0x80] sm:$0xff] %v284_v14  ;;  %v290_v17 = vld [vmem:[%s4678_s15 + $0x128] sm:$0xff]  ;;  %287 = vst [vmem:[%s4683_s16 + $0x8c] sm:$0xff] %v286_v15  ;;  %v292_v18 = vld [vmem:[%s4678_s15 + $0x150] sm:$0xff] }
  0x1e   : > { %289 = vst [vmem:[%s4683_s16 + $0x94] sm:$0xff] %v288_v16  ;;  %291 = vst [vmem:[%s4683_s16 + $0x9c] sm:$0xff] %v290_v17  ;;  %v294_v19 = vld [vmem:[%s4678_s15 + $0x158] sm:$0xff]  ;;  %v296_v20 = vld [vmem:[%s4678_s15 + $0x160] sm:$0xff] }
  0x1f   : > { %293 = vst [vmem:[%s4683_s16 + $0xa8] sm:$0xff] %v292_v18  ;;  %295 = vst [vmem:[%s4683_s16 + $0xb0] sm:$0xff] %v294_v19  ;;  %v298_v21 = vld [vmem:[%s4678_s15 + $0x188] sm:$0xff]  ;;  %v300_v22 = vld [vmem:[%s4678_s15 + $0x190] sm:$0xff] }
  0x20   : > { %297 = vst [vmem:[%s4683_s16 + $0xb8] sm:$0xff] %v296_v20  ;;  %v302_v23 = vld [vmem:[%s4678_s15 + $0x198] sm:$0xff]  ;;  %299 = vst [vmem:[%s4683_s16 + $0xc4] sm:$0xff] %v298_v21  ;;  %v304_v24 = vld [vmem:[%s4678_s15 + $0x1c0] sm:$0xff] }
  0x21   : > { %301 = vst [vmem:[%s4683_s16 + $0xcc] sm:$0xff] %v300_v22  ;;  %303 = vst [vmem:[%s4683_s16 + $0xd4] sm:$0xff] %v302_v23  ;;  %v306_v25 = vld [vmem:[%s4678_s15 + $0x1c8] sm:$0xff]  ;;  %v308_v26 = vld [vmem:[%s4678_s15 + $0x1d0] sm:$0xff] }
  0x22   : > { %305 = vst [vmem:[%s4683_s16 + $0xe0] sm:$0xff] %v304_v24  ;;  %307 = vst [vmem:[%s4683_s16 + $0xe8] sm:$0xff] %v306_v25  ;;  %v310_v27 = vld [vmem:[%s4678_s15 + $0x1f8] sm:$0xff]  ;;  %v312_v28 = vld [vmem:[%s4678_s15 + $0x200] sm:$0xff] }
  0x23   : > { %309 = vst [vmem:[%s4683_s16 + $0xf0] sm:$0xff] %v308_v26  ;;  %v314_v29 = vld [vmem:[%s4678_s15 + $0x208] sm:$0xff]  ;;  %311 = vst [vmem:[%s4683_s16 + $0xfc] sm:$0xff] %v310_v27  ;;  %v316_v30 = vld [vmem:[%s4678_s15 + $0x230] sm:$0xff] }
  0x24   : > { %313 = vst [vmem:[%s4683_s16 + $0x104] sm:$0xff] %v312_v28  ;;  %315 = vst [vmem:[%s4683_s16 + $0x10c] sm:$0xff] %v314_v29  ;;  %v318_v31 = vld [vmem:[%s4678_s15 + $0x238] sm:$0xff]  ;;  %v320_v32 = vld [vmem:[%s4678_s15 + $0x240] sm:$0xff] }
  0x25   : > { %317 = vst [vmem:[%s4683_s16 + $0x118] sm:$0xff] %v316_v30  ;;  %319 = vst [vmem:[%s4683_s16 + $0x120] sm:$0xff] %v318_v31  ;;  %v322_v33 = vld [vmem:[%s4678_s15 + $0x268] sm:$0xff]  ;;  %v324_v34 = vld [vmem:[%s4678_s15 + $0x270] sm:$0xff] }
  0x26   : > { %321 = vst [vmem:[%s4683_s16 + $0x128] sm:$0xff] %v320_v32  ;;  %v326_v35 = vld [vmem:[%s4678_s15 + $0x278] sm:$0xff]  ;;  %323 = vst [vmem:[%s4683_s16 + $0x134] sm:$0xff] %v322_v33  ;;  %v328_v36 = vld [vmem:[%s4678_s15 + $0x2a0] sm:$0xff] }
  0x27   : > { %325 = vst [vmem:[%s4683_s16 + $0x13c] sm:$0xff] %v324_v34  ;;  %327 = vst [vmem:[%s4683_s16 + $0x144] sm:$0xff] %v326_v35  ;;  %v330_v37 = vld [vmem:[%s4678_s15 + $0x2a8] sm:$0xff]  ;;  %v332_v38 = vld [vmem:[%s4678_s15 + $0x2b0] sm:$0xff] }
  0x28   : > { %329 = vst [vmem:[%s4683_s16 + $0x150] sm:$0xff] %v328_v36  ;;  %331 = vst [vmem:[%s4683_s16 + $0x158] sm:$0xff] %v330_v37  ;;  %v334_v39 = vld [vmem:[%s4678_s15 + $0x2d8] sm:$0xff]  ;;  %v336_v40 = vld [vmem:[%s4678_s15 + $0x2e0] sm:$0xff] }
  0x29   : > { %333 = vst [vmem:[%s4683_s16 + $0x160] sm:$0xff] %v332_v38  ;;  %v338_v41 = vld [vmem:[%s4678_s15 + $0x2e8] sm:$0xff]  ;;  %335 = vst [vmem:[%s4683_s16 + $0x16c] sm:$0xff] %v334_v39  ;;  %v340_v42 = vld [vmem:[%s4678_s15 + $0x310] sm:$0xff] }
  0x2a   : > { %337 = vst [vmem:[%s4683_s16 + $0x174] sm:$0xff] %v336_v40  ;;  %339 = vst [vmem:[%s4683_s16 + $0x17c] sm:$0xff] %v338_v41  ;;  %v342_v43 = vld [vmem:[%s4678_s15 + $0x318] sm:$0xff]  ;;  %v344_v44 = vld [vmem:[%s4678_s15 + $0x320] sm:$0xff] }
  0x2b   : > { %341 = vst [vmem:[%s4683_s16 + $0x188] sm:$0xff] %v340_v42  ;;  %343 = vst [vmem:[%s4683_s16 + $0x190] sm:$0xff] %v342_v43  ;;  %v346_v45 = vld [vmem:[%s4678_s15 + $0x348] sm:$0xff]  ;;  %v348_v46 = vld [vmem:[%s4678_s15 + $0x350] sm:$0xff] }
  0x2c   : > { %345 = vst [vmem:[%s4683_s16 + $0x198] sm:$0xff] %v344_v44  ;;  %v350_v47 = vld [vmem:[%s4678_s15 + $0x358] sm:$0xff]  ;;  %347 = vst [vmem:[%s4683_s16 + $0x1a4] sm:$0xff] %v346_v45  ;;  %v352_v48 = vld [vmem:[%s4678_s15 + $0x380] sm:$0xff] }
  0x2d   : > { %349 = vst [vmem:[%s4683_s16 + $0x1ac] sm:$0xff] %v348_v46  ;;  %351 = vst [vmem:[%s4683_s16 + $0x1b4] sm:$0xff] %v350_v47  ;;  %v354_v49 = vld [vmem:[%s4678_s15 + $0x388] sm:$0xff]  ;;  %v356_v50 = vld [vmem:[%s4678_s15 + $0x390] sm:$0xff] }
  0x2e   : > { %353 = vst [vmem:[%s4683_s16 + $0x1c0] sm:$0xff] %v352_v48  ;;  %355 = vst [vmem:[%s4683_s16 + $0x1c8] sm:$0xff] %v354_v49  ;;  %v358_v51 = vld [vmem:[%s4678_s15 + $0x3b8] sm:$0xff]  ;;  %v360_v52 = vld [vmem:[%s4678_s15 + $0x3c0] sm:$0xff] }
  0x2f   : > { %357 = vst [vmem:[%s4683_s16 + $0x1d0] sm:$0xff] %v356_v50  ;;  %v362_v53 = vld [vmem:[%s4678_s15 + $0x3c8] sm:$0xff]  ;;  %359 = vst [vmem:[%s4683_s16 + $0x1dc] sm:$0xff] %v358_v51  ;;  %v364_v54 = vld [vmem:[%s4678_s15 + $0x3f0] sm:$0xff] }
  0x30   : > { %361 = vst [vmem:[%s4683_s16 + $0x1e4] sm:$0xff] %v360_v52  ;;  %363 = vst [vmem:[%s4683_s16 + $0x1ec] sm:$0xff] %v362_v53  ;;  %v366_v55 = vld [vmem:[%s4678_s15 + $0x3f8] sm:$0xff]  ;;  %v368_v56 = vld [vmem:[%s4678_s15 + $0x400] sm:$0xff] }
  0x31   : > { %365 = vst [vmem:[%s4683_s16 + $0x1f8] sm:$0xff] %v364_v54  ;;  %367 = vst [vmem:[%s4683_s16 + $0x200] sm:$0xff] %v366_v55  ;;  %v370_v57 = vld [vmem:[%s4678_s15 + $0x428] sm:$0xff]  ;;  %v372_v58 = vld [vmem:[%s4678_s15 + $0x430] sm:$0xff] }
  0x32   : > { %369 = vst [vmem:[%s4683_s16 + $0x208] sm:$0xff] %v368_v56  ;;  %v374_v59 = vld [vmem:[%s4678_s15 + $0x438] sm:$0xff]  ;;  %371 = vst [vmem:[%s4683_s16 + $0x214] sm:$0xff] %v370_v57  ;;  %v376_v60 = vld [vmem:[%s4678_s15 + $0x460] sm:$0xff] }
  0x33   : > { %373 = vst [vmem:[%s4683_s16 + $0x21c] sm:$0xff] %v372_v58  ;;  %375 = vst [vmem:[%s4683_s16 + $0x224] sm:$0xff] %v374_v59  ;;  %v378_v61 = vld [vmem:[%s4678_s15 + $0x468] sm:$0xff]  ;;  %v380_v62 = vld [vmem:[%s4678_s15 + $0x470] sm:$0xff] }
  0x34   : > { %377 = vst [vmem:[%s4683_s16 + $0x230] sm:$0xff] %v376_v60  ;;  %379 = vst [vmem:[%s4683_s16 + $0x238] sm:$0xff] %v378_v61  ;;  %v382_v63 = vld [vmem:[%s4678_s15 + $0x498] sm:$0xff]  ;;  %v384_v0 = vld [vmem:[%s4678_s15 + $0x4a0] sm:$0xff] }
  0x35   : > { %381 = vst [vmem:[%s4683_s16 + $0x240] sm:$0xff] %v380_v62  ;;  %v386_v1 = vld [vmem:[%s4678_s15 + $0x4a8] sm:$0xff]  ;;  %383 = vst [vmem:[%s4683_s16 + $0x24c] sm:$0xff] %v382_v63  ;;  %v388_v2 = vld [vmem:[%s4678_s15 + $0x4d0] sm:$0xff] }
  0x36   : > { %385 = vst [vmem:[%s4683_s16 + $0x254] sm:$0xff] %v384_v0  ;;  %387 = vst [vmem:[%s4683_s16 + $0x25c] sm:$0xff] %v386_v1  ;;  %v390_v3 = vld [vmem:[%s4678_s15 + $0x4d8] sm:$0xff]  ;;  %v392_v4 = vld [vmem:[%s4678_s15 + $0x4e0] sm:$0xff] }
  0x37   : > { %389 = vst [vmem:[%s4683_s16 + $0x268] sm:$0xff] %v388_v2  ;;  %391 = vst [vmem:[%s4683_s16 + $0x270] sm:$0xff] %v390_v3  ;;  %v394_v5 = vld [vmem:[%s4678_s15 + $0x508] sm:$0xff]  ;;  %v396_v6 = vld [vmem:[%s4678_s15 + $0x510] sm:$0xff] }
  0x38   : > { %393 = vst [vmem:[%s4683_s16 + $0x278] sm:$0xff] %v392_v4  ;;  %v398_v7 = vld [vmem:[%s4678_s15 + $0x518] sm:$0xff]  ;;  %395 = vst [vmem:[%s4683_s16 + $0x284] sm:$0xff] %v394_v5  ;;  %v400_v8 = vld [vmem:[%s4678_s15 + $0x540] sm:$0xff] }
  0x39   : > { %397 = vst [vmem:[%s4683_s16 + $0x28c] sm:$0xff] %v396_v6  ;;  %399 = vst [vmem:[%s4683_s16 + $0x294] sm:$0xff] %v398_v7  ;;  %v402_v9 = vld [vmem:[%s4678_s15 + $0x548] sm:$0xff]  ;;  %v404_v10 = vld [vmem:[%s4678_s15 + $0x550] sm:$0xff] }
  0x3a   : > { %401 = vst [vmem:[%s4683_s16 + $0x2a0] sm:$0xff] %v400_v8  ;;  %403 = vst [vmem:[%s4683_s16 + $0x2a8] sm:$0xff] %v402_v9  ;;  %v406_v11 = vld [vmem:[%s4678_s15 + $0x578] sm:$0xff]  ;;  %v408_v12 = vld [vmem:[%s4678_s15 + $0x580] sm:$0xff] }
  0x3b   : > { %405 = vst [vmem:[%s4683_s16 + $0x2b0] sm:$0xff] %v404_v10  ;;  %v410_v13 = vld [vmem:[%s4678_s15 + $0x588] sm:$0xff]  ;;  %407 = vst [vmem:[%s4683_s16 + $0x2bc] sm:$0xff] %v406_v11  ;;  %v412_v14 = vld [vmem:[%s4678_s15 + $0x5b0] sm:$0xff] }
  0x3c   : > { %409 = vst [vmem:[%s4683_s16 + $0x2c4] sm:$0xff] %v408_v12  ;;  %411 = vst [vmem:[%s4683_s16 + $0x2cc] sm:$0xff] %v410_v13  ;;  %v414_v15 = vld [vmem:[%s4678_s15 + $0x5b8] sm:$0xff]  ;;  %v416_v16 = vld [vmem:[%s4678_s15 + $0x5c0] sm:$0xff] }
  0x3d   : > { %413 = vst [vmem:[%s4683_s16 + $0x2d8] sm:$0xff] %v412_v14  ;;  %415 = vst [vmem:[%s4683_s16 + $0x2e0] sm:$0xff] %v414_v15  ;;  %v418_v17 = vld [vmem:[%s4678_s15 + $0x5e8] sm:$0xff]  ;;  %v420_v18 = vld [vmem:[%s4678_s15 + $0x5f0] sm:$0xff] }
  0x3e   : > { %417 = vst [vmem:[%s4683_s16 + $0x2e8] sm:$0xff] %v416_v16  ;;  %v422_v19 = vld [vmem:[%s4678_s15 + $0x5f8] sm:$0xff]  ;;  %419 = vst [vmem:[%s4683_s16 + $0x2f4] sm:$0xff] %v418_v17  ;;  %v424_v20 = vld [vmem:[%s4678_s15 + $0x620] sm:$0xff] }
  0x3f   : > { %421 = vst [vmem:[%s4683_s16 + $0x2fc] sm:$0xff] %v420_v18  ;;  %423 = vst [vmem:[%s4683_s16 + $0x304] sm:$0xff] %v422_v19  ;;  %v426_v21 = vld [vmem:[%s4678_s15 + $0x628] sm:$0xff]  ;;  %v428_v22 = vld [vmem:[%s4678_s15 + $0x630] sm:$0xff] }
  0x40   : > { %425 = vst [vmem:[%s4683_s16 + $0x310] sm:$0xff] %v424_v20  ;;  %427 = vst [vmem:[%s4683_s16 + $0x318] sm:$0xff] %v426_v21  ;;  %v430_v23 = vld [vmem:[%s4678_s15 + $0x658] sm:$0xff]  ;;  %v432_v24 = vld [vmem:[%s4678_s15 + $0x660] sm:$0xff] }
  0x41   : > { %429 = vst [vmem:[%s4683_s16 + $0x320] sm:$0xff] %v428_v22  ;;  %v434_v25 = vld [vmem:[%s4678_s15 + $0x668] sm:$0xff]  ;;  %431 = vst [vmem:[%s4683_s16 + $0x32c] sm:$0xff] %v430_v23  ;;  %v436_v26 = vld [vmem:[%s4678_s15 + $0x690] sm:$0xff] }
  0x42   : > { %433 = vst [vmem:[%s4683_s16 + $0x334] sm:$0xff] %v432_v24  ;;  %435 = vst [vmem:[%s4683_s16 + $0x33c] sm:$0xff] %v434_v25  ;;  %v438_v27 = vld [vmem:[%s4678_s15 + $0x698] sm:$0xff]  ;;  %v440_v28 = vld [vmem:[%s4678_s15 + $0x6a0] sm:$0xff] }
  0x43   : > { %437 = vst [vmem:[%s4683_s16 + $0x348] sm:$0xff] %v436_v26  ;;  %439 = vst [vmem:[%s4683_s16 + $0x350] sm:$0xff] %v438_v27  ;;  %v442_v29 = vld [vmem:[%s4678_s15 + $0x6c8] sm:$0xff]  ;;  %v444_v30 = vld [vmem:[%s4678_s15 + $0x6d0] sm:$0xff] }
  0x44   : > { %441 = vst [vmem:[%s4683_s16 + $0x358] sm:$0xff] %v440_v28  ;;  %v446_v31 = vld [vmem:[%s4678_s15 + $0x6d8] sm:$0xff]  ;;  %443 = vst [vmem:[%s4683_s16 + $0x364] sm:$0xff] %v442_v29  ;;  %v448_v32 = vld [vmem:[%s4678_s15 + $0x700] sm:$0xff] }
  0x45   : > { %445 = vst [vmem:[%s4683_s16 + $0x36c] sm:$0xff] %v444_v30  ;;  %447 = vst [vmem:[%s4683_s16 + $0x374] sm:$0xff] %v446_v31  ;;  %v450_v33 = vld [vmem:[%s4678_s15 + $0x708] sm:$0xff]  ;;  %v452_v34 = vld [vmem:[%s4678_s15 + $0x710] sm:$0xff] }
  0x46   : > { %449 = vst [vmem:[%s4683_s16 + $0x380] sm:$0xff] %v448_v32  ;;  %451 = vst [vmem:[%s4683_s16 + $0x388] sm:$0xff] %v450_v33  ;;  %v454_v35 = vld [vmem:[%s4678_s15 + $0x738] sm:$0xff]  ;;  %v456_v36 = vld [vmem:[%s4678_s15 + $0x740] sm:$0xff] }
  0x47   : > { %453 = vst [vmem:[%s4683_s16 + $0x390] sm:$0xff] %v452_v34  ;;  %v458_v37 = vld [vmem:[%s4678_s15 + $0x748] sm:$0xff]  ;;  %455 = vst [vmem:[%s4683_s16 + $0x39c] sm:$0xff] %v454_v35  ;;  %v460_v38 = vld [vmem:[%s4678_s15 + $0x770] sm:$0xff] }
  0x48   : > { %457 = vst [vmem:[%s4683_s16 + $0x3a4] sm:$0xff] %v456_v36  ;;  %459 = vst [vmem:[%s4683_s16 + $0x3ac] sm:$0xff] %v458_v37  ;;  %v462_v39 = vld [vmem:[%s4678_s15 + $0x778] sm:$0xff]  ;;  %v464_v40 = vld [vmem:[%s4678_s15 + $0x780] sm:$0xff] }
  0x49   : > { %461 = vst [vmem:[%s4683_s16 + $0x3b8] sm:$0xff] %v460_v38  ;;  %463 = vst [vmem:[%s4683_s16 + $0x3c0] sm:$0xff] %v462_v39  ;;  %v466_v41 = vld [vmem:[%s4678_s15 + $0x7a8] sm:$0xff]  ;;  %v468_v42 = vld [vmem:[%s4678_s15 + $0x7b0] sm:$0xff] }
  0x4a   : > { %465 = vst [vmem:[%s4683_s16 + $0x3c8] sm:$0xff] %v464_v40  ;;  %v470_v43 = vld [vmem:[%s4678_s15 + $0x7b8] sm:$0xff]  ;;  %467 = vst [vmem:[%s4683_s16 + $0x3d4] sm:$0xff] %v466_v41  ;;  %v472_v44 = vld [vmem:[%s4678_s15 + $0x7e0] sm:$0xff] }
  0x4b   : > { %469 = vst [vmem:[%s4683_s16 + $0x3dc] sm:$0xff] %v468_v42  ;;  %471 = vst [vmem:[%s4683_s16 + $0x3e4] sm:$0xff] %v470_v43  ;;  %v474_v45 = vld [vmem:[%s4678_s15 + $0x7e8] sm:$0xff]  ;;  %v476_v46 = vld [vmem:[%s4678_s15 + $0x7f0] sm:$0xff] }
  0x4c   : > { %473 = vst [vmem:[%s4683_s16 + $0x3f0] sm:$0xff] %v472_v44  ;;  %475 = vst [vmem:[%s4683_s16 + $0x3f8] sm:$0xff] %v474_v45  ;;  %v478_v47 = vld [vmem:[%s4678_s15 + $0x818] sm:$0xff]  ;;  %v480_v48 = vld [vmem:[%s4678_s15 + $0x820] sm:$0xff] }
  0x4d   : > { %477 = vst [vmem:[%s4683_s16 + $0x400] sm:$0xff] %v476_v46  ;;  %v482_v49 = vld [vmem:[%s4678_s15 + $0x828] sm:$0xff]  ;;  %479 = vst [vmem:[%s4683_s16 + $0x40c] sm:$0xff] %v478_v47  ;;  %v484_v50 = vld [vmem:[%s4678_s15 + $0x850] sm:$0xff] }
  0x4e   : > { %481 = vst [vmem:[%s4683_s16 + $0x414] sm:$0xff] %v480_v48  ;;  %483 = vst [vmem:[%s4683_s16 + $0x41c] sm:$0xff] %v482_v49  ;;  %v486_v51 = vld [vmem:[%s4678_s15 + $0x858] sm:$0xff]  ;;  %v488_v52 = vld [vmem:[%s4678_s15 + $0x860] sm:$0xff] }
  0x4f   : > { %485 = vst [vmem:[%s4683_s16 + $0x428] sm:$0xff] %v484_v50  ;;  %487 = vst [vmem:[%s4683_s16 + $0x430] sm:$0xff] %v486_v51  ;;  %v490_v53 = vld [vmem:[%s4678_s15 + $0x888] sm:$0xff]  ;;  %v492_v54 = vld [vmem:[%s4678_s15 + $0x890] sm:$0xff] }
  0x50   : > { %489 = vst [vmem:[%s4683_s16 + $0x438] sm:$0xff] %v488_v52  ;;  %v494_v55 = vld [vmem:[%s4678_s15 + $0x898] sm:$0xff]  ;;  %491 = vst [vmem:[%s4683_s16 + $0x444] sm:$0xff] %v490_v53  ;;  %v496_v56 = vld [vmem:[%s4678_s15 + $0x8c0] sm:$0xff] }
  0x51   : > { %493 = vst [vmem:[%s4683_s16 + $0x44c] sm:$0xff] %v492_v54  ;;  %495 = vst [vmem:[%s4683_s16 + $0x454] sm:$0xff] %v494_v55  ;;  %v498_v57 = vld [vmem:[%s4678_s15 + $0x8c8] sm:$0xff]  ;;  %v500_v58 = vld [vmem:[%s4678_s15 + $0x8d0] sm:$0xff] }
  0x52   : > { %497 = vst [vmem:[%s4683_s16 + $0x460] sm:$0xff] %v496_v56  ;;  %499 = vst [vmem:[%s4683_s16 + $0x468] sm:$0xff] %v498_v57  ;;  %v502_v59 = vld [vmem:[%s4678_s15 + $0x8f8] sm:$0xff]  ;;  %v504_v60 = vld [vmem:[%s4678_s15 + $0x900] sm:$0xff] }
  0x53   : > { %501 = vst [vmem:[%s4683_s16 + $0x470] sm:$0xff] %v500_v58  ;;  %v506_v61 = vld [vmem:[%s4678_s15 + $0x908] sm:$0xff]  ;;  %503 = vst [vmem:[%s4683_s16 + $0x47c] sm:$0xff] %v502_v59  ;;  %v508_v62 = vld [vmem:[%s4678_s15 + $0x930] sm:$0xff] }
  0x54   : > { %505 = vst [vmem:[%s4683_s16 + $0x484] sm:$0xff] %v504_v60  ;;  %507 = vst [vmem:[%s4683_s16 + $0x48c] sm:$0xff] %v506_v61  ;;  %v510_v63 = vld [vmem:[%s4678_s15 + $0x938] sm:$0xff]  ;;  %v512_v0 = vld [vmem:[%s4678_s15 + $0x940] sm:$0xff] }
  0x55   : > { %509 = vst [vmem:[%s4683_s16 + $0x498] sm:$0xff] %v508_v62  ;;  %511 = vst [vmem:[%s4683_s16 + $0x4a0] sm:$0xff] %v510_v63  ;;  %v514_v1 = vld [vmem:[%s4678_s15 + $0x968] sm:$0xff]  ;;  %v516_v2 = vld [vmem:[%s4678_s15 + $0x970] sm:$0xff] }
  0x56   : > { %513 = vst [vmem:[%s4683_s16 + $0x4a8] sm:$0xff] %v512_v0  ;;  %v518_v3 = vld [vmem:[%s4678_s15 + $0x978] sm:$0xff]  ;;  %515 = vst [vmem:[%s4683_s16 + $0x4b4] sm:$0xff] %v514_v1  ;;  %v520_v4 = vld [vmem:[%s4678_s15 + $0x9a0] sm:$0xff] }
  0x57   : > { %517 = vst [vmem:[%s4683_s16 + $0x4bc] sm:$0xff] %v516_v2  ;;  %519 = vst [vmem:[%s4683_s16 + $0x4c4] sm:$0xff] %v518_v3  ;;  %v522_v5 = vld [vmem:[%s4678_s15 + $0x9a8] sm:$0xff]  ;;  %v524_v6 = vld [vmem:[%s4678_s15 + $0x9b0] sm:$0xff] }
  0x58   : > { %521 = vst [vmem:[%s4683_s16 + $0x4d0] sm:$0xff] %v520_v4  ;;  %523 = vst [vmem:[%s4683_s16 + $0x4d8] sm:$0xff] %v522_v5  ;;  %v526_v7 = vld [vmem:[%s4678_s15 + $0x9d8] sm:$0xff]  ;;  %v528_v8 = vld [vmem:[%s4678_s15 + $0x9e0] sm:$0xff] }
  0x59   : > { %525 = vst [vmem:[%s4683_s16 + $0x4e0] sm:$0xff] %v524_v6  ;;  %v530_v9 = vld [vmem:[%s4678_s15 + $0x9e8] sm:$0xff]  ;;  %527 = vst [vmem:[%s4683_s16 + $0x4ec] sm:$0xff] %v526_v7  ;;  %v532_v10 = vld [vmem:[%s4678_s15 + $0xa10] sm:$0xff] }
  0x5a   : > { %529 = vst [vmem:[%s4683_s16 + $0x4f4] sm:$0xff] %v528_v8  ;;  %531 = vst [vmem:[%s4683_s16 + $0x4fc] sm:$0xff] %v530_v9  ;;  %v534_v11 = vld [vmem:[%s4678_s15 + $0xa18] sm:$0xff]  ;;  %v536_v12 = vld [vmem:[%s4678_s15 + $0xa20] sm:$0xff] }
  0x5b   : > { %533 = vst [vmem:[%s4683_s16 + $0x508] sm:$0xff] %v532_v10  ;;  %535 = vst [vmem:[%s4683_s16 + $0x510] sm:$0xff] %v534_v11  ;;  %v538_v13 = vld [vmem:[%s4678_s15 + $0xa48] sm:$0xff]  ;;  %v540_v14 = vld [vmem:[%s4678_s15 + $0xa50] sm:$0xff] }
  0x5c   : > { %537 = vst [vmem:[%s4683_s16 + $0x518] sm:$0xff] %v536_v12  ;;  %v542_v15 = vld [vmem:[%s4678_s15 + $0xa58] sm:$0xff]  ;;  %539 = vst [vmem:[%s4683_s16 + $0x524] sm:$0xff] %v538_v13  ;;  %v544_v16 = vld [vmem:[%s4678_s15 + $0xa80] sm:$0xff] }
  0x5d   : > { %541 = vst [vmem:[%s4683_s16 + $0x52c] sm:$0xff] %v540_v14  ;;  %543 = vst [vmem:[%s4683_s16 + $0x534] sm:$0xff] %v542_v15  ;;  %v546_v17 = vld [vmem:[%s4678_s15 + $0xa88] sm:$0xff]  ;;  %v548_v18 = vld [vmem:[%s4678_s15 + $0xa90] sm:$0xff] }
  0x5e   : > { %545 = vst [vmem:[%s4683_s16 + $0x540] sm:$0xff] %v544_v16  ;;  %547 = vst [vmem:[%s4683_s16 + $0x548] sm:$0xff] %v546_v17  ;;  %v550_v19 = vld [vmem:[%s4678_s15 + $0xab8] sm:$0xff]  ;;  %v552_v20 = vld [vmem:[%s4678_s15 + $0xac0] sm:$0xff] }
  0x5f   : > { %549 = vst [vmem:[%s4683_s16 + $0x550] sm:$0xff] %v548_v18  ;;  %v554_v21 = vld [vmem:[%s4678_s15 + $0xac8] sm:$0xff]  ;;  %551 = vst [vmem:[%s4683_s16 + $0x55c] sm:$0xff] %v550_v19  ;;  %v556_v22 = vld [vmem:[%s4678_s15 + $0xaf0] sm:$0xff] }
  0x60   : > { %553 = vst [vmem:[%s4683_s16 + $0x564] sm:$0xff] %v552_v20  ;;  %555 = vst [vmem:[%s4683_s16 + $0x56c] sm:$0xff] %v554_v21  ;;  %v558_v23 = vld [vmem:[%s4678_s15 + $0xaf8] sm:$0xff]  ;;  %v560_v24 = vld [vmem:[%s4678_s15 + $0xb00] sm:$0xff] }
  0x61   : > { %557 = vst [vmem:[%s4683_s16 + $0x578] sm:$0xff] %v556_v22  ;;  %559 = vst [vmem:[%s4683_s16 + $0x580] sm:$0xff] %v558_v23  ;;  %v562_v25 = vld [vmem:[%s4678_s15 + $0xb28] sm:$0xff]  ;;  %v564_v26 = vld [vmem:[%s4678_s15 + $0xb30] sm:$0xff] }
  0x62   : > { %561 = vst [vmem:[%s4683_s16 + $0x588] sm:$0xff] %v560_v24  ;;  %v566_v27 = vld [vmem:[%s4678_s15 + $0xb38] sm:$0xff]  ;;  %563 = vst [vmem:[%s4683_s16 + $0x594] sm:$0xff] %v562_v25  ;;  %v568_v28 = vld [vmem:[%s4678_s15 + $0xb60] sm:$0xff] }
  0x63   : > { %565 = vst [vmem:[%s4683_s16 + $0x59c] sm:$0xff] %v564_v26  ;;  %567 = vst [vmem:[%s4683_s16 + $0x5a4] sm:$0xff] %v566_v27  ;;  %v570_v29 = vld [vmem:[%s4678_s15 + $0xb68] sm:$0xff]  ;;  %v572_v30 = vld [vmem:[%s4678_s15 + $0xb70] sm:$0xff] }
  0x64   : > { %569 = vst [vmem:[%s4683_s16 + $0x5b0] sm:$0xff] %v568_v28  ;;  %571 = vst [vmem:[%s4683_s16 + $0x5b8] sm:$0xff] %v570_v29  ;;  %v574_v31 = vld [vmem:[%s4678_s15 + $0xb98] sm:$0xff]  ;;  %v576_v32 = vld [vmem:[%s4678_s15 + $0xba0] sm:$0xff] }
  0x65   : > { %573 = vst [vmem:[%s4683_s16 + $0x5c0] sm:$0xff] %v572_v30  ;;  %v578_v33 = vld [vmem:[%s4678_s15 + $0xba8] sm:$0xff]  ;;  %575 = vst [vmem:[%s4683_s16 + $0x5cc] sm:$0xff] %v574_v31  ;;  %v580_v34 = vld [vmem:[%s4678_s15 + $0xbd0] sm:$0xff] }
  0x66   : > { %577 = vst [vmem:[%s4683_s16 + $0x5d4] sm:$0xff] %v576_v32  ;;  %579 = vst [vmem:[%s4683_s16 + $0x5dc] sm:$0xff] %v578_v33  ;;  %v582_v35 = vld [vmem:[%s4678_s15 + $0xbd8] sm:$0xff]  ;;  %v584_v36 = vld [vmem:[%s4678_s15 + $0xbe0] sm:$0xff] }
  0x67   : > { %581 = vst [vmem:[%s4683_s16 + $0x5e8] sm:$0xff] %v580_v34  ;;  %583 = vst [vmem:[%s4683_s16 + $0x5f0] sm:$0xff] %v582_v35  ;;  %v586_v37 = vld [vmem:[%s4678_s15 + $0xc08] sm:$0xff]  ;;  %v588_v38 = vld [vmem:[%s4678_s15 + $0xc10] sm:$0xff] }
  0x68   : > { %585 = vst [vmem:[%s4683_s16 + $0x5f8] sm:$0xff] %v584_v36  ;;  %v590_v39 = vld [vmem:[%s4678_s15 + $0xc18] sm:$0xff]  ;;  %587 = vst [vmem:[%s4683_s16 + $0x604] sm:$0xff] %v586_v37  ;;  %v3814_v41 = vld [vmem:[%s4678_s15 + $0x50] sm:$0xf] }
  0x69   : > { %589 = vst [vmem:[%s4683_s16 + $0x60c] sm:$0xff] %v588_v38  ;;  %591 = vst [vmem:[%s4683_s16 + $0x614] sm:$0xff] %v590_v39  ;;  %v3812_v40 = vld [vmem:[%s4678_s15 + $0x18] sm:$0xf]  ;;  %v3816_v42 = vld [vmem:[%s4678_s15 + $0x88] sm:$0xf] }
  0x6a   : > { %3813 = vst [vmem:[%s4683_s16 + $0x18] sm:$0xf] %v3812_v40  ;;  %3815 = vst [vmem:[%s4683_s16 + $0x34] sm:$0xf] %v3814_v41  ;;  %v3818_v43 = vld [vmem:[%s4678_s15 + $0xc0] sm:$0xf] }
  0x6b   : > { %3817 = vst [vmem:[%s4683_s16 + $0x50] sm:$0xf] %v3816_v42  ;;  %v3820_v44 = vld [vmem:[%s4678_s15 + $0xf8] sm:$0xf]  ;;  %v3822_v45 = vld [vmem:[%s4678_s15 + $0x130] sm:$0xf] }
  0x6c   : > { %3819 = vst [vmem:[%s4683_s16 + $0x6c] sm:$0xf] %v3818_v43  ;;  %3821 = vst [vmem:[%s4683_s16 + $0x88] sm:$0xf] %v3820_v44  ;;  %v3824_v46 = vld [vmem:[%s4678_s15 + $0x168] sm:$0xf] }
  0x6d   : > { %3823 = vst [vmem:[%s4683_s16 + $0xa4] sm:$0xf] %v3822_v45  ;;  %v3826_v47 = vld [vmem:[%s4678_s15 + $0x1a0] sm:$0xf]  ;;  %v3828_v48 = vld [vmem:[%s4678_s15 + $0x1d8] sm:$0xf] }
  0x6e   : > { %3825 = vst [vmem:[%s4683_s16 + $0xc0] sm:$0xf] %v3824_v46  ;;  %3827 = vst [vmem:[%s4683_s16 + $0xdc] sm:$0xf] %v3826_v47  ;;  %v3830_v49 = vld [vmem:[%s4678_s15 + $0x210] sm:$0xf] }
  0x6f   : > { %3829 = vst [vmem:[%s4683_s16 + $0xf8] sm:$0xf] %v3828_v48  ;;  %v3832_v50 = vld [vmem:[%s4678_s15 + $0x248] sm:$0xf]  ;;  %v3834_v51 = vld [vmem:[%s4678_s15 + $0x280] sm:$0xf] }
  0x70   : > { %3831 = vst [vmem:[%s4683_s16 + $0x114] sm:$0xf] %v3830_v49  ;;  %3833 = vst [vmem:[%s4683_s16 + $0x130] sm:$0xf] %v3832_v50  ;;  %v3836_v52 = vld [vmem:[%s4678_s15 + $0x2b8] sm:$0xf] }
  0x71   : > { %3835 = vst [vmem:[%s4683_s16 + $0x14c] sm:$0xf] %v3834_v51  ;;  %v3838_v53 = vld [vmem:[%s4678_s15 + $0x2f0] sm:$0xf]  ;;  %v3840_v54 = vld [vmem:[%s4678_s15 + $0x328] sm:$0xf] }
  0x72   : > { %3837 = vst [vmem:[%s4683_s16 + $0x168] sm:$0xf] %v3836_v52  ;;  %3839 = vst [vmem:[%s4683_s16 + $0x184] sm:$0xf] %v3838_v53  ;;  %v3842_v55 = vld [vmem:[%s4678_s15 + $0x360] sm:$0xf] }
  0x73   : > { %3841 = vst [vmem:[%s4683_s16 + $0x1a0] sm:$0xf] %v3840_v54  ;;  %v3844_v56 = vld [vmem:[%s4678_s15 + $0x398] sm:$0xf]  ;;  %v3846_v57 = vld [vmem:[%s4678_s15 + $0x3d0] sm:$0xf] }
  0x74   : > { %3843 = vst [vmem:[%s4683_s16 + $0x1bc] sm:$0xf] %v3842_v55  ;;  %3845 = vst [vmem:[%s4683_s16 + $0x1d8] sm:$0xf] %v3844_v56  ;;  %v3848_v58 = vld [vmem:[%s4678_s15 + $0x408] sm:$0xf] }
  0x75   : > { %3847 = vst [vmem:[%s4683_s16 + $0x1f4] sm:$0xf] %v3846_v57  ;;  %v3850_v59 = vld [vmem:[%s4678_s15 + $0x440] sm:$0xf]  ;;  %v3852_v60 = vld [vmem:[%s4678_s15 + $0x478] sm:$0xf] }
  0x76   : > { %3849 = vst [vmem:[%s4683_s16 + $0x210] sm:$0xf] %v3848_v58  ;;  %3851 = vst [vmem:[%s4683_s16 + $0x22c] sm:$0xf] %v3850_v59  ;;  %v3854_v61 = vld [vmem:[%s4678_s15 + $0x4b0] sm:$0xf] }
  0x77   : > { %3853 = vst [vmem:[%s4683_s16 + $0x248] sm:$0xf] %v3852_v60  ;;  %v3856_v62 = vld [vmem:[%s4678_s15 + $0x4e8] sm:$0xf]  ;;  %v3858_v63 = vld [vmem:[%s4678_s15 + $0x520] sm:$0xf] }
  0x78   : > { %3855 = vst [vmem:[%s4683_s16 + $0x264] sm:$0xf] %v3854_v61  ;;  %3857 = vst [vmem:[%s4683_s16 + $0x280] sm:$0xf] %v3856_v62  ;;  %v3860_v0 = vld [vmem:[%s4678_s15 + $0x558] sm:$0xf] }
  0x79   : > { %3859 = vst [vmem:[%s4683_s16 + $0x29c] sm:$0xf] %v3858_v63  ;;  %v3862_v1 = vld [vmem:[%s4678_s15 + $0x590] sm:$0xf]  ;;  %v3864_v2 = vld [vmem:[%s4678_s15 + $0x5c8] sm:$0xf] }
  0x7a   : > { %3861 = vst [vmem:[%s4683_s16 + $0x2b8] sm:$0xf] %v3860_v0  ;;  %3863 = vst [vmem:[%s4683_s16 + $0x2d4] sm:$0xf] %v3862_v1  ;;  %v3866_v3 = vld [vmem:[%s4678_s15 + $0x600] sm:$0xf] }
  0x7b   : > { %3865 = vst [vmem:[%s4683_s16 + $0x2f0] sm:$0xf] %v3864_v2  ;;  %v3868_v4 = vld [vmem:[%s4678_s15 + $0x638] sm:$0xf]  ;;  %v3870_v5 = vld [vmem:[%s4678_s15 + $0x670] sm:$0xf] }
  0x7c   : > { %3867 = vst [vmem:[%s4683_s16 + $0x30c] sm:$0xf] %v3866_v3  ;;  %3869 = vst [vmem:[%s4683_s16 + $0x328] sm:$0xf] %v3868_v4  ;;  %v3872_v6 = vld [vmem:[%s4678_s15 + $0x6a8] sm:$0xf] }
  0x7d   : > { %3871 = vst [vmem:[%s4683_s16 + $0x344] sm:$0xf] %v3870_v5  ;;  %v3874_v7 = vld [vmem:[%s4678_s15 + $0x6e0] sm:$0xf]  ;;  %v3876_v8 = vld [vmem:[%s4678_s15 + $0x718] sm:$0xf] }
  0x7e   : > { %3873 = vst [vmem:[%s4683_s16 + $0x360] sm:$0xf] %v3872_v6  ;;  %3875 = vst [vmem:[%s4683_s16 + $0x37c] sm:$0xf] %v3874_v7  ;;  %v3878_v9 = vld [vmem:[%s4678_s15 + $0x750] sm:$0xf] }
  0x7f   : > { %3877 = vst [vmem:[%s4683_s16 + $0x398] sm:$0xf] %v3876_v8  ;;  %v3880_v10 = vld [vmem:[%s4678_s15 + $0x788] sm:$0xf]  ;;  %v3882_v11 = vld [vmem:[%s4678_s15 + $0x7c0] sm:$0xf] }
  0x80   : > { %3879 = vst [vmem:[%s4683_s16 + $0x3b4] sm:$0xf] %v3878_v9  ;;  %3881 = vst [vmem:[%s4683_s16 + $0x3d0] sm:$0xf] %v3880_v10  ;;  %v3884_v12 = vld [vmem:[%s4678_s15 + $0x7f8] sm:$0xf] }
  0x81   : > { %3883 = vst [vmem:[%s4683_s16 + $0x3ec] sm:$0xf] %v3882_v11  ;;  %v3886_v13 = vld [vmem:[%s4678_s15 + $0x830] sm:$0xf]  ;;  %v3888_v14 = vld [vmem:[%s4678_s15 + $0x868] sm:$0xf] }
  0x82   : > { %3885 = vst [vmem:[%s4683_s16 + $0x408] sm:$0xf] %v3884_v12  ;;  %3887 = vst [vmem:[%s4683_s16 + $0x424] sm:$0xf] %v3886_v13  ;;  %v3890_v15 = vld [vmem:[%s4678_s15 + $0x8a0] sm:$0xf] }
  0x83   : > { %3889 = vst [vmem:[%s4683_s16 + $0x440] sm:$0xf] %v3888_v14  ;;  %v3892_v16 = vld [vmem:[%s4678_s15 + $0x8d8] sm:$0xf]  ;;  %v3894_v17 = vld [vmem:[%s4678_s15 + $0x910] sm:$0xf] }
  0x84   : > { %3891 = vst [vmem:[%s4683_s16 + $0x45c] sm:$0xf] %v3890_v15  ;;  %3893 = vst [vmem:[%s4683_s16 + $0x478] sm:$0xf] %v3892_v16  ;;  %v3896_v18 = vld [vmem:[%s4678_s15 + $0x948] sm:$0xf] }
  0x85   : > { %3895 = vst [vmem:[%s4683_s16 + $0x494] sm:$0xf] %v3894_v17  ;;  %v3898_v19 = vld [vmem:[%s4678_s15 + $0x980] sm:$0xf]  ;;  %v3900_v20 = vld [vmem:[%s4678_s15 + $0x9b8] sm:$0xf] }
  0x86   : > { %3897 = vst [vmem:[%s4683_s16 + $0x4b0] sm:$0xf] %v3896_v18  ;;  %3899 = vst [vmem:[%s4683_s16 + $0x4cc] sm:$0xf] %v3898_v19  ;;  %v3902_v21 = vld [vmem:[%s4678_s15 + $0x9f0] sm:$0xf] }
  0x87   : > { %3901 = vst [vmem:[%s4683_s16 + $0x4e8] sm:$0xf] %v3900_v20  ;;  %v3904_v22 = vld [vmem:[%s4678_s15 + $0xa28] sm:$0xf]  ;;  %v3906_v23 = vld [vmem:[%s4678_s15 + $0xa60] sm:$0xf] }
  0x88   : > { %3903 = vst [vmem:[%s4683_s16 + $0x504] sm:$0xf] %v3902_v21  ;;  %3905 = vst [vmem:[%s4683_s16 + $0x520] sm:$0xf] %v3904_v22  ;;  %v3908_v24 = vld [vmem:[%s4678_s15 + $0xa98] sm:$0xf] }
  0x89   : > { %3907 = vst [vmem:[%s4683_s16 + $0x53c] sm:$0xf] %v3906_v23  ;;  %v3910_v25 = vld [vmem:[%s4678_s15 + $0xad0] sm:$0xf]  ;;  %v3912_v26 = vld [vmem:[%s4678_s15 + $0xb08] sm:$0xf] }
  0x8a   : > { %3909 = vst [vmem:[%s4683_s16 + $0x558] sm:$0xf] %v3908_v24  ;;  %3911 = vst [vmem:[%s4683_s16 + $0x574] sm:$0xf] %v3910_v25  ;;  %v3914_v27 = vld [vmem:[%s4678_s15 + $0xb40] sm:$0xf] }
  0x8b   : > { %3913 = vst [vmem:[%s4683_s16 + $0x590] sm:$0xf] %v3912_v26  ;;  %v3916_v28 = vld [vmem:[%s4678_s15 + $0xb78] sm:$0xf]  ;;  %v3918_v29 = vld [vmem:[%s4678_s15 + $0xbb0] sm:$0xf] }
  0x8c   : > { %3915 = vst [vmem:[%s4683_s16 + $0x5ac] sm:$0xf] %v3914_v27  ;;  %3917 = vst [vmem:[%s4683_s16 + $0x5c8] sm:$0xf] %v3916_v28  ;;  %v3920_v30 = vld [vmem:[%s4678_s15 + $0xbe8] sm:$0xf] }
  0x8d   : > { %3919 = vst [vmem:[%s4683_s16 + $0x5e4] sm:$0xf] %v3918_v29  ;;  %v3922_v31 = vld [vmem:[%s4678_s15 + $0xc20] sm:$0xf]  ;;  %3921 = vst [vmem:[%s4683_s16 + $0x600] sm:$0xf] %v3920_v30 }
  0x8e   : > { %3923 = vst [vmem:[%s4683_s16 + $0x61c] sm:$0xf] %v3922_v31 }
  0x8f PF: > { %p3924_p7 = scmp.ge.s32.totalorder %s4593_s26, 1  ;;  %p731_p8 = scmp.lt.s32.totalorder %s4593_s26, 3 }
  0x91   : > { %p732_p9 = pnand %p3924_p7, %p731_p8 }
  0x93   : > { %735 = sbr.rel (%p732_p9) target bundleno = 776 (0x308), region = 70 }
  0x9a   : > { %s738_s17 = sand.u32 1, %s4585_s24   ;;  %v5174_v2 = vld [vmem:[%s6701_s0] sm:$0xff]  ;;  %v5179_v3 = vld [vmem:[%s6701_s0 + $0x8] sm:$0xff]  ;;  %v792_v4 = vld [vmem:[%s6701_s0 + $0x18] sm:$0xff]  ;;  %vm857_vm0 = vcmask 523264   ;;  %vm822_vm1 = vcmask 1040384  }
  0x9b   : > { %s4231_s18 = smul.u32 1568, %s738_s17  ;;  %v5187_v5 = vld [vmem:[%s6701_s0 + $0x20] sm:$0xff]  ;;  %v5192_v6 = vld [vmem:[%s6701_s0 + $0x28] sm:$0xff]  ;;  %v791_v9 = vld [vmem:[%s6701_s0 + $0x10] sm:$0xff]  ;;  %v858_v19 = vsel %vm857_vm0, %v792_v4, 0.0  ;;  %v883_v23 = vmul.f32 %v5174_v2, %v5174_v2  ;;  %v886_v24 = vmul.f32 %v792_v4, %v792_v4  ;;  %v884_v30 = vmul.f32 %v5179_v3, %v5179_v3 }
  0x9c   : > { %v795_v10 = vld [vmem:[%s6701_s0 + $0x30] sm:$0xff]  ;;  %v796_v11 = vld [vmem:[%s6701_s0 + $0x38] sm:$0xff]  ;;  %v5210_v14 = vld [vmem:[%s6701_s0 + $0x40] sm:$0xff]  ;;  %v817_v17 = vadd.f32 %v5187_v5, %v5174_v2  ;;  %v831_v18 = vadd.f32 %v5192_v6, %v5179_v3  ;;  %v887_v25 = vmul.f32 %v5187_v5, %v5187_v5  ;;  %v888_v31 = vmul.f32 %v5192_v6, %v5192_v6  ;;  %s4232_s11 = smul.u32 392, %s738_s17 }
  0x9d   : > { %s5135_s19 = scalar_lea.vmem [#allocation2], %s4231_s18  ;;  %v5215_v15 = vld [vmem:[%s6701_s0 + $0x48] sm:$0xff]  ;;  %v800_v16 = vld [vmem:[%s6701_s0 + $0x58] sm:$0xff]  ;;  %v859_v20 = vsel %vm857_vm0, %v796_v11, 0.0  ;;  %v799_v22 = vld [vmem:[%s6701_s0 + $0x50] sm:$0xff]  ;;  %v890_v26 = vmul.f32 %v796_v11, %v796_v11  ;;  %v844_v29 = vadd.f32 %v795_v10, %v791_v9  ;;  %vm869_vm2 = vcmask 516096  }
  0x9e   : > { %v4259_v32 = vld [vmem:[%s5135_s19 + $0x4] ss:$28 sps:$4 sm:$0xff]   ;;  %v4261_v33 = vld [vmem:[%s5135_s19 + $0xc] ss:$28 sps:$4 sm:$0xff]   ;;  %v4265_v36 = vld [vmem:[%s5135_s19 + $0x3c] ss:$28 sps:$4 sm:$0xff]  }
  0x9f   : > { %2459 = vmatprep.subr.bf16.mxu0 %v4259_v32  ;;  %v4263_v34 = vld [vmem:[%s5135_s19] ss:$28 sps:$4 sm:$0xff]   ;;  %v4264_v35 = vld [vmem:[%s5135_s19 + $0x8] ss:$28 sps:$4 sm:$0xff]   ;;  %2601 = vmatprep.subr.bf16.mxu1 %v4261_v33  ;;  %v4269_v38 = vld [vmem:[%s5135_s19 + $0x38] ss:$28 sps:$4 sm:$0xff]   ;;  %v860_v33 = vadd.f32 %v859_v20, %v858_v19 }
  0xa0   : > { %2460 = vmatpush1.bf16.msra.mxu0 %v4263_v34  ;;  %2602 = vmatpush1.bf16.msra.mxu1 %v4264_v35  ;;  %v4267_v37 = vld [vmem:[%s5135_s19 + $0x44] ss:$28 sps:$4 sm:$0xff]   ;;  %v4271_v40 = vld [vmem:[%s5135_s19 + $0x74] ss:$28 sps:$4 sm:$0xff]   ;;  %v4273_v41 = vld [vmem:[%s5135_s19 + $0x7c] ss:$28 sps:$4 sm:$0xff]   ;;  %v885_v34 = vmul.f32 %v791_v9, %v791_v9  ;;  %v889_v35 = vmul.f32 %v795_v10, %v795_v10 }
  0xa1   : > { %2461 = vmatprep.subr.bf16.mxu0 %v4265_v36  ;;  %v4270_v39 = vld [vmem:[%s5135_s19 + $0x40] ss:$28 sps:$4 sm:$0xff]   ;;  %2603 = vmatprep.subr.bf16.mxu1 %v4267_v37  ;;  %v4275_v42 = vld [vmem:[%s5135_s19 + $0x70] ss:$28 sps:$4 sm:$0xff]   ;;  %v4276_v43 = vld [vmem:[%s5135_s19 + $0x78] ss:$28 sps:$4 sm:$0xff]   ;;  %v818_v36 = vadd.f32 %v817_v17, %v5210_v14  ;;  %v832_v37 = vadd.f32 %v831_v18, %v5215_v15 }
  0xa2   : > { %v4277_v44 = vld [vmem:[%s5135_s19 + $0xac] ss:$28 sps:$4 sm:$0xff]   ;;  %v4279_v45 = vld [vmem:[%s5135_s19 + $0xb4] ss:$28 sps:$4 sm:$0xff]   ;;  %v4283_v48 = vld [vmem:[%s5135_s19 + $0xe4] ss:$28 sps:$4 sm:$0xff]  }
  0xa3   : > { %v4281_v46 = vld [vmem:[%s5135_s19 + $0xa8] ss:$28 sps:$4 sm:$0xff]   ;;  %v4282_v47 = vld [vmem:[%s5135_s19 + $0xb0] ss:$28 sps:$4 sm:$0xff]   ;;  %v4287_v50 = vld [vmem:[%s5135_s19 + $0xe0] ss:$28 sps:$4 sm:$0xff]  }
  0xa4   : > { %2462 = vmatpush1.bf16.msra.mxu0 %v4269_v38  ;;  %2604 = vmatpush1.bf16.msra.mxu1 %v4270_v39  ;;  %v4285_v49 = vld [vmem:[%s5135_s19 + $0xec] ss:$28 sps:$4 sm:$0xff]   ;;  %v4289_v52 = vld [vmem:[%s5135_s19 + $0x11c] ss:$28 sps:$4 sm:$0xff]   ;;  %v4291_v53 = vld [vmem:[%s5135_s19 + $0x124] ss:$28 sps:$4 sm:$0xff]   ;;  %v891_v39 = vmul.f32 %v5210_v14, %v5210_v14 }
  0xa5   : > { %2463 = vmatprep.subr.bf16.mxu0 %v4271_v40  ;;  %2605 = vmatprep.subr.bf16.mxu1 %v4273_v41  ;;  %v4288_v51 = vld [vmem:[%s5135_s19 + $0xe8] ss:$28 sps:$4 sm:$0xff]   ;;  %v4293_v54 = vld [vmem:[%s5135_s19 + $0x118] ss:$28 sps:$4 sm:$0xff]   ;;  %v4294_v55 = vld [vmem:[%s5135_s19 + $0x120] ss:$28 sps:$4 sm:$0xff]  }
  0xa6   : > { %v4295_v56 = vld [vmem:[%s5135_s19 + $0x154] ss:$28 sps:$4 sm:$0xff]   ;;  %v4297_v57 = vld [vmem:[%s5135_s19 + $0x15c] ss:$28 sps:$4 sm:$0xff]   ;;  %v4301_v60 = vld [vmem:[%s5135_s19 + $0x18c] ss:$28 sps:$4 sm:$0xff]  }
  0xa7   : > { %v4299_v58 = vld [vmem:[%s5135_s19 + $0x150] ss:$28 sps:$4 sm:$0xff]   ;;  %v4300_v59 = vld [vmem:[%s5135_s19 + $0x158] ss:$28 sps:$4 sm:$0xff]   ;;  %v4305_v62 = vld [vmem:[%s5135_s19 + $0x188] ss:$28 sps:$4 sm:$0xff]  }
  0xa8   : > { %2464 = vmatpush1.bf16.msra.mxu0 %v4275_v42  ;;  %2606 = vmatpush1.bf16.msra.mxu1 %v4276_v43  ;;  %v4303_v61 = vld [vmem:[%s5135_s19 + $0x194] ss:$28 sps:$4 sm:$0xff]   ;;  %v4307_v0 = vld [vmem:[%s5135_s19 + $0x1c4] ss:$28 sps:$4 sm:$0xff]   ;;  %v4309_v1 = vld [vmem:[%s5135_s19 + $0x1cc] ss:$28 sps:$4 sm:$0xff]   ;;  %v894_v42 = vmul.f32 %v800_v16, %v800_v16  ;;  %v911_v43 = vadd.f32 %v887_v25, %v883_v23 }
  0xa9   : > { %2465 = vmatprep.subr.bf16.mxu0 %v4277_v44  ;;  %2607 = vmatprep.subr.bf16.mxu1 %v4279_v45  ;;  %v4306_v63 = vld [vmem:[%s5135_s19 + $0x190] ss:$28 sps:$4 sm:$0xff]   ;;  %v4311_v7 = vld [vmem:[%s5135_s19 + $0x1c0] ss:$28 sps:$4 sm:$0xff]   ;;  %v4312_v8 = vld [vmem:[%s5135_s19 + $0x1c8] ss:$28 sps:$4 sm:$0xff]  }
  0xaa   : > { %v4313_v12 = vld [vmem:[%s5135_s19 + $0x1fc] ss:$28 sps:$4 sm:$0xff]   ;;  %v4315_v13 = vld [vmem:[%s5135_s19 + $0x204] ss:$28 sps:$4 sm:$0xff]   ;;  %v4319_v28 = vld [vmem:[%s5135_s19 + $0x234] ss:$28 sps:$4 sm:$0xff]  }
  0xab   : > { %v4317_v21 = vld [vmem:[%s5135_s19 + $0x1f8] ss:$28 sps:$4 sm:$0xff]   ;;  %v4318_v27 = vld [vmem:[%s5135_s19 + $0x200] ss:$28 sps:$4 sm:$0xff]   ;;  %v861_v38 = vsel %vm857_vm0, %v800_v16, 0.0  ;;  %v950_v44 = vsel %vm857_vm0, %v886_v24, 0.0 }
  0xac   : > { %2466 = vmatpush1.bf16.msra.mxu0 %v4281_v46  ;;  %2608 = vmatpush1.bf16.msra.mxu1 %v4282_v47  ;;  %v4321_v32 = vld [vmem:[%s5135_s19 + $0x23c] ss:$28 sps:$4 sm:$0xff]   ;;  %v4323_v40 = vld [vmem:[%s5135_s19 + $0x230] ss:$28 sps:$4 sm:$0xff]   ;;  %v951_v45 = vsel %vm857_vm0, %v890_v26, 0.0  ;;  %v845_v47 = vadd.f32 %v844_v29, %v799_v22  ;;  %v5281_v4 = vld [vmem:[%s6701_s0 + $0x80] sm:$0xff] }
  0xad   : > { %2467 = vmatprep.subr.bf16.mxu0 %v4283_v48  ;;  %2609 = vmatprep.subr.bf16.mxu1 %v4285_v49  ;;  %v4324_v41 = vld [vmem:[%s5135_s19 + $0x238] ss:$28 sps:$4 sm:$0xff]   ;;  %v4325_v46 = vld [vmem:[%s5135_s19 + $0x26c] ss:$28 sps:$4 sm:$0xff]   ;;  %v892_v48 = vmul.f32 %v5215_v15, %v5215_v15  ;;  %v924_v49 = vadd.f32 %v888_v31, %v884_v30  ;;  %v5305_v16 = vld [vmem:[%s6701_s0 + $0xa0] sm:$0xff]  ;;  %s6463_s24 = scalar_lea.vmem [#allocation3], %s4232_s11 }
  0xae   : > { %v5310_v17 = vld [vmem:[%s6701_s0 + $0xa8] sm:$0xff]  ;;  %v5324_v23 = vld [vmem:[%s6701_s0 + $0xb8] sm:$0xff]  ;;  %v5329_v24 = vld [vmem:[%s6701_s0 + $0xc0] sm:$0x1]  ;;  %s4141_s17 = smul.u32 (%p4668_p5), 56, %s4653_s27 }
  0xaf   : > { %v5340_v29 = vld [vmem:[%s6701_s0 + $0xc8] sm:$0x1]  ;;  %v815_v30 = vld [vmem:[%s6701_s0 + $0xd0] sm:$0x1]  ;;  %v5348_v31 = vld [vmem:[%s6701_s0 + $0xd8] sm:$0x1] }
  0xb0   : > { %2468 = vmatpush1.bf16.msra.mxu0 %v4287_v50  ;;  %2610 = vmatpush1.bf16.msra.mxu1 %v4288_v51  ;;  %v4327_v50 = vld [vmem:[%s5135_s19 + $0x274] ss:$28 sps:$4 sm:$0xff]   ;;  %v862_v51 = vadd.f32 %v861_v38, %v860_v33  ;;  %v823_v38 = vsel %vm822_vm1, %v5329_v24, 0.0  ;;  %s6597_s13 = scalar_lea.vmem (%p4668_p5), %s6708_s7, %s4141_s17 }
  0xb1   : > { %2469 = vmatprep.subr.bf16.mxu0 %v4289_v52  ;;  %2611 = vmatprep.subr.bf16.mxu1 %v4291_v53  ;;  %v893_v52 = vmul.f32 %v799_v22, %v799_v22  ;;  %v937_v53 = vadd.f32 %v889_v35, %v885_v34  ;;  %v5319_v22 = vld [vmem:[%s6701_s0 + $0xb0] sm:$0xff] }
  0xb3   : > { %v5313_v20 = vadd.f32 %v937_v53, %v893_v52 }
  0xb4   : > { %2470 = vmatpush1.bf16.msra.mxu0 %v4293_v54  ;;  %2612 = vmatpush1.bf16.msra.mxu1 %v4294_v55  ;;  %v4329_v54 = vld [vmem:[%s5135_s19 + $0x268] ss:$28 sps:$4 sm:$0xff]   ;;  %v4330_v55 = vld [vmem:[%s5135_s19 + $0x270] ss:$28 sps:$4 sm:$0xff]  }
  0xb5   : > { %2471 = vmatprep.subr.bf16.mxu0 %v4295_v56  ;;  %2613 = vmatprep.subr.bf16.mxu1 %v4297_v57  ;;  %v5259_v56 = vld [vmem:[%s6701_s0 + $0x60] sm:$0xff]  ;;  %v952_v57 = vadd.f32 %v951_v45, %v950_v44  ;;  %v849_v44 = vsel %vm822_vm1, %v815_v30, 0.0  ;;  %v867_v45 = vsel %vm857_vm0, %v5324_v23, 0.0 }
  0xb6   : > { %v895_v34 = vmul.f32 %v5259_v56, %v5259_v56 }
  0xb8   : > { %2472 = vmatpush1.bf16.msra.mxu0 %v4299_v58  ;;  %2614 = vmatpush1.bf16.msra.mxu1 %v4300_v59  ;;  %v4331_v58 = vld [vmem:[%s5135_s19 + $0x2a4] ss:$28 sps:$4 sm:$0xff]   ;;  %v4333_v59 = vld [vmem:[%s5135_s19 + $0x2ac] ss:$28 sps:$4 sm:$0xff]  }
  0xb9   : > { %2473 = vmatprep.subr.bf16.mxu0 %v4301_v60  ;;  %2615 = vmatprep.subr.bf16.mxu1 %v4303_v61  ;;  %v5266_v60 = vld [vmem:[%s6701_s0 + $0x68] sm:$0xff]  ;;  %v803_v61 = vld [vmem:[%s6701_s0 + $0x70] sm:$0xff] }
  0xba   : > { %v833_v9 = vadd.f32 %v832_v37, %v5266_v60  ;;  %v846_v10 = vadd.f32 %v845_v47, %v803_v61  ;;  %v896_v35 = vmul.f32 %v5266_v60, %v5266_v60  ;;  %v4337_v37 = vld [vmem:[%s5135_s19 + $0x2dc] ss:$28 sps:$4 sm:$0xff]  }
  0xbc   : > { %2474 = vmatpush1.bf16.msra.mxu0 %v4305_v62  ;;  %2616 = vmatpush1.bf16.msra.mxu1 %v4306_v63  ;;  %v804_v62 = vld [vmem:[%s6701_s0 + $0x78] sm:$0xff]  ;;  %v819_v63 = vadd.f32 %v818_v36, %v5259_v56  ;;  %v4336_v36 = vld [vmem:[%s5135_s19 + $0x2a8] ss:$28 sps:$4 sm:$0xff]  }
  0xbd   : > { %2475 = vmatprep.subr.bf16.mxu0 %v4307_v0  ;;  %2617 = vmatprep.subr.bf16.mxu1 %v4309_v1  ;;  %v5275_v0 = vadd.f32 %v911_v43, %v891_v39  ;;  %v953_v1 = vsel %vm857_vm0, %v894_v42, 0.0  ;;  %v863_v11 = vsel %vm857_vm0, %v804_v62, 0.0  ;;  %v4339_v42 = vld [vmem:[%s5135_s19 + $0x2e4] ss:$28 sps:$4 sm:$0xff]   ;;  %v898_v53 = vmul.f32 %v804_v62, %v804_v62  ;;  %v4345_v62 = vld [vmem:[%s5135_s19 + $0x31c] ss:$28 sps:$4 sm:$0xff]  }
  0xbe   : > { %v820_v18 = vadd.f32 %v819_v63, %v5281_v4  ;;  %v864_v19 = vadd.f32 %v863_v11, %v862_v51  ;;  %v4341_v51 = vld [vmem:[%s5135_s19 + $0x2d8] ss:$28 sps:$4 sm:$0xff]   ;;  %v903_v11 = vmul.f32 %v5305_v16, %v5305_v16 }
  0xc0   : > { %2476 = vmatpush1.bf16.msra.mxu0 %v4311_v7  ;;  %2618 = vmatpush1.bf16.msra.mxu1 %v4312_v8  ;;  %v5286_v7 = vld [vmem:[%s6701_s0 + $0x88] sm:$0xff]  ;;  %v5291_v8 = vld [vmem:[%s6701_s0 + $0x90] sm:$0xff] }
  0xc1   : > { %2477 = vmatprep.subr.bf16.mxu0 %v4313_v12  ;;  %2619 = vmatprep.subr.bf16.mxu1 %v4315_v13  ;;  %v5295_v12 = vadd.f32 %v924_v49, %v892_v48  ;;  %v5300_v13 = vld [vmem:[%s6701_s0 + $0x98] sm:$0xff]  ;;  %v834_v25 = vadd.f32 %v833_v9, %v5286_v7  ;;  %v847_v26 = vadd.f32 %v846_v10, %v5291_v8 }
  0xc2   : > { %v902_v10 = vmul.f32 %v5300_v13, %v5300_v13 }
  0xc3   : > { %v835_v39 = vadd.f32 %v834_v25, %v5310_v17  ;;  %v907_v25 = vmul.f32 %v5329_v24, %v5329_v24 }
  0xc4   : > { %2478 = vmatpush1.bf16.msra.mxu0 %v4317_v21  ;;  %2620 = vmatpush1.bf16.msra.mxu1 %v4318_v27  ;;  %v4335_v21 = vld [vmem:[%s5135_s19 + $0x2a0] ss:$28 sps:$4 sm:$0xff]   ;;  %v865_v27 = vsel %vm857_vm0, %v5300_v13, 0.0 }
  0xc5   : > { %2479 = vmatprep.subr.bf16.mxu0 %v4319_v28  ;;  %2621 = vmatprep.subr.bf16.mxu1 %v4321_v32  ;;  %v5335_v28 = vadd.f32 %v953_v1, %v952_v57  ;;  %v821_v32 = vadd.f32 %v820_v18, %v5305_v16  ;;  %v866_v33 = vadd.f32 %v865_v27, %v864_v19  ;;  %v4342_v57 = vld [vmem:[%s5135_s19 + $0x2e0] ss:$28 sps:$4 sm:$0xff]   ;;  %v4348_v27 = vld [vmem:[%s5135_s19 + $0x318] ss:$28 sps:$4 sm:$0xff]  }
  0xc7   : > { %v824_v43 = vadd.f32 %v823_v38, %v821_v32  ;;  %v868_v49 = vadd.f32 %v867_v45, %v866_v33  ;;  %v904_v33 = vmul.f32 %v5310_v17, %v5310_v17  ;;  %v4349_v38 = vld [vmem:[%s5135_s19 + $0x34c] ss:$28 sps:$4 sm:$0xff]  }
  0xc8   : > { %2480 = vmatpush1.bf16.msra.mxu0 %v4323_v40  ;;  %2622 = vmatpush1.bf16.msra.mxu1 %v4324_v41  ;;  %v836_v40 = vsel %vm822_vm1, %v5340_v29, 0.0  ;;  %v848_v41 = vadd.f32 %v847_v26, %v5319_v22  ;;  %v4347_v26 = vld [vmem:[%s5135_s19 + $0x310] ss:$28 sps:$4 sm:$0xff]  }
  0xc9   : > { %2481 = vmatprep.subr.bf16.mxu0 %v4325_v46  ;;  %2623 = vmatprep.subr.bf16.mxu1 %v4327_v50  ;;  %v870_v46 = vsel %vm869_vm2, %v5348_v31, 0.0  ;;  %v837_v47 = vadd.f32 %v836_v40, %v835_v39  ;;  %v897_v50 = vmul.f32 %v803_v61, %v803_v61  ;;  %v825_v52 = vrot.slane %v824_v43, 4 }
  0xca   : > { %v850_v48 = vadd.f32 %v849_v44, %v848_v41  ;;  %v871_v1 = vadd.f32 %v870_v46, %v868_v49  ;;  %v901_v61 = vmul.f32 %v5291_v8, %v5291_v8  ;;  %v926_v46 = vadd.f32 %v5295_v12, %v896_v35  ;;  %v4353_v49 = vld [vmem:[%s5135_s19 + $0x348] ss:$28 sps:$4 sm:$0xff]   ;;  %v4354_v12 = vld [vmem:[%s5135_s19 + $0x350] ss:$28 sps:$4 sm:$0xff]  }
  0xcb   : > { %v826_v9 = vadd.f32 %v825_v52, %v824_v43  ;;  %v4351_v43 = vld [vmem:[%s5135_s19 + $0x354] ss:$28 sps:$4 sm:$0xff]  }
  0xcc   : > { %2482 = vmatpush1.bf16.msra.mxu0 %v4329_v54  ;;  %2624 = vmatpush1.bf16.msra.mxu1 %v4330_v55  ;;  %v899_v54 = vmul.f32 %v5281_v4, %v5281_v4  ;;  %v900_v55 = vmul.f32 %v5286_v7, %v5286_v7  ;;  %v851_v63 = vrot.slane %v850_v48, 4 }
  0xcd   : > { %2483 = vmatprep.subr.bf16.mxu0 %v4331_v58  ;;  %2625 = vmatprep.subr.bf16.mxu1 %v4333_v59  ;;  %v4343_v58 = vld [vmem:[%s5135_s19 + $0x314] ss:$28 sps:$4 sm:$0xff]   ;;  %v838_v59 = vrot.slane %v837_v47, 4  ;;  %v827_v32 = vrot.slane %v826_v9, 2 }
  0xce   : > { %v852_v19 = vadd.f32 %v851_v63, %v850_v48  ;;  %v955_v48 = vsel %vm857_vm0, %v898_v53, 0.0  ;;  %v927_v52 = vadd.f32 %v926_v46, %v900_v55  ;;  %v4357_v55 = vld [vmem:[%s5135_s19 + $0x384] ss:$28 sps:$4 sm:$0xff]  }
  0xcf   : > { %v839_v18 = vadd.f32 %v838_v59, %v837_v47  ;;  %v828_v44 = vadd.f32 %v827_v32, %v826_v9  ;;  %v905_v47 = vmul.f32 %v5319_v22, %v5319_v22 }
  0xd0   : > { %2484 = vmatpush1.bf16.msra.mxu0 %v4335_v21  ;;  %2626 = vmatpush1.bf16.msra.mxu1 %v4336_v36  ;;  %v872_v21 = vrot.slane %v871_v1, 4  ;;  %v908_v36 = vmul.f32 %v5340_v29, %v5340_v29  ;;  %v853_v40 = vrot.slane %v852_v19, 2  ;;  %v928_v53 = vadd.f32 %v927_v52, %v904_v33 }
  0xd1   : > { %2485 = vmatprep.subr.bf16.mxu0 %v4337_v37  ;;  %2627 = vmatprep.subr.bf16.mxu1 %v4339_v42  ;;  %v913_v37 = vadd.f32 %v5275_v0, %v895_v34  ;;  %v840_v39 = vrot.slane %v839_v18, 2  ;;  %v909_v42 = vmul.f32 %v815_v30, %v815_v30  ;;  %v916_v0 = vsel %vm822_vm1, %v907_v25, 0.0 }
  0xd2   : > { %v873_v41 = vadd.f32 %v872_v21, %v871_v1  ;;  %v939_v34 = vadd.f32 %v5313_v20, %v897_v50  ;;  %v829_v35 = vrot.slane %v828_v44, 1  ;;  %v906_v20 = vmul.f32 %v5324_v23, %v5324_v23  ;;  %v4360_v1 = vld [vmem:[%s5135_s19 + $0x38c] ss:$28 sps:$4 sm:$0xff]  }
  0xd3   : > { %v914_v45 = vadd.f32 %v913_v37, %v899_v54  ;;  %v854_v54 = vadd.f32 %v853_v40, %v852_v19  ;;  %v942_v63 = vsel %vm822_vm1, %v909_v42, 0.0  ;;  %v956_v21 = vadd.f32 %v955_v48, %v5335_v28 }
  0xd4   : > { %2486 = vmatpush1.bf16.msra.mxu0 %v4341_v51  ;;  %2628 = vmatpush1.bf16.msra.mxu1 %v4342_v57  ;;  %v841_v51 = vadd.f32 %v840_v39, %v839_v18  ;;  %v929_v57 = vsel %vm822_vm1, %v908_v36, 0.0  ;;  %v940_v59 = vadd.f32 %v939_v34, %v901_v61  ;;  %v830_v25 = vadd.f32 %v829_v35, %v828_v44 }
  0xd5   : > { %2487 = vmatprep.subr.bf16.mxu0 %v4343_v58  ;;  %2629 = vmatprep.subr.bf16.mxu1 %v4345_v62  ;;  %v915_v30 = vadd.f32 %v914_v45, %v903_v11  ;;  %v874_v58 = vrot.slane %v873_v41, 2  ;;  %v910_v62 = vmul.f32 %v5348_v31, %v5348_v31  ;;  %v957_v11 = vsel %vm857_vm0, %v902_v10, 0.0 }
  0xd6   : > { %v941_v9 = vadd.f32 %v940_v59, %v905_v47  ;;  %v842_v18 = vrot.slane %v841_v51, 1  ;;  %v930_v61 = vadd.f32 %v929_v57, %v928_v53  ;;  %v958_v37 = vadd.f32 %v957_v11, %v956_v21 }
  0xd7   : > { %v917_v50 = vadd.f32 %v916_v0, %v915_v30  ;;  %v961_v10 = vsel %vm869_vm2, %v910_v62, 0.0  ;;  %v5414_v46 = vmul.f32 0.020408163, %v830_v25 }
  0xd8   : > { %2488 = vmatpush1.bf16.msra.mxu0 %v4347_v26  ;;  %2630 = vmatpush1.bf16.msra.mxu1 %v4348_v27  ;;  %v855_v26 = vrot.slane %v854_v54, 1  ;;  %v875_v27 = vadd.f32 %v874_v58, %v873_v41  ;;  %v943_v32 = vadd.f32 %v942_v63, %v941_v9  ;;  %v931_v36 = vrot.slane %v930_v61, 4 }
  0xd9   : > { %2489 = vmatprep.subr.bf16.mxu0 %v4349_v38  ;;  %2631 = vmatprep.subr.bf16.mxu1 %v4351_v43  ;;  %v918_v19 = vrot.slane %v917_v50, 4  ;;  %v959_v38 = vsel %vm857_vm0, %v906_v20, 0.0  ;;  %v843_v39 = vadd.f32 %v842_v18, %v841_v51  ;;  %v991_v9 = vlaneseq }
  0xda   : > { %v944_v31 = vrot.slane %v943_v32, 4  ;;  %v932_v42 = vadd.f32 %v931_v36, %v930_v61  ;;  %v960_v28 = vadd.f32 %v959_v38, %v958_v37  ;;  %v856_v43 = vadd.f32 %v855_v26, %v854_v54 }
  0xdb   : > { %v919_v33 = vadd.f32 %v918_v19, %v917_v50  ;;  %v876_v45 = vrot.slane %v875_v27, 1  ;;  %v880_v48 = vmul.f32 0.020408163, %v843_v39  ;;  %v973_v54 = vmul.f32 %v5414_v46, %v5414_v46 }
  0xdc   : > { %2490 = vmatpush1.bf16.msra.mxu0 %v4353_v49  ;;  %2632 = vmatpush1.bf16.msra.mxu1 %v4354_v12  ;;  %v945_v44 = vadd.f32 %v944_v31, %v943_v32  ;;  %v933_v47 = vrot.slane %v932_v42, 2  ;;  %v962_v0 = vadd.f32 %v961_v10, %v960_v28  ;;  %v881_v12 = vmul.f32 0.020408163, %v856_v43 }
  0xdd   : > { %2530 = vmatprep.subr.bf16.mxu0 %v4357_v55  ;;  %2672 = vmatprep.subr.bf16.mxu1 %v4360_v1  ;;  %v920_v40 = vrot.slane %v919_v33, 2  ;;  %v877_v57 = vadd.f32 %v876_v45, %v875_v27  ;;  %v974_v55 = vmul.f32 %v880_v48, %v880_v48 }
  0xde   : > { %v946_v34 = vrot.slane %v945_v44, 2  ;;  %v934_v30 = vadd.f32 %v933_v47, %v932_v42  ;;  %v963_v52 = vrot.slane %v962_v0, 4  ;;  %v975_v62 = vmul.f32 %v881_v12, %v881_v12  ;;  %v989_v42 = vld [vmem:[%s6704_s3] sm:$0xf] }
  0xdf   : > { %v921_v41 = vadd.f32 %v920_v40, %v919_v33  ;;  %v882_v11 = vmul.f32 0.020408163, %v877_v57  ;;  %v5418_v33 = vshrl.u32 %v991_v9, 7 }
  0xe0   : > { %v947_v35 = vadd.f32 %v946_v34, %v945_v44  ;;  %v935_v58 = vrot.slane %v934_v30, 1  ;;  %v964_v59 = vadd.f32 %v963_v52, %v962_v0  ;;  %v4595_v0 = vmov 1966171168  }
  0xe1   : > { %v922_v49 = vrot.slane %v921_v41, 1  ;;  %6716 = vst [vmem:[#allocation4_spill] sm:$0xff] %v5418_v33  ;;  %v976_v37 = vmul.f32 %v882_v11, %v882_v11  ;;  %v5421_v39 = vsub.s32 0, %v5418_v33  ;;  %v5427_v28 = vsub.s32 1, %v5418_v33 }
  0xe2   : > { %v948_v20 = vrot.slane %v947_v35, 1  ;;  %v936_v50 = vadd.f32 %v935_v58, %v934_v30  ;;  %v965_v53 = vrot.slane %v964_v59, 2  ;;  %v5431_v44 = vsub.s32 2, %v5418_v33 }
  0xe3   : > { %v923_v51 = vadd.f32 %v922_v49, %v921_v41  ;;  %v994_v45 = vrot.slane %v989_v42, %v5421_v39  ;;  %v998_v41 = vrot.slane %v989_v42, %v5427_v28  ;;  %v1027_v34 = vunpack.c.l.s4 %v4595_v0 }
  0xe4   : > { %v949_v1 = vadd.f32 %v948_v20, %v947_v35  ;;  %v966_v18 = vadd.f32 %v965_v53, %v964_v59  ;;  %v970_v19 = vmul.f32 0.020408163, %v936_v50  ;;  %v1002_v49 = vrot.slane %v989_v42, %v5431_v44 }
  0xe5   : > { %v969_v63 = vmul.f32 0.020408163, %v923_v51  ;;  %v5436_v30 = vsub.s32 3, %v5418_v33  ;;  %v1028_v58 = vunpack.c.0.s8 %v1027_v34 }
  0xe6   : > { %v971_v21 = vmul.f32 0.020408163, %v949_v1  ;;  %v967_v25 = vrot.slane %v966_v18, 1  ;;  %v978_v26 = vsub.f32 %v970_v19, %v974_v55 }
  0xe7   : > { %v977_v61 = vsub.f32 %v969_v63, %v973_v54  ;;  %v1006_v59 = vrot.slane %v989_v42, %v5436_v30 }
  0xe8   : > { %v979_v32 = vsub.f32 %v971_v21, %v975_v62  ;;  %v968_v36 = vadd.f32 %v967_v25, %v966_v18  ;;  %v982_v38 = vadd.f32 1e-05, %v978_v26  ;;  %v5441_v62 = vsub.s32 %v1028_v58, %v5418_v33  ;;  %v1050_v25 = vld [vmem:[%s6702_s1] sm:$0xff] }
  0xe9   : > { %v981_v27 = vadd.f32 1e-05, %v977_v61 }
  0xea   : > { %v983_v31 = vadd.f32 1e-05, %v979_v32  ;;  %v972_v10 = vmul.f32 0.020408163, %v968_v36 }
  0xeb   : > { %4539 = vrsqrt.f32 %v981_v27 }
  0xec   : > { %4541 = vrsqrt.f32 %v982_v38  ;;  %v980_v40 = vsub.f32 %v972_v10, %v976_v37  ;;  %v1054_v38 = vld [vmem:[%s6702_s1 + $0x20] sm:$0xff] }
  0xed   : > { %4543 = vrsqrt.f32 %v983_v31 }
  0xee   : > { %v984_v43 = vadd.f32 1e-05, %v980_v40 }
  0xf0   : > { %4545 = vrsqrt.f32 %v984_v43 }
  0xf5   : > { %v4540_v47 = vpop.eup %4539 }
  0xf6   : > { %v1011_v52 = vmul.f32 %v4540_v47, %v994_v45  ;;  %v4542_v57 = vpop.eup %4541 }
  0xf7   : > { %v4544_v35 = vpop.eup %4543  ;;  %v1012_v51 = vmul.f32 %v4542_v57, %v998_v41 }
  0xf8   : > { %v1013_v54 = vmul.f32 %v4544_v35, %v1002_v49  ;;  %v1016_v20 = vmul.f32 %v1011_v52, %v5414_v46  ;;  %v5444_v18 = vrot.slane %v1011_v52, %v5421_v39 }
  0xf9   : > { %v1017_v50 = vmul.f32 %v1012_v51, %v880_v48  ;;  %v5448_v21 = vrot.slane %v1012_v51, %v5421_v39  ;;  %v1015_v48 = vld [vmem:[%s6705_s4] sm:$0xf]  ;;  %v1067_v51 = vld [vmem:[%s6702_s1 + $0x88] sm:$0xff] }
  0xfa   : > { %v4546_v53 = vpop.eup %4545  ;;  %v1018_v55 = vmul.f32 %v1013_v54, %v881_v12  ;;  %v1051_v12 = vld [vmem:[%s6702_s1 + $0x8] sm:$0xff]  ;;  %v1094_v26 = vmul.f32 %v5444_v18, %v5174_v2  ;;  %v1098_v27 = vmul.f32 %v5444_v18, %v5187_v5  ;;  %v1110_v40 = vmul.f32 %v5444_v18, %v5281_v4  ;;  %v1070_v4 = vld [vmem:[%s6702_s1 + $0xa0] sm:$0xff] }
  0xfb   : > { %v1014_v63 = vmul.f32 %v4546_v53, %v1006_v59  ;;  %v1024_v1 = vcombine.low %v1016_v20, %v1017_v50  ;;  %v1095_v36 = vmul.f32 %v5448_v21, %v5179_v3  ;;  %v1099_v37 = vmul.f32 %v5448_v21, %v5192_v6  ;;  %v1059_v2 = vld [vmem:[%s6702_s1 + $0x48] sm:$0xff] }
  0xfc   : > { %v1103_v31 = vmul.f32 %v5448_v21, %v5215_v15  ;;  %v1107_v5 = vmul.f32 %v5448_v21, %v5266_v60  ;;  %v1063_v3 = vld [vmem:[%s6702_s1 + $0x68] sm:$0xff]  ;;  %v1102_v6 = vmul.f32 %v5444_v18, %v5210_v14  ;;  %v1122_v15 = vadd.f32 %v1094_v26, %v1050_v25  ;;  %v1066_v60 = vld [vmem:[%s6702_s1 + $0x80] sm:$0xff]  ;;  %v1068_v25 = vld [vmem:[%s6702_s1 + $0x90] sm:$0xff] }
  0xfd   : > { %v1019_v9 = vmul.f32 %v1014_v63, %v882_v11  ;;  %v1032_v61 = vrot.slane %v1024_v1, %v5441_v62  ;;  %v1055_v11 = vld [vmem:[%s6702_s1 + $0x28] sm:$0xff]  ;;  %v1126_v42 = vadd.f32 %v1098_v27, %v1054_v38  ;;  %v1106_v43 = vmul.f32 %v5444_v18, %v5259_v56  ;;  %v1058_v56 = vld [vmem:[%s6702_s1 + $0x40] sm:$0xff] }
  0xfe   : > { %v1114_v45 = vmul.f32 %v5444_v18, %v5305_v16  ;;  %v1123_v47 = vadd.f32 %v1095_v36, %v1051_v12  ;;  %v1127_v0 = vadd.f32 %v1099_v37, %v1055_v11  ;;  %v1131_v14 = vadd.f32 %v1103_v31, %v1059_v2  ;;  %v4355_v1 = vld [vmem:[%s5135_s19 + $0x380] ss:$28 sps:$4 sm:$0xff]  }
  0xff   : > { %v1025_v19 = vcombine.low %v1018_v55, %v1019_v9  ;;  %v1135_v34 = vadd.f32 %v1107_v5, %v1063_v3  ;;  %v1111_v49 = vmul.f32 %v5448_v21, %v5286_v7  ;;  %v5507_v16 = vrot.slane %v1014_v63, %v5421_v39  ;;  %v1062_v7 = vld [vmem:[%s6702_s1 + $0x60] sm:$0xff]  ;;  %v1073_v11 = vld [vmem:[%s6702_s1 + $0xb8] sm:$0xff] }
 0x100   : > { %v5510_v52 = vrot.slane %v1013_v54, %v5421_v39  ;;  %v1115_v58 = vmul.f32 %v5448_v21, %v5310_v17  ;;  %v1138_v59 = vadd.f32 %v1110_v40, %v1066_v60  ;;  %v1071_v54 = vld [vmem:[%s6702_s1 + $0xa8] sm:$0xff]  ;;  %v1142_v20 = vadd.f32 %v1114_v45, %v1070_v4  ;;  %v4361_v40 = vld [vmem:[%s5135_s19 + $0x3b8] ss:$28 sps:$4 sm:$0xff]   ;;  %v4364_v60 = vld [vmem:[%s5135_s19 + $0x3c0] ss:$28 sps:$4 sm:$0xff]  }
 0x101   : > { %v1039_v46 = vrot.slane %v1025_v19, %v5441_v62  ;;  %v1113_v50 = vmul.f32 %v5507_v16, %v5300_v13  ;;  %v1117_v53 = vmul.f32 %v5507_v16, %v5324_v23  ;;  %v4358_v9 = vld [vmem:[%s5135_s19 + $0x388] ss:$28 sps:$4 sm:$0xff]   ;;  %v1069_v13 = vld [vmem:[%s6702_s1 + $0x98] sm:$0xff]  ;;  %v1134_v12 = vadd.f32 %v1106_v43, %v1062_v7 }
 0x102   : > { %v1112_v63 = vmul.f32 %v5510_v52, %v5291_v8  ;;  %v1139_v36 = vadd.f32 %v1111_v49, %v1067_v51  ;;  %v1116_v37 = vmul.f32 %v5510_v52, %v5319_v22  ;;  %v1143_v38 = vadd.f32 %v1115_v58, %v1071_v54  ;;  %v4370_v51 = vld [vmem:[%s5135_s19 + $0x3f8] ss:$28 sps:$4 sm:$0xff]  }
 0x103   : > { %v1040_v32 = vcombine.low %v1032_v61, %v1039_v46  ;;  %v4363_v46 = vld [vmem:[%s5135_s19 + $0x3bc] ss:$28 sps:$4 sm:$0xff]   ;;  %v1141_v5 = vadd.f32 %v1113_v50, %v1069_v13  ;;  %v1145_v22 = vadd.f32 %v1117_v53, %v1073_v11  ;;  %v1119_v7 = vmul.f32 %v5448_v21, %v5340_v29  ;;  %v4375_v50 = vld [vmem:[%s5135_s19 + $0x42c] ss:$28 sps:$4 sm:$0xff]   ;;  %v4378_v21 = vld [vmem:[%s5135_s19 + $0x434] ss:$28 sps:$4 sm:$0xff]  }
 0x104   : > { %v1074_v13 = vld [vmem:[%s6702_s1 + $0xc0] sm:$0x1]  ;;  %v4562_v11 = vld [vmem:[%s6701_s0 + $0x38] sm:$0xff] }
 0x105   : > { %v1047_v10 = vrot.slane %v1040_v32, %v5441_v62  ;;  %v4366_v32 = vld [vmem:[%s5135_s19 + $0x3c4] ss:$28 sps:$4 sm:$0xff]  }
 0x107   : > { %v5496_v41 = vsub.f32 %v1015_v48, %v1047_v10  ;;  %v1130_v48 = vadd.f32 %v1102_v6, %v1058_v56  ;;  %v1072_v10 = vld [vmem:[%s6702_s1 + $0xb0] sm:$0xff]  ;;  %v1140_v6 = vadd.f32 %v1112_v63, %v1068_v25  ;;  %v4373_v63 = vld [vmem:[%s5135_s19 + $0x428] ss:$28 sps:$4 sm:$0xff]   ;;  %v1101_v25 = vmul.f32 %v4562_v11, %v5507_v16 }
 0x108   : > { %v1144_v45 = vadd.f32 %v1116_v37, %v1072_v10  ;;  %v4390_v37 = vld [vmem:[%s5135_s19 + $0x4a4] ss:$28 sps:$4 sm:$0xff]  }
 0x109   : > { %v5514_v57 = vrot.slane %v5496_v41, %v5427_v28  ;;  %v5518_v35 = vrot.slane %v5496_v41, %v5421_v39  ;;  %v5587_v4 = vrot.slane %v5496_v41, %v5431_v44 }
 0x10b   : > { %v1172_v55 = vadd.f32 %v5514_v57, %v1123_v47  ;;  %v1176_v17 = vadd.f32 %v5514_v57, %v1127_v0  ;;  %v1171_v19 = vadd.f32 %v5518_v35, %v1122_v15  ;;  %v1175_v61 = vadd.f32 %v5518_v35, %v1126_v42  ;;  %v4369_v47 = vld [vmem:[%s5135_s19 + $0x3f4] ss:$28 sps:$4 sm:$0xff]   ;;  %v4372_v0 = vld [vmem:[%s5135_s19 + $0x3fc] ss:$28 sps:$4 sm:$0xff]  }
 0x10c   : > { %v1180_v23 = vadd.f32 %v5514_v57, %v1131_v14  ;;  %v1184_v8 = vadd.f32 %v5514_v57, %v1135_v34  ;;  %v1187_v31 = vadd.f32 %v5518_v35, %v1138_v59  ;;  %v1191_v2 = vadd.f32 %v5518_v35, %v1142_v20  ;;  %v4367_v34 = vld [vmem:[%s5135_s19 + $0x3f0] ss:$28 sps:$4 sm:$0xff]  }
 0x10d   : > { %v5555_v26 = vpack.c.bf16 %v1176_v17, %v1172_v55  ;;  %v5557_v27 = vpack.c.bf16 %v1175_v61, %v1171_v19  ;;  %v1179_v15 = vadd.f32 %v5518_v35, %v1130_v48  ;;  %v1183_v42 = vadd.f32 %v5518_v35, %v1134_v12  ;;  %v4381_v61 = vld [vmem:[%s5135_s19 + $0x464] ss:$28 sps:$4 sm:$0xff]   ;;  %v4561_v48 = vld [vmem:[%s6701_s0 + $0x18] sm:$0xff] }
 0x10e   : > { %v5569_v3 = vpack.c.bf16 %v1184_v8, %v1180_v23  ;;  %v5576_v43 = vpack.c.bf16 %v1191_v2, %v1187_v31  ;;  %v5583_v14 = vrot.slane %v5496_v41, %v5436_v30  ;;  %v1188_v56 = vadd.f32 %v5514_v57, %v1139_v36  ;;  %v1075_v41 = vld [vmem:[%s6702_s1 + $0xc8] sm:$0x1]  ;;  %v4379_v23 = vld [vmem:[%s5135_s19 + $0x460] ss:$28 sps:$4 sm:$0xff]  }
 0x10f   : > { %2491 = vmatprep.mubr.bf16.mxu0 %v5555_v26  ;;  %2633 = vmatprep.mubr.bf16.mxu1 %v5555_v26  ;;  %v1192_v49 = vadd.f32 %v5514_v57, %v1143_v38  ;;  %v5597_v58 = vpack.c.bf16 %v1183_v42, %v1179_v15  ;;  %v1189_v20 = vadd.f32 %v5587_v4, %v1140_v6  ;;  %v4382_v8 = vld [vmem:[%s5135_s19 + $0x468] ss:$28 sps:$4 sm:$0xff]   ;;  %v4387_v36 = vld [vmem:[%s5135_s19 + $0x49c] ss:$28 sps:$4 sm:$0xff]   ;;  %v4393_v6 = vld [vmem:[%s5135_s19 + $0x4d4] ss:$28 sps:$4 sm:$0xff]  }
 0x110   : > { %2492 = vmatmul.mubr.bf16.vlgmr.msra.gmra.mrb[0].mxu0 %v5557_v27  ;;  %2634 = vmatmul.mubr.bf16.vlgmr.msra.gmra.mrb[0].mxu1 %v5557_v27  ;;  %v1190_v59 = vadd.f32 %v5583_v14, %v1141_v5  ;;  %v1194_v54 = vadd.f32 %v5583_v14, %v1145_v22  ;;  %v1193_v29 = vadd.f32 %v5587_v4, %v1144_v45  ;;  %v4385_v5 = vld [vmem:[%s5135_s19 + $0x498] ss:$28 sps:$4 sm:$0xff]   ;;  %v4388_v22 = vld [vmem:[%s5135_s19 + $0x4a0] ss:$28 sps:$4 sm:$0xff]   ;;  %v4391_v15 = vld [vmem:[%s5135_s19 + $0x4d0] ss:$28 sps:$4 sm:$0xff]  }
 0x111   : > { %2531 = vmatpush1.bf16.msra.mxu0 %v4355_v1  ;;  %2673 = vmatpush1.bf16.msra.mxu1 %v4358_v9  ;;  %v5611_v55 = vpack.c.bf16 %v1192_v49, %v1188_v56  ;;  %v1147_v17 = vadd.f32 %v1119_v7, %v1075_v41  ;;  %v4376_v9 = vld [vmem:[%s5135_s19 + $0x430] ss:$28 sps:$4 sm:$0xff]   ;;  %v1118_v19 = vmul.f32 %v5444_v18, %v5329_v24  ;;  %v1053_v18 = vld [vmem:[%s6702_s1 + $0x18] sm:$0xff]  ;;  %v4397_v56 = vld [vmem:[%s5135_s19 + $0x508] ss:$28 sps:$4 sm:$0xff]  }
 0x112   : > { %2532 = vmatprep.subr.bf16.mxu0 %v4363_v46  ;;  %2674 = vmatprep.subr.bf16.mxu1 %v4366_v32  ;;  %v5608_v53 = vpack.c.bf16 %v1194_v54, %v1190_v59  ;;  %v5613_v1 = vpack.c.bf16 %v1193_v29, %v1189_v20  ;;  %v4384_v46 = vld [vmem:[%s5135_s19 + $0x46c] ss:$28 sps:$4 sm:$0xff]   ;;  %v1097_v12 = vmul.f32 %v4561_v48, %v5507_v16  ;;  %v4405_v7 = vld [vmem:[%s5135_s19 + $0x544] ss:$28 sps:$4 sm:$0xff]   ;;  %v4411_v54 = vld [vmem:[%s5135_s19 + $0x57c] ss:$28 sps:$4 sm:$0xff]  }
 0x113   : > { %2501 = vmatprep.mubr.bf16.mxu0 %v5569_v3  ;;  %2643 = vmatprep.mubr.bf16.mxu1 %v5569_v3  ;;  %v1196_v24 = vadd.f32 %v5514_v57, %v1147_v17  ;;  %v1146_v32 = vadd.f32 %v1118_v19, %v1074_v13  ;;  %v1057_v57 = vld [vmem:[%s6702_s1 + $0x38] sm:$0xff]  ;;  %v4400_v49 = vld [vmem:[%s5135_s19 + $0x510] ss:$28 sps:$4 sm:$0xff]   ;;  %v4406_v59 = vld [vmem:[%s5135_s19 + $0x548] ss:$28 sps:$4 sm:$0xff]  }
 0x114   : > { %v1125_v31 = vadd.f32 %v1097_v12, %v1053_v18  ;;  %v1129_v2 = vadd.f32 %v1101_v25, %v1057_v57  ;;  %v4403_v41 = vld [vmem:[%s5135_s19 + $0x540] ss:$28 sps:$4 sm:$0xff]   ;;  %v4564_v17 = vld [vmem:[%s6701_s0 + $0x30] sm:$0xff] }
 0x115   : > { %2533 = vmatpush1.bf16.msra.mxu0 %v4361_v40  ;;  %2675 = vmatpush1.bf16.msra.mxu1 %v4364_v60  ;;  %v5646_v38 = vpack.c.bf16 %v1196_v24, %v1196_v24  ;;  %v1195_v10 = vadd.f32 %v5518_v35, %v1146_v32  ;;  %v4396_v40 = vld [vmem:[%s5135_s19 + $0x4dc] ss:$28 sps:$4 sm:$0xff]   ;;  %v4414_v20 = vld [vmem:[%s5135_s19 + $0x584] ss:$28 sps:$4 sm:$0xff]   ;;  %v1052_v19 = vld [vmem:[%s6702_s1 + $0x10] sm:$0xff] }
 0x116   : > { %2534 = vmatprep.subr.bf16.mxu0 %v4369_v47  ;;  %2676 = vmatprep.subr.bf16.mxu1 %v4372_v0  ;;  %v1174_v42 = vadd.f32 %v5583_v14, %v1125_v31  ;;  %v1178_v35 = vadd.f32 %v5583_v14, %v1129_v2  ;;  %v4394_v60 = vld [vmem:[%s5135_s19 + $0x4d8] ss:$28 sps:$4 sm:$0xff]   ;;  %v4399_v47 = vld [vmem:[%s5135_s19 + $0x50c] ss:$28 sps:$4 sm:$0xff]   ;;  %v4412_v29 = vld [vmem:[%s5135_s19 + $0x580] ss:$28 sps:$4 sm:$0xff]  }
 0x117   : > { %v5661_v45 = vpack.c.bf16 %v1195_v10, %v1195_v10  ;;  %v4402_v0 = vld [vmem:[%s5135_s19 + $0x514] ss:$28 sps:$4 sm:$0xff]   ;;  %v4566_v18 = vld [vmem:[%s6701_s0 + $0x78] sm:$0xff] }
 0x118   : > { %2502 = vmatmul.mubr.bf16.gmra.mrb[4].mxu0 %v5597_v58  ;;  %2644 = vmatmul.mubr.bf16.gmra.mrb[4].mxu1 %v5597_v58  ;;  %v4417_v13 = vld [vmem:[%s5135_s19 + $0x5b4] ss:$28 sps:$4 sm:$0xff]   ;;  %v1109_v48 = vmul.f32 %v4566_v18, %v5507_v16  ;;  %v1065_v25 = vld [vmem:[%s6702_s1 + $0x78] sm:$0xff] }
 0x119   : > { %2535 = vmatpush1.bf16.msra.mxu0 %v4367_v34  ;;  %2677 = vmatpush1.bf16.msra.mxu1 %v4370_v51  ;;  %v5665_v34 = vpack.c.bf16 %v1178_v35, %v1174_v42  ;;  %v4408_v51 = vld [vmem:[%s5135_s19 + $0x54c] ss:$28 sps:$4 sm:$0xff]   ;;  %v4418_v57 = vld [vmem:[%s5135_s19 + $0x5b8] ss:$28 sps:$4 sm:$0xff]   ;;  %v4437_v18 = vld [vmem:[%s5135_s19 + $0x80] ss:$28 sps:$4 sm:$0xff]  }
 0x11a   : > { %2536 = vmatprep.subr.bf16.mxu0 %v4375_v50  ;;  %2678 = vmatprep.subr.bf16.mxu1 %v4378_v21  ;;  %v4409_v50 = vld [vmem:[%s5135_s19 + $0x578] ss:$28 sps:$4 sm:$0xff]   ;;  %v4415_v32 = vld [vmem:[%s5135_s19 + $0x5b0] ss:$28 sps:$4 sm:$0xff]   ;;  %v1137_v2 = vadd.f32 %v1109_v48, %v1065_v25  ;;  %v4441_v48 = vld [vmem:[%s5135_s19 + $0x88] ss:$28 sps:$4 sm:$0xff]  }
 0x11b   : > { %2511 = vmatprep.mubr.bf16.mxu0 %v5611_v55  ;;  %2653 = vmatprep.mubr.bf16.mxu1 %v5611_v55  ;;  %v4563_v21 = vld [vmem:[%s6701_s0 + $0x10] sm:$0xff] }
 0x11c   : > { %v4424_v35 = vld [vmem:[%s5135_s19 + $0x5f0] ss:$28 sps:$4 sm:$0xff]  }
 0x11d   : > { %2537 = vmatpush1.bf16.msra.mxu0 %v4373_v63  ;;  %2679 = vmatpush1.bf16.msra.mxu1 %v4376_v9  ;;  %v1096_v63 = vmul.f32 %v4563_v21, %v5510_v52  ;;  %v1100_v9 = vmul.f32 %v4564_v17, %v5510_v52 }
 0x11e   : > { %2538 = vmatprep.subr.bf16.mxu0 %v4381_v61  ;;  %2680 = vmatprep.subr.bf16.mxu1 %v4384_v46  ;;  %v1056_v61 = vld [vmem:[%s6702_s1 + $0x30] sm:$0xff]  ;;  %v4420_v46 = vld [vmem:[%s5135_s19 + $0x5bc] ss:$28 sps:$4 sm:$0xff]  }
 0x11f   : > { %v1124_v12 = vadd.f32 %v1096_v63, %v1052_v19  ;;  %v1128_v11 = vadd.f32 %v1100_v9, %v1056_v61  ;;  %v4432_v9 = vld [vmem:[%s5135_s19 + $0x48] ss:$28 sps:$4 sm:$0xff]   ;;  %v4436_v19 = vld [vmem:[%s5135_s19 + $0x50] ss:$28 sps:$4 sm:$0xff]  }
 0x120   : > { %2512 = vmatmul.mubr.bf16.gmra.mrb[8].mxu0 %v5576_v43  ;;  %2654 = vmatmul.mubr.bf16.gmra.mrb[8].mxu1 %v5576_v43  ;;  %v4439_v61 = vld [vmem:[%s5135_s19 + $0x84] ss:$28 sps:$4 sm:$0xff]  }
 0x121   : > { %2539 = vmatpush1.bf16.msra.mxu0 %v4379_v23  ;;  %2681 = vmatpush1.bf16.msra.mxu1 %v4382_v8  ;;  %v1061_v23 = vld [vmem:[%s6702_s1 + $0x58] sm:$0xff]  ;;  %v1173_v10 = vadd.f32 %v5587_v4, %v1124_v12 }
 0x122   : > { %2540 = vmatprep.subr.bf16.mxu0 %v4387_v36  ;;  %2682 = vmatprep.subr.bf16.mxu1 %v4390_v37  ;;  %v4565_v8 = vld [vmem:[%s6701_s0 + $0x58] sm:$0xff]  ;;  %v4423_v36 = vld [vmem:[%s5135_s19 + $0x5ec] ss:$28 sps:$4 sm:$0xff]   ;;  %v4426_v37 = vld [vmem:[%s5135_s19 + $0x5f4] ss:$28 sps:$4 sm:$0xff]  }
 0x123   : > { %2521 = vmatprep.mubr.bf16.mxu0 %v5646_v38  ;;  %2663 = vmatprep.mubr.bf16.mxu1 %v5646_v38  ;;  %v1105_v24 = vmul.f32 %v4565_v8, %v5507_v16  ;;  %v4444_v12 = vld [vmem:[%s5135_s19 + $0xbc] ss:$28 sps:$4 sm:$0xff]  }
 0x125   : > { %2541 = vmatpush1.bf16.msra.mxu0 %v4385_v5  ;;  %2683 = vmatpush1.bf16.msra.mxu1 %v4388_v22  ;;  %v1133_v31 = vadd.f32 %v1105_v24, %v1061_v23  ;;  %v4421_v5 = vld [vmem:[%s5135_s19 + $0x5e8] ss:$28 sps:$4 sm:$0xff]   ;;  %v1177_v22 = vadd.f32 %v5587_v4, %v1128_v11  ;;  %v1077_v24 = vld [vmem:[%s6702_s1 + $0xd8] sm:$0x1]  ;;  %v4445_v11 = vld [vmem:[%s5135_s19 + $0x280] ss:$28 sps:$4 sm:$0xff]  }
 0x126   : > { %2542 = vmatprep.subr.bf16.mxu0 %v4393_v6  ;;  %2684 = vmatprep.subr.bf16.mxu1 %v4396_v40  ;;  %v4567_v6 = vld [vmem:[%s6701_s0 + $0x50] sm:$0xff] }
 0x127   : > { %v1104_v40 = vmul.f32 %v4567_v6, %v5510_v52  ;;  %v4454_v6 = vld [vmem:[%s5135_s19 + $0x12c] ss:$28 sps:$4 sm:$0xff]  }
 0x128   : > { %2522 = vmatmul.mubr.bf16.gmra.mrb[12].mxu0 %v5661_v45  ;;  %2664 = vmatmul.mubr.bf16.gmra.mrb[12].mxu1 %v5661_v45 }
 0x129   : > { %2543 = vmatpush1.bf16.msra.mxu0 %v4391_v15  ;;  %2685 = vmatpush1.bf16.msra.mxu1 %v4394_v60  ;;  %v4568_v15 = vld [vmem:[%s6701_s0 + $0x70] sm:$0xff] }
 0x12a   : > { %2544 = vmatprep.subr.bf16.mxu0 %v4399_v47  ;;  %2686 = vmatprep.subr.bf16.mxu1 %v4402_v0  ;;  %v1108_v42 = vmul.f32 %v4568_v15, %v5510_v52  ;;  %v1060_v60 = vld [vmem:[%s6702_s1 + $0x50] sm:$0xff] }
 0x12b   : > { %4121 = vmatprep.mubr.msk.bf16.mxu0 %vm857_vm0, %v5665_v34  ;;  %4125 = vmatprep.mubr.msk.bf16.mxu1 %vm857_vm0, %v5665_v34  ;;  %v1064_v47 = vld [vmem:[%s6702_s1 + $0x70] sm:$0xff] }
 0x12c   : > { %v4429_v0 = vld [vmem:[%s5135_s19 + $0x14] ss:$28 sps:$4 sm:$0xff]  }
 0x12d   : > { %2545 = vmatpush1.bf16.msra.mxu0 %v4397_v56  ;;  %2687 = vmatpush1.bf16.msra.mxu1 %v4400_v49  ;;  %v4430_v56 = vld [vmem:[%s5135_s19 + $0x1d8] ss:$28 sps:$4 sm:$0xff]   ;;  %v1182_v49 = vadd.f32 %v5583_v14, %v1133_v31 }
 0x12e   : > { %2546 = vmatprep.subr.bf16.mxu0 %v4405_v7  ;;  %2688 = vmatprep.subr.bf16.mxu1 %v4408_v51  ;;  %v1186_v7 = vadd.f32 %v5583_v14, %v1137_v2  ;;  %v5739_v51 = vpack.c.bf16 %v1177_v22, %v1173_v10  ;;  %v4449_v31 = vld [vmem:[%s5135_s19 + $0xf4] ss:$28 sps:$4 sm:$0xff]  }
 0x12f   : > { %v4450_v2 = vld [vmem:[%s5135_s19 + $0x2b8] ss:$28 sps:$4 sm:$0xff]   ;;  %v4447_v10 = vld [vmem:[%s5135_s19 + $0xf0] ss:$28 sps:$4 sm:$0xff]  }
 0x130   : > { %v5745_v21 = vpack.c.bf16 %v1186_v7, %v1182_v49  ;;  %v4451_v22 = vld [vmem:[%s5135_s19 + $0xf8] ss:$28 sps:$4 sm:$0xff]   ;;  %v4465_v7 = vld [vmem:[%s5135_s19 + $0x360] ss:$28 sps:$4 sm:$0xff]  }
 0x131   : > { %2547 = vmatpush1.bf16.msra.mxu0 %v4403_v41  ;;  %2689 = vmatpush1.bf16.msra.mxu1 %v4406_v59  ;;  %v1132_v41 = vadd.f32 %v1104_v40, %v1060_v60  ;;  %v1136_v59 = vadd.f32 %v1108_v42, %v1064_v47  ;;  %v4455_v40 = vld [vmem:[%s5135_s19 + $0x2f0] ss:$28 sps:$4 sm:$0xff]   ;;  %v4452_v42 = vld [vmem:[%s5135_s19 + $0x128] ss:$28 sps:$4 sm:$0xff]   ;;  %v4464_v49 = vld [vmem:[%s5135_s19 + $0x19c] ss:$28 sps:$4 sm:$0xff]  }
 0x132   : > { %2548 = vmatprep.subr.bf16.mxu0 %v4411_v54  ;;  %2690 = vmatprep.subr.bf16.mxu1 %v4414_v20  ;;  %v4427_v54 = vld [vmem:[%s5135_s19 + $0x10] ss:$28 sps:$4 sm:$0xff]   ;;  %v4431_v20 = vld [vmem:[%s5135_s19 + $0x18] ss:$28 sps:$4 sm:$0xff]   ;;  %v4459_v60 = vld [vmem:[%s5135_s19 + $0x164] ss:$28 sps:$4 sm:$0xff]  }
 0x133   : > { %v1181_v63 = vadd.f32 %v5587_v4, %v1132_v41  ;;  %v1185_v17 = vadd.f32 %v5587_v4, %v1136_v59  ;;  %v4460_v47 = vld [vmem:[%s5135_s19 + $0x328] ss:$28 sps:$4 sm:$0xff]   ;;  %v4462_v41 = vld [vmem:[%s5135_s19 + $0x198] ss:$28 sps:$4 sm:$0xff]   ;;  %v4466_v59 = vld [vmem:[%s5135_s19 + $0x1a0] ss:$28 sps:$4 sm:$0xff]  }
 0x135   : > { %2549 = vmatpush1.bf16.msra.mxu0 %v4409_v50  ;;  %2691 = vmatpush1.bf16.msra.mxu1 %v4412_v29  ;;  %v4434_v50 = vld [vmem:[%s5135_s19 + $0x4c] ss:$28 sps:$4 sm:$0xff]   ;;  %v5763_v8 = vpack.c.bf16 %v1185_v17, %v1181_v63 }
 0x136   : > { %2550 = vmatprep.subr.bf16.mxu0 %v4417_v13  ;;  %2692 = vmatprep.subr.bf16.mxu1 %v4420_v46  ;;  %v4435_v29 = vld [vmem:[%s5135_s19 + $0x210] ss:$28 sps:$4 sm:$0xff]   ;;  %v4440_v13 = vld [vmem:[%s5135_s19 + $0x248] ss:$28 sps:$4 sm:$0xff]   ;;  %v4569_v46 = vld [vmem:[%s6701_s0 + $0xd8] sm:$0x1] }
 0x137   : > { %v1121_v23 = vmul.f32 %v4569_v46, %v5507_v16  ;;  %v4570_v16 = vld [vmem:[%s6701_s0 + $0xd0] sm:$0x1]  ;;  %v4473_v63 = vld [vmem:[%s5135_s19 + $0x20c] ss:$28 sps:$4 sm:$0xff]   ;;  %v4479_v46 = vld [vmem:[%s5135_s19 + $0x278] ss:$28 sps:$4 sm:$0xff]  }
 0x138   : > { %v4471_v17 = vld [vmem:[%s5135_s19 + $0x208] ss:$28 sps:$4 sm:$0xff]  }
 0x139   : > { %2551 = vmatpush1.bf16.msra.mxu0 %v4415_v32  ;;  %2693 = vmatpush1.bf16.msra.mxu1 %v4418_v57  ;;  %v1149_v25 = vadd.f32 %v1121_v23, %v1077_v24  ;;  %v1120_v32 = vmul.f32 %v4570_v16, %v5510_v52  ;;  %v4442_v57 = vld [vmem:[%s5135_s19 + $0xb8] ss:$28 sps:$4 sm:$0xff]   ;;  %v4482_v23 = vld [vmem:[%s5135_s19 + $0x440] ss:$28 sps:$4 sm:$0xff]  }
 0x13a   : > { %2552 = vmatprep.subr.bf16.mxu0 %v4423_v36  ;;  %2694 = vmatprep.subr.bf16.mxu1 %v4426_v37  ;;  %v4446_v36 = vld [vmem:[%s5135_s19 + $0xc0] ss:$28 sps:$4 sm:$0xff]   ;;  %v1076_v37 = vld [vmem:[%s6702_s1 + $0xd0] sm:$0x1] }
 0x13b   : > { %v1198_v52 = vadd.f32 %v5583_v14, %v1149_v25  ;;  %v4485_v24 = vld [vmem:[%s5135_s19 + $0x2b4] ss:$28 sps:$4 sm:$0xff]   ;;  %v4493_v16 = vld [vmem:[%s5135_s19 + $0x324] ss:$28 sps:$4 sm:$0xff]  }
 0x13c   : > { %v4490_v25 = vld [vmem:[%s5135_s19 + $0x4b0] ss:$28 sps:$4 sm:$0xff]  }
 0x13d   : > { %2553 = vmatpush1.bf16.msra.mxu0 %v4421_v5  ;;  %2695 = vmatpush1.bf16.msra.mxu1 %v4424_v35  ;;  %v1148_v5 = vadd.f32 %v1120_v32, %v1076_v37  ;;  %v5794_v15 = vpack.c.bf16 %v1198_v52, %v1198_v52  ;;  %v4456_v35 = vld [vmem:[%s5135_s19 + $0x130] ss:$28 sps:$4 sm:$0xff]   ;;  %v4491_v32 = vld [vmem:[%s5135_s19 + $0x320] ss:$28 sps:$4 sm:$0xff]   ;;  %v4495_v37 = vld [vmem:[%s5135_s19 + $0x358] ss:$28 sps:$4 sm:$0xff]  }
 0x13e   : > { %2743 = vmatprep.subr.bf16.mxu0 %v4429_v0  ;;  %4142 = vmatprep.subr.bf16.mxu1 %v4430_v56  ;;  %v4461_v56 = vld [vmem:[%s5135_s19 + $0x168] ss:$28 sps:$4 sm:$0xff]   ;;  %v4499_v52 = vld [vmem:[%s5135_s19 + $0x390] ss:$28 sps:$4 sm:$0xff]  }
 0x13f   : > { %v1197_v14 = vadd.f32 %v5587_v4, %v1148_v5  ;;  %v4457_v4 = vld [vmem:[%s5135_s19 + $0x160] ss:$28 sps:$4 sm:$0xff]   ;;  %v4502_v5 = vld [vmem:[%s5135_s19 + $0x558] ss:$28 sps:$4 sm:$0xff]  }
 0x140   : > { %2563 = vmatmul.mubr.bf16.vlgmr.msra.gmra.mrb[0].mxu0 %v5739_v51  ;;  %2705 = vmatmul.mubr.bf16.vlgmr.msra.gmra.mrb[0].mxu1 %v5739_v51 }
 0x141   : > { %2744 = vmatpush1.bf16.msra.mxu0 %v4427_v54  ;;  %4143 = vmatpush3.bf16.msra.mxu1 %v4431_v20  ;;  %v5807_v0 = vpack.c.bf16 %v1197_v14, %v1197_v14  ;;  %v4469_v54 = vld [vmem:[%s5135_s19 + $0x1d4] ss:$28 sps:$4 sm:$0xff]   ;;  %v4507_v14 = vld [vmem:[%s5135_s19 + $0x400] ss:$28 sps:$4 sm:$0xff]  }
 0x142   : > { %2745 = vmatprep.subr.bf16.mxu0 %v4434_v50  ;;  %4144 = vmatprep.subr.bf16.mxu1 %v4435_v29  ;;  %v4467_v20 = vld [vmem:[%s5135_s19 + $0x1d0] ss:$28 sps:$4 sm:$0xff]   ;;  %v4470_v50 = vld [vmem:[%s5135_s19 + $0x398] ss:$28 sps:$4 sm:$0xff]   ;;  %v4596_v29 = vmov 0  }
 0x143   : > { %4122 = vmatprep.mubr.msk.bf16.mxu0 %vm857_vm0, %v5745_v21  ;;  %4126 = vmatprep.mubr.msk.bf16.mxu1 %vm857_vm0, %v5745_v21 }
 0x145   : > { %2746 = vmatpush1.bf16.msra.mxu0 %v4432_v9  ;;  %4145 = vmatpush3.bf16.msra.mxu1 %v4436_v19  ;;  %v4477_v9 = vld [vmem:[%s5135_s19 + $0x244] ss:$28 sps:$4 sm:$0xff]  }
 0x146   : > { %2747 = vmatprep.subr.bf16.mxu0 %v4439_v61  ;;  %4146 = vmatprep.subr.bf16.mxu1 %v4440_v13  ;;  %v4475_v19 = vld [vmem:[%s5135_s19 + $0x240] ss:$28 sps:$4 sm:$0xff]   ;;  %v4478_v61 = vld [vmem:[%s5135_s19 + $0x408] ss:$28 sps:$4 sm:$0xff]  }
 0x147   : > { %v4481_v13 = vld [vmem:[%s5135_s19 + $0x27c] ss:$28 sps:$4 sm:$0xff]  }
 0x148   : > { %2573 = vmatmul.mubr.bf16.gmra.mrb[4].mxu0 %v5763_v8  ;;  %2715 = vmatmul.mubr.bf16.gmra.mrb[4].mxu1 %v5763_v8 }
 0x149   : > { %2748 = vmatpush1.bf16.msra.mxu0 %v4437_v18  ;;  %4147 = vmatpush3.bf16.msra.mxu1 %v4441_v48  ;;  %v4483_v18 = vld [vmem:[%s5135_s19 + $0x2b0] ss:$28 sps:$4 sm:$0xff]   ;;  %v4486_v48 = vld [vmem:[%s5135_s19 + $0x478] ss:$28 sps:$4 sm:$0xff]  }
 0x14a   : > { %2749 = vmatprep.subr.bf16.mxu0 %v4444_v12  ;;  %4148 = vmatprep.subr.bf16.mxu1 %v4445_v11  ;;  %v4489_v12 = vld [vmem:[%s5135_s19 + $0x2ec] ss:$28 sps:$4 sm:$0xff]  }
 0x14b   : > { %4123 = vmatprep.mubr.msk.bf16.mxu0 %vm857_vm0, %v5608_v53  ;;  %4127 = vmatprep.mubr.msk.bf16.mxu1 %vm857_vm0, %v5608_v53  ;;  %v4487_v11 = vld [vmem:[%s5135_s19 + $0x2e8] ss:$28 sps:$4 sm:$0xff]  }
 0x14d   : > { %2750 = vmatpush1.bf16.msra.mxu0 %v4442_v57  ;;  %4149 = vmatpush3.bf16.msra.mxu1 %v4446_v36  ;;  %v4494_v57 = vld [vmem:[%s5135_s19 + $0x4e8] ss:$28 sps:$4 sm:$0xff]   ;;  %v4497_v36 = vld [vmem:[%s5135_s19 + $0x35c] ss:$28 sps:$4 sm:$0xff]  }
 0x14e   : > { %2751 = vmatprep.subr.bf16.mxu0 %v4449_v31  ;;  %4150 = vmatprep.subr.bf16.mxu1 %v4450_v2  ;;  %v4498_v31 = vld [vmem:[%s5135_s19 + $0x520] ss:$28 sps:$4 sm:$0xff]   ;;  %v4501_v2 = vld [vmem:[%s5135_s19 + $0x394] ss:$28 sps:$4 sm:$0xff]  }
 0x150   : > { %2583 = vmatmul.mubr.bf16.gmra.mrb[8].mxu0 %v5613_v1  ;;  %2725 = vmatmul.mubr.bf16.gmra.mrb[8].mxu1 %v5613_v1 }
 0x151   : > { %2752 = vmatpush1.bf16.msra.mxu0 %v4447_v10  ;;  %4151 = vmatpush3.bf16.msra.mxu1 %v4451_v22  ;;  %v4505_v10 = vld [vmem:[%s5135_s19 + $0x3cc] ss:$28 sps:$4 sm:$0xff]  }
 0x152   : > { %2753 = vmatprep.subr.bf16.mxu0 %v4454_v6  ;;  %4152 = vmatprep.subr.bf16.mxu1 %v4455_v40  ;;  %v4503_v22 = vld [vmem:[%s5135_s19 + $0x3c8] ss:$28 sps:$4 sm:$0xff]   ;;  %v4506_v6 = vld [vmem:[%s5135_s19 + $0x590] ss:$28 sps:$4 sm:$0xff]  }
 0x153   : > { %4124 = vmatprep.mubr.msk.bf16.mxu0 %vm857_vm0, %v5794_v15  ;;  %4128 = vmatprep.mubr.msk.bf16.mxu1 %vm857_vm0, %v5794_v15  ;;  %v4509_v40 = vld [vmem:[%s5135_s19 + $0x404] ss:$28 sps:$4 sm:$0xff]  }
 0x155   : > { %2754 = vmatpush1.bf16.msra.mxu0 %v4452_v42  ;;  %4153 = vmatpush3.bf16.msra.mxu1 %v4456_v35  ;;  %v4510_v42 = vld [vmem:[%s5135_s19 + $0x5c8] ss:$28 sps:$4 sm:$0xff]   ;;  %v4511_v35 = vld [vmem:[%s5135_s19 + $0x438] ss:$28 sps:$4 sm:$0xff]  }
 0x156   : > { %2755 = vmatprep.subr.bf16.mxu0 %v4459_v60  ;;  %4154 = vmatprep.subr.bf16.mxu1 %v4460_v47  ;;  %v4514_v60 = vld [vmem:[%s5135_s19 + $0x600] ss:$28 sps:$4 sm:$0xff]   ;;  %v4515_v47 = vld [vmem:[%s5135_s19 + $0x470] ss:$28 sps:$4 sm:$0xff]  }
 0x158   : > { %2593 = vmatmul.mubr.bf16.gmra.mrb[12].mxu0 %v5807_v0  ;;  %2735 = vmatmul.mubr.bf16.gmra.mrb[12].mxu1 %v5807_v0 }
 0x159   : > { %2756 = vmatpush1.bf16.msra.mxu0 %v4457_v4  ;;  %4155 = vmatpush3.bf16.msra.mxu1 %v4461_v56  ;;  %v4520_v4 = vld [vmem:[%s5135_s19 + $0x4ac] ss:$28 sps:$4 sm:$0xff]   ;;  %v4521_v56 = vld [vmem:[%s5135_s19 + $0x4e0] ss:$28 sps:$4 sm:$0xff]  }
 0x15a   : > { %2757 = vmatprep.subr.bf16.mxu0 %v4464_v49  ;;  %4156 = vmatprep.subr.bf16.mxu1 %v4465_v7  ;;  %v4526_v49 = vld [vmem:[%s5135_s19 + $0x51c] ss:$28 sps:$4 sm:$0xff]   ;;  %v4527_v7 = vld [vmem:[%s5135_s19 + $0x550] ss:$28 sps:$4 sm:$0xff]  }
 0x15b   : > { %2917 = vmatprep.mubr.bf16.mxu1 %v5555_v26  ;;  %2775 = vmatprep.mubr.bf16.mxu0 %v5555_v26  ;;  %v4474_v26 = vld [vmem:[%s5135_s19 + $0x3d0] ss:$28 sps:$4 sm:$0xff]  }
 0x15d   : > { %2758 = vmatpush1.bf16.msra.mxu0 %v4462_v41  ;;  %4157 = vmatpush3.bf16.msra.mxu1 %v4466_v59  ;;  %v4532_v41 = vld [vmem:[%s5135_s19 + $0x58c] ss:$28 sps:$4 sm:$0xff]   ;;  %v4535_v59 = vld [vmem:[%s5135_s19 + $0x5c4] ss:$28 sps:$4 sm:$0xff]  }
 0x15e   : > { %2759 = vmatprep.subr.bf16.mxu0 %v4469_v54  ;;  %2949 = vmatprep.subr.bf16.mxu1 %v4596_v29  ;;  %v4533_v54 = vld [vmem:[%s5135_s19 + $0x5c0] ss:$28 sps:$4 sm:$0xff]  }
 0x160   : > { %2918 = vmatmul.mubr.bf16.vlgmr.msra.gmra.mrb[16].mxu1 %v5557_v27 }
 0x161   : > { %2760 = vmatpush1.bf16.msra.mxu0 %v4467_v20  ;;  %2950 = vmatpush1.bf16.msra.mxu1 %v4470_v50  ;;  %v4538_v20 = vld [vmem:[%s5135_s19 + $0x5fc] ss:$28 sps:$4 sm:$0xff]  }
 0x162   : > { %2761 = vmatprep.subr.bf16.mxu0 %v4473_v63  ;;  %2951 = vmatprep.subr.bf16.mxu1 %v4596_v29 }
 0x163   : > { %2925 = vmatprep.mubr.bf16.mxu1 %v5569_v3 }
 0x165   : > { %2762 = vmatpush1.bf16.msra.mxu0 %v4471_v17  ;;  %2952 = vmatpush1.bf16.msra.mxu1 %v4474_v26 }
 0x166   : > { %2763 = vmatprep.subr.bf16.mxu0 %v4477_v9  ;;  %2953 = vmatprep.subr.bf16.mxu1 %v4596_v29 }
 0x168   : > { %2926 = vmatmul.mubr.bf16.gmra.mrb[20].mxu1 %v5597_v58 }
 0x169   : > { %2764 = vmatpush1.bf16.msra.mxu0 %v4475_v19  ;;  %2954 = vmatpush1.bf16.msra.mxu1 %v4478_v61 }
 0x16a   : > { %2765 = vmatprep.subr.bf16.mxu0 %v4481_v13  ;;  %2955 = vmatprep.subr.bf16.mxu1 %v4596_v29 }
 0x16b   : > { %2933 = vmatprep.mubr.bf16.mxu1 %v5611_v55 }
 0x16d   : > { %2766 = vmatpush1.bf16.msra.mxu0 %v4479_v46  ;;  %2956 = vmatpush1.bf16.msra.mxu1 %v4482_v23 }
 0x16e   : > { %2767 = vmatprep.subr.bf16.mxu0 %v4485_v24  ;;  %2957 = vmatprep.subr.bf16.mxu1 %v4596_v29 }
 0x170   : > { %2934 = vmatmul.mubr.bf16.gmra.mrb[24].mxu1 %v5576_v43 }
 0x171   : > { %2768 = vmatpush1.bf16.msra.mxu0 %v4483_v18  ;;  %2958 = vmatpush1.bf16.msra.mxu1 %v4486_v48 }
 0x172   : > { %2769 = vmatprep.subr.bf16.mxu0 %v4489_v12  ;;  %2959 = vmatprep.subr.bf16.mxu1 %v4596_v29 }
 0x173   : > { %2941 = vmatprep.mubr.bf16.mxu1 %v5646_v38 }
 0x175   : > { %2770 = vmatpush1.bf16.msra.mxu0 %v4487_v11  ;;  %2960 = vmatpush1.bf16.msra.mxu1 %v4490_v25 }
 0x176   : > { %2771 = vmatprep.subr.bf16.mxu0 %v4493_v16  ;;  %2961 = vmatprep.subr.bf16.mxu1 %v4596_v29 }
 0x178   : > { %2942 = vmatmul.mubr.bf16.gmra.mrb[28].mxu1 %v5661_v45 }
 0x179   : > { %2772 = vmatpush1.bf16.msra.mxu0 %v4491_v32  ;;  %2962 = vmatpush1.bf16.msra.mxu1 %v4494_v57 }
 0x17a   : > { %2773 = vmatprep.subr.bf16.mxu0 %v4497_v36  ;;  %2963 = vmatprep.subr.bf16.mxu1 %v4596_v29 }
 0x17b   : > { %4133 = vmatprep.mubr.msk.bf16.mxu1 %vm857_vm0, %v5665_v34 }
 0x17d   : > { %2774 = vmatpush1.bf16.msra.mxu0 %v4495_v37  ;;  %2964 = vmatpush1.bf16.msra.mxu1 %v4498_v31 }
 0x17e   : > { %2814 = vmatprep.subr.bf16.mxu0 %v4501_v2  ;;  %2965 = vmatprep.subr.bf16.mxu1 %v4596_v29 }
 0x180   : > { %2776 = vmatmul.mubr.bf16.vlgmr.msra.gmra.mrb[16].mxu0 %v5557_v27  ;;  %v4513_v27 = vld [vmem:[%s5135_s19 + $0x43c] ss:$28 sps:$4 sm:$0xff]  }
 0x181   : > { %2815 = vmatpush1.bf16.msra.mxu0 %v4499_v52  ;;  %2966 = vmatpush1.bf16.msra.mxu1 %v4502_v5 }
 0x182   : > { %2816 = vmatprep.subr.bf16.mxu0 %v4505_v10  ;;  %2967 = vmatprep.subr.bf16.mxu1 %v4596_v29 }
 0x183   : > { %2785 = vmatprep.mubr.bf16.mxu0 %v5569_v3  ;;  %v4517_v3 = vld [vmem:[%s5135_s19 + $0x474] ss:$28 sps:$4 sm:$0xff]  }
 0x185   : > { %2817 = vmatpush1.bf16.msra.mxu0 %v4503_v22  ;;  %2968 = vmatpush1.bf16.msra.mxu1 %v4506_v6 }
 0x186   : > { %2818 = vmatprep.subr.bf16.mxu0 %v4509_v40  ;;  %2969 = vmatprep.subr.bf16.mxu1 %v4596_v29 }
 0x188   : > { %2786 = vmatmul.mubr.bf16.gmra.mrb[20].mxu0 %v5597_v58  ;;  %v4518_v58 = vld [vmem:[%s5135_s19 + $0x4a8] ss:$28 sps:$4 sm:$0xff]  }
 0x189   : > { %2819 = vmatpush1.bf16.msra.mxu0 %v4507_v14  ;;  %2970 = vmatpush1.bf16.msra.mxu1 %v4510_v42 }
 0x18a   : > { %2820 = vmatprep.subr.bf16.mxu0 %v4513_v27  ;;  %2971 = vmatprep.subr.bf16.mxu1 %v4596_v29 }
 0x18b   : > { %2795 = vmatprep.mubr.bf16.mxu0 %v5611_v55  ;;  %v4523_v55 = vld [vmem:[%s5135_s19 + $0x4e4] ss:$28 sps:$4 sm:$0xff]  }
 0x18d   : > { %2821 = vmatpush1.bf16.msra.mxu0 %v4511_v35  ;;  %2972 = vmatpush1.bf16.msra.mxu1 %v4514_v60 }
 0x18e   : > { %2822 = vmatprep.subr.bf16.mxu0 %v4517_v3 }
 0x190   : > { %2982 = vmatmul.mubr.bf16.vlgmr.msra.gmra.mrb[32].mxu1 %v5739_v51  ;;  %2796 = vmatmul.mubr.bf16.gmra.mrb[24].mxu0 %v5576_v43  ;;  %v4524_v43 = vld [vmem:[%s5135_s19 + $0x518] ss:$28 sps:$4 sm:$0xff]  }
 0x191   : > { %2823 = vmatpush1.bf16.msra.mxu0 %v4515_v47  ;;  %4134 = vmatprep.mubr.msk.bf16.mxu1 %vm857_vm0, %v5745_v21 }
 0x192   : > { %2824 = vmatprep.subr.bf16.mxu0 %v4520_v4  ;;  %2805 = vmatprep.mubr.bf16.mxu0 %v5646_v38  ;;  %v4529_v38 = vld [vmem:[%s5135_s19 + $0x554] ss:$28 sps:$4 sm:$0xff]  }
 0x195   : > { %2825 = vmatpush1.bf16.msra.mxu0 %v4518_v58 }
 0x196   : > { %2826 = vmatprep.subr.bf16.mxu0 %v4523_v55 }
 0x198   : > { %2990 = vmatmul.mubr.bf16.gmra.mrb[36].mxu1 %v5763_v8  ;;  %2806 = vmatmul.mubr.bf16.gmra.mrb[28].mxu0 %v5661_v45  ;;  %v4530_v45 = vld [vmem:[%s5135_s19 + $0x588] ss:$28 sps:$4 sm:$0xff]  }
 0x199   : > { %2827 = vmatpush1.bf16.msra.mxu0 %v4521_v56  ;;  %4135 = vmatprep.mubr.msk.bf16.mxu1 %vm857_vm0, %v5608_v53 }
 0x19a   : > { %2828 = vmatprep.subr.bf16.mxu0 %v4526_v49  ;;  %4129 = vmatprep.mubr.msk.bf16.mxu0 %vm857_vm0, %v5665_v34  ;;  %v4536_v34 = vld [vmem:[%s5135_s19 + $0x5f8] ss:$28 sps:$4 sm:$0xff]   ;;  %s777_s19 = smul.u32 7, %s4653_s27 }
 0x19c   : > { %p6076_p10 = scmp.lt.s32.totalorder %s777_s19, 13 }
 0x19d   : > { %2829 = vmatpush1.bf16.msra.mxu0 %v4524_v43 }
 0x19e   : > { %2830 = vmatprep.subr.bf16.mxu0 %v4529_v38  ;;  %s6775_s19 = smov (!%p6076_p10, %s777_s19), 13 }
 0x19f   : > { %s780_s26 = scalar_lea.vmem %s6706_s5, %s6775_s19  ;;  %s785_s10 = scalar_lea.vmem %s6707_s6, %s6775_s19 }
 0x1a0   : > { %2998 = vmatmul.mubr.bf16.gmra.mrb[40].mxu1 %v5613_v1 }
 0x1a1   : > { %2831 = vmatpush1.bf16.msra.mxu0 %v4527_v7  ;;  %4136 = vmatprep.mubr.msk.bf16.mxu1 %vm857_vm0, %v5794_v15 }
 0x1a2   : > { %2832 = vmatprep.subr.bf16.mxu0 %v4532_v41 }
 0x1a5   : > { %2833 = vmatpush1.bf16.msra.mxu0 %v4530_v45 }
 0x1a6   : > { %2834 = vmatprep.subr.bf16.mxu0 %v4535_v59 }
 0x1a8   : > { %3006 = vmatmul.mubr.bf16.gmra.mrb[44].mxu1 %v5807_v0 }
 0x1a9   : > { %2835 = vmatpush1.bf16.msra.mxu0 %v4533_v54 }
 0x1aa   : > { %2836 = vmatprep.subr.bf16.mxu0 %v4538_v20 }
 0x1ad   : > { %2837 = vmatpush1.bf16.msra.mxu0 %v4536_v34 }
 0x1b0   : > { %2847 = vmatmul.mubr.bf16.vlgmr.msra.gmra.mrb[16].mxu0 %v5739_v51 }
 0x1b1   : > { %4130 = vmatprep.mubr.msk.bf16.mxu0 %vm857_vm0, %v5745_v21 }
 0x1b8   : > { %2857 = vmatmul.mubr.bf16.gmra.mrb[20].mxu0 %v5763_v8 }
 0x1b9   : > { %4131 = vmatprep.mubr.msk.bf16.mxu0 %vm857_vm0, %v5608_v53 }
 0x1c0   : > { %2867 = vmatmul.mubr.bf16.gmra.mrb[24].mxu0 %v5613_v1 }
 0x1c1   : > { %4132 = vmatprep.mubr.msk.bf16.mxu0 %vm857_vm0, %v5794_v15 }
 0x1c8   : > { %2877 = vmatmul.mubr.bf16.gmra.mrb[28].mxu0 %v5807_v0 }
 0x213   : > { %v5921_v50 = vpop.f32.mrb[0].mxu0  ;;  %v5923_v29 = vpop.f32.mrb[0].mxu1 }
 0x214   : > { %v5925_v51 = vpop.f32.mrb[1].mxu0  ;;  %v5927_v63 = vpop.f32.mrb[1].mxu1  ;;  %v3111_v21 = vmul.f32 %v5921_v50, %v5921_v50  ;;  %v3113_v53 = vmul.f32 %v5923_v29, %v5923_v29 }
 0x215   : > { %v3112_v1 = vmul.f32 %v5925_v51, %v5925_v51  ;;  %v3114_v8 = vmul.f32 %v5927_v63, %v5927_v63  ;;  %v5937_v15 = vpop.f32.mrb[2].mxu0  ;;  %v5939_v0 = vpop.f32.mrb[2].mxu1 }
 0x216   : > { %v3013_v17 = vadd.f32 %v5937_v15, %v5921_v50  ;;  %v3118_v26 = vmul.f32 %v5937_v15, %v5937_v15  ;;  %v3039_v9 = vadd.f32 %v5939_v0, %v5923_v29  ;;  %v3120_v19 = vmul.f32 %v5939_v0, %v5939_v0  ;;  %v5949_v61 = vpop.f32.mrb[3].mxu0  ;;  %v5951_v13 = vpop.f32.mrb[3].mxu1 }
 0x217   : > { %v3026_v46 = vadd.f32 %v5949_v61, %v5925_v51  ;;  %v3119_v23 = vmul.f32 %v5949_v61, %v5949_v61  ;;  %v3052_v24 = vadd.f32 %v5951_v13, %v5927_v63  ;;  %v3121_v18 = vmul.f32 %v5951_v13, %v5951_v13 }
 0x218   : > { %v3160_v48 = vadd.f32 %v3118_v26, %v3111_v21  ;;  %v3186_v12 = vadd.f32 %v3120_v19, %v3113_v53 }
 0x219   : > { %v3173_v11 = vadd.f32 %v3119_v23, %v3112_v1  ;;  %v3199_v25 = vadd.f32 %v3121_v18, %v3114_v8 }
 0x21b   : > { %v5961_v16 = vpop.f32.mrb[4].mxu0  ;;  %v5963_v32 = vpop.f32.mrb[4].mxu1 }
 0x21c   : > { %v3014_v57 = vadd.f32 %v3013_v17, %v5961_v16  ;;  %v3125_v36 = vmul.f32 %v5961_v16, %v5961_v16  ;;  %v3040_v37 = vadd.f32 %v3039_v9, %v5963_v32  ;;  %v3127_v31 = vmul.f32 %v5963_v32, %v5963_v32  ;;  %v5971_v2 = vpop.f32.mrb[5].mxu0  ;;  %v5973_v52 = vpop.f32.mrb[5].mxu1 }
 0x21d   : > { %v3027_v5 = vadd.f32 %v3026_v46, %v5971_v2  ;;  %v3126_v10 = vmul.f32 %v5971_v2, %v5971_v2  ;;  %v3053_v22 = vadd.f32 %v3052_v24, %v5973_v52  ;;  %v3128_v6 = vmul.f32 %v5973_v52, %v5973_v52  ;;  %v5981_v40 = vpop.f32.mrb[6].mxu0  ;;  %v5983_v14 = vpop.f32.mrb[6].mxu1 }
 0x21e   : > { %v3161_v42 = vadd.f32 %v3160_v48, %v3125_v36  ;;  %v3187_v27 = vadd.f32 %v3186_v12, %v3127_v31  ;;  %v3015_v35 = vadd.f32 %v3014_v57, %v5981_v40  ;;  %v3132_v60 = vmul.f32 %v5981_v40, %v5981_v40  ;;  %v5988_v3 = vpop.f32.mrb[7].mxu0  ;;  %v5990_v47 = vpop.f32.mrb[7].mxu1 }
 0x21f   : > { %v3174_v4 = vadd.f32 %v3173_v11, %v3126_v10  ;;  %v3200_v58 = vadd.f32 %v3199_v25, %v3128_v6  ;;  %v3041_v55 = vadd.f32 %v3040_v37, %v5983_v14  ;;  %v3134_v56 = vmul.f32 %v5983_v14, %v5983_v14 }
 0x220   : > { %v3162_v49 = vadd.f32 %v3161_v42, %v3132_v60  ;;  %v3028_v43 = vadd.f32 %v3027_v5, %v5988_v3  ;;  %v3133_v38 = vmul.f32 %v5988_v3, %v5988_v3  ;;  %v3054_v7 = vadd.f32 %v3053_v22, %v5990_v47 }
 0x221   : > { %v3188_v41 = vadd.f32 %v3187_v27, %v3134_v56  ;;  %v3135_v45 = vmul.f32 %v5990_v47, %v5990_v47 }
 0x222   : > { %v3175_v59 = vadd.f32 %v3174_v4, %v3133_v38 }
 0x223   : > { %v3201_v54 = vadd.f32 %v3200_v58, %v3135_v45  ;;  %v6001_v20 = vpop.f32.mrb[8].mxu0  ;;  %v6003_v34 = vpop.f32.mrb[8].mxu1 }
 0x224   : > { %v3016_v21 = vadd.f32 %v3015_v35, %v6001_v20  ;;  %v3139_v53 = vmul.f32 %v6001_v20, %v6001_v20  ;;  %v3042_v1 = vadd.f32 %v3041_v55, %v6003_v34  ;;  %v3141_v8 = vmul.f32 %v6003_v34, %v6003_v34  ;;  %v6011_v17 = vpop.f32.mrb[9].mxu0  ;;  %v6013_v26 = vpop.f32.mrb[9].mxu1 }
 0x225   : > { %6717 = vst [vmem:[#allocation5_spill] sm:$0xff] %v6013_v26  ;;  %v3029_v9 = vadd.f32 %v3028_v43, %v6011_v17  ;;  %v3140_v19 = vmul.f32 %v6011_v17, %v6011_v17  ;;  %v3055_v46 = vadd.f32 %v3054_v7, %v6013_v26  ;;  %v3142_v23 = vmul.f32 %v6013_v26, %v6013_v26  ;;  %v6021_v24 = vpop.f32.mrb[10].mxu0  ;;  %v6023_v18 = vpop.f32.mrb[10].mxu1 }
 0x226   : > { %v3163_v48 = vadd.f32 %v3162_v49, %v3139_v53  ;;  %v3189_v12 = vadd.f32 %v3188_v41, %v3141_v8  ;;  %v3017_v11 = vadd.f32 %v3016_v21, %v6021_v24  ;;  %v3146_v25 = vmul.f32 %v6021_v24, %v6021_v24  ;;  %v6028_v57 = vpop.f32.mrb[11].mxu0  ;;  %v6030_v36 = vpop.f32.mrb[11].mxu1 }
 0x227   : > { %6718 = vst [vmem:[#allocation6_spill] sm:$0xff] %v6030_v36  ;;  %v3176_v37 = vadd.f32 %v3175_v59, %v3140_v19  ;;  %v3202_v31 = vadd.f32 %v3201_v54, %v3142_v23  ;;  %v3043_v5 = vadd.f32 %v3042_v1, %v6023_v18  ;;  %v3148_v10 = vmul.f32 %v6023_v18, %v6023_v18 }
 0x228   : > { %v3164_v22 = vadd.f32 %v3163_v48, %v3146_v25  ;;  %v3030_v6 = vadd.f32 %v3029_v9, %v6028_v57  ;;  %v3147_v42 = vmul.f32 %v6028_v57, %v6028_v57  ;;  %v3056_v27 = vadd.f32 %v3055_v46, %v6030_v36 }
 0x229   : > { %v3190_v35 = vadd.f32 %v3189_v12, %v3148_v10  ;;  %v3149_v60 = vmul.f32 %v6030_v36, %v6030_v36 }
 0x22a   : > { %v3177_v4 = vadd.f32 %v3176_v37, %v3147_v42 }
 0x22b   : > { %v3203_v58 = vadd.f32 %v3202_v31, %v3149_v60  ;;  %v6041_v55 = vpop.f32.mrb[12].mxu0  ;;  %v6043_v56 = vpop.f32.mrb[12].mxu1 }
 0x22c   : > { %v3018_v49 = vsel %vm822_vm1, %v6041_v55, 0.0  ;;  %v3153_v43 = vmul.f32 %v6041_v55, %v6041_v55  ;;  %v3044_v38 = vsel %vm822_vm1, %v6043_v56, 0.0  ;;  %v3155_v7 = vmul.f32 %v6043_v56, %v6043_v56  ;;  %v6053_v41 = vpop.f32.mrb[13].mxu0  ;;  %v6055_v45 = vpop.f32.mrb[13].mxu1 }
 0x22d   : > { %6719 = vst [vmem:[#allocation7_spill] sm:$0xff] %v6055_v45  ;;  %v3019_v59 = vadd.f32 %v3018_v49, %v3017_v11  ;;  %v3045_v54 = vadd.f32 %v3044_v38, %v3043_v5  ;;  %v3031_v21 = vsel %vm822_vm1, %v6053_v41, 0.0  ;;  %v3154_v53 = vmul.f32 %v6053_v41, %v6053_v41  ;;  %v2598_v1 = vpop.f32.mrb[14].mxu0  ;;  %v2740_v8 = vpop.f32.mrb[14].mxu1 }
 0x22e   : > { %v3165_v9 = vsel %vm822_vm1, %v3153_v43, 0.0  ;;  %v3191_v19 = vsel %vm822_vm1, %v3155_v7, 0.0  ;;  %v3032_v46 = vadd.f32 %v3031_v21, %v3030_v6  ;;  %v3057_v23 = vsel %vm822_vm1, %v6055_v45, 0.0  ;;  %v2599_v48 = vpop.f32.mrb[15].mxu0  ;;  %v2741_v12 = vpop.f32.mrb[15].mxu1 }
 0x22f   : > { %v3020_v11 = vrot.slane %v3019_v59, 4  ;;  %v3166_v25 = vadd.f32 %v3165_v9, %v3164_v22  ;;  %v3046_v37 = vrot.slane %v3045_v54, 4  ;;  %v3192_v31 = vadd.f32 %v3191_v19, %v3190_v35 }
 0x230   : > { %v3033_v5 = vrot.slane %v3032_v46, 4  ;;  %v3178_v10 = vsel %vm822_vm1, %v3154_v53, 0.0  ;;  %v3058_v42 = vadd.f32 %v3057_v23, %v3056_v27  ;;  %v3156_v60 = vmul.f32 %v6055_v45, %v6055_v45 }
 0x231   : > { %v3021_v49 = vadd.f32 %v3020_v11, %v3019_v59  ;;  %v3167_v43 = vrot.slane %v3166_v25, 4  ;;  %v3047_v38 = vadd.f32 %v3046_v37, %v3045_v54  ;;  %v3193_v6 = vrot.slane %v3192_v31, 4 }
 0x232   : > { %v3034_v7 = vadd.f32 %v3033_v5, %v3032_v46  ;;  %v3179_v21 = vadd.f32 %v3178_v10, %v3177_v4  ;;  %v3059_v1 = vrot.slane %v3058_v42, 4  ;;  %v3204_v8 = vsel %vm822_vm1, %v3156_v60, 0.0 }
 0x233   : > { %v3022_v48 = vrot.slane %v3021_v49, 2  ;;  %v3168_v22 = vadd.f32 %v3167_v43, %v3166_v25  ;;  %v3048_v9 = vrot.slane %v3047_v38, 2  ;;  %v3194_v35 = vadd.f32 %v3193_v6, %v3192_v31  ;;  %v4158_v19 = vpop.f32.mrb[16].mxu1 }
 0x234   : > { %v3035_v12 = vrot.slane %v3034_v7, 2  ;;  %v3180_v53 = vrot.slane %v3179_v21, 4  ;;  %v3060_v27 = vadd.f32 %v3059_v1, %v3058_v42  ;;  %v3205_v23 = vadd.f32 %v3204_v8, %v3203_v58  ;;  %v4159_v33 = vpop.f32.mrb[17].mxu1 }
 0x235   : > { %v3023_v59 = vadd.f32 %v3022_v48, %v3021_v49  ;;  %v3169_v11 = vrot.slane %v3168_v22, 2  ;;  %v3049_v54 = vadd.f32 %v3048_v9, %v3047_v38  ;;  %v3195_v37 = vrot.slane %v3194_v35, 2  ;;  %v4161_v46 = vpop.f32.mrb[18].mxu1 }
 0x236   : > { %v3036_v4 = vadd.f32 %v3035_v12, %v3034_v7  ;;  %v3181_v5 = vadd.f32 %v3180_v53, %v3179_v21  ;;  %v3061_v10 = vrot.slane %v3060_v27, 2  ;;  %v3206_v60 = vrot.slane %v3205_v23, 4  ;;  %v4162_v45 = vpop.f32.mrb[19].mxu1 }
 0x237   : > { %v3024_v25 = vrot.slane %v3023_v59, 1  ;;  %v3170_v43 = vadd.f32 %v3169_v11, %v3168_v22  ;;  %v3050_v31 = vrot.slane %v3049_v54, 1  ;;  %v3196_v6 = vadd.f32 %v3195_v37, %v3194_v35 }
 0x238   : > { %v3037_v36 = vrot.slane %v3036_v4, 1  ;;  %v3182_v42 = vrot.slane %v3181_v5, 2  ;;  %v3062_v58 = vadd.f32 %v3061_v10, %v3060_v27  ;;  %v3207_v1 = vadd.f32 %v3206_v60, %v3205_v23 }
 0x239   : > { %v3025_v49 = vadd.f32 %v3024_v25, %v3023_v59  ;;  %v3171_v8 = vrot.slane %v3170_v43, 1  ;;  %v3051_v38 = vadd.f32 %v3050_v31, %v3049_v54  ;;  %v3197_v48 = vrot.slane %v3196_v6, 1 }
 0x23a   : > { %v3038_v9 = vadd.f32 %v3037_v36, %v3036_v4  ;;  %v3183_v7 = vadd.f32 %v3182_v42, %v3181_v5  ;;  %v3063_v21 = vrot.slane %v3062_v58, 1  ;;  %v3208_v12 = vrot.slane %v3207_v1, 2 }
 0x23b   : > { %v6070_v53 = vmul.f32 0.020408163, %v3025_v49  ;;  %v3172_v26 = vadd.f32 %v3171_v8, %v3170_v43  ;;  %v6072_v22 = vmul.f32 0.020408163, %v3051_v38  ;;  %v3198_v35 = vadd.f32 %v3197_v48, %v3196_v6  ;;  %v4164_v11 = vpop.f32.mrb[20].mxu1 }
 0x23c   : > { %v6080_v27 = vmul.f32 0.020408163, %v3038_v9  ;;  %v3184_v23 = vrot.slane %v3183_v7, 1  ;;  %v3064_v59 = vadd.f32 %v3063_v21, %v3062_v58  ;;  %v3209_v36 = vadd.f32 %v3208_v12, %v3207_v1  ;;  %v4165_v54 = vpop.f32.mrb[21].mxu1 }
 0x23d   : > { %v3251_v37 = vmul.f32 0.020408163, %v3172_v26  ;;  %v3258_v4 = vmul.f32 %v6070_v53, %v6070_v53  ;;  %v3253_v5 = vmul.f32 0.020408163, %v3198_v35  ;;  %v3260_v10 = vmul.f32 %v6072_v22, %v6072_v22  ;;  %v4167_v60 = vpop.f32.mrb[22].mxu1 }
 0x23e   : > { %v3185_v25 = vadd.f32 %v3184_v23, %v3183_v7  ;;  %v3259_v43 = vmul.f32 %v6080_v27, %v6080_v27  ;;  %v6088_v31 = vmul.f32 0.020408163, %v3064_v59  ;;  %v3210_v6 = vrot.slane %v3209_v36, 1  ;;  %v4168_v42 = vpop.f32.mrb[23].mxu1 }
 0x23f   : > { %v3265_v58 = vsub.f32 %v3251_v37, %v3258_v4  ;;  %v3267_v1 = vsub.f32 %v3253_v5, %v3260_v10  ;;  %v6090_v49 = vadd.f32 %v4159_v33, %v4158_v19  ;;  %v6092_v26 = vadd.f32 %v4162_v45, %v4161_v46  ;;  %v6112_v37 = vld [vmem:[%s780_s26] sm:$0xff] }
 0x240   : > { %v3252_v8 = vmul.f32 0.020408163, %v3185_v25  ;;  %v3211_v38 = vadd.f32 %v3210_v6, %v3209_v36  ;;  %v3261_v48 = vmul.f32 %v6088_v31, %v6088_v31  ;;  %v6102_v9 = vadd.f32 %v4165_v54, %v4164_v11 }
 0x241   : > { %v3272_v7 = vadd.f32 1e-05, %v3265_v58  ;;  %v3274_v21 = vadd.f32 1e-05, %v3267_v1  ;;  %v6104_v12 = vadd.f32 %v4168_v42, %v4167_v60  ;;  %v3291_v5 = vrot.slane %v6112_v37, %v5421_v39 }
 0x242   : > { %v3266_v33 = vsub.f32 %v3252_v8, %v3259_v43  ;;  %v3254_v19 = vmul.f32 0.020408163, %v3211_v38  ;;  %v3299_v10 = vrot.slane %v6112_v37, %v5431_v44  ;;  %v3295_v6 = vrot.slane %v6112_v37, %v5427_v28 }
 0x243   : > { %4547 = vrsqrt.f32 %v3272_v7  ;;  %v4170_v45 = vpop.f32.mrb[24].mxu1 }
 0x244   : > { %4549 = vrsqrt.f32 %v3274_v21  ;;  %v3273_v46 = vadd.f32 1e-05, %v3266_v33  ;;  %v3268_v35 = vsub.f32 %v3254_v19, %v3261_v48  ;;  %v4171_v23 = vpop.f32.mrb[25].mxu1 }
 0x245   : > { %v6110_v59 = vadd.f32 %v4171_v23, %v4170_v45  ;;  %v4173_v11 = vpop.f32.mrb[26].mxu1 }
 0x246   : > { %4551 = vrsqrt.f32 %v3273_v46  ;;  %v3275_v36 = vadd.f32 1e-05, %v3268_v35  ;;  %v4174_v54 = vpop.f32.mrb[27].mxu1  ;;  %v3303_v35 = vrot.slane %v6112_v37, %v5436_v30 }
 0x247   : > { %v6114_v4 = vadd.f32 %v4174_v54, %v4173_v11 }
 0x248   : > { %4553 = vrsqrt.f32 %v3275_v36 }
 0x24b   : > { %v4176_v60 = vpop.f32.mrb[28].mxu1 }
 0x24c   : > { %v4177_v25 = vpop.f32.mrb[29].mxu1 }
 0x24d   : > { %v4548_v43 = vpop.eup %4547  ;;  %v6122_v42 = vadd.f32 %v4177_v25, %v4176_v60  ;;  %v4179_v58 = vpop.f32.mrb[30].mxu1 }
 0x24e   : > { %v4550_v1 = vpop.eup %4549  ;;  %v3323_v8 = vmul.f32 %v4548_v43, %v3291_v5  ;;  %v4180_v38 = vpop.f32.mrb[31].mxu1  ;;  %v6738_v58 = vld [vmem:[#allocation5_spill] sm:$0xff] }
 0x24f   : > { %v3325_v48 = vmul.f32 %v4550_v1, %v3299_v10  ;;  %v6740_v1 = vld [vmem:[#allocation6_spill] sm:$0xff]  ;;  %v6742_v38 = vld [vmem:[#allocation7_spill] sm:$0xff] }
 0x250   : > { %v4552_v7 = vpop.eup %4551  ;;  %v3331_v21 = vmul.f32 %v3323_v8, %v6070_v53  ;;  %v3398_v33 = vrot.slane %v3323_v8, %v5421_v39 }
 0x251   : > { %v3333_v19 = vmul.f32 %v3325_v48, %v6072_v22  ;;  %v3406_v45 = vrot.slane %v3325_v48, %v5421_v39  ;;  %v3324_v46 = vmul.f32 %v4552_v7, %v3295_v6 }
 0x252   : > { %v6131_v23 = vmul.f32 %v3398_v33, %v5921_v50  ;;  %v6134_v11 = vmul.f32 %v3398_v33, %v5937_v15  ;;  %v6137_v36 = vmul.f32 %v3398_v33, %v5961_v16  ;;  %v6140_v53 = vmul.f32 %v3398_v33, %v5981_v40  ;;  %v4554_v54 = vpop.eup %4553 }
 0x253   : > { %v6143_v22 = vmul.f32 %v3398_v33, %v6001_v20  ;;  %v6146_v5 = vmul.f32 %v3398_v33, %v6021_v24  ;;  %v6149_v10 = vmul.f32 %v3398_v33, %v6041_v55  ;;  %v6152_v50 = vmul.f32 %v3406_v45, %v5923_v29 }
 0x254   : > { %6721 = vst [vmem:[#allocation8_spill] sm:$0xff] %v6137_v36  ;;  %6722 = vst [vmem:[#allocation9_spill] sm:$0xff] %v6140_v53  ;;  %v6155_v15 = vmul.f32 %v3406_v45, %v5939_v0  ;;  %v6158_v16 = vmul.f32 %v3406_v45, %v5963_v32  ;;  %v6161_v40 = vmul.f32 %v3406_v45, %v5983_v14 }
 0x255   : > { %6723 = vst [vmem:[#allocation10_spill] sm:$0xff] %v6143_v22  ;;  %6724 = vst [vmem:[#allocation11_spill] sm:$0xff] %v6146_v5  ;;  %v6164_v20 = vmul.f32 %v3406_v45, %v6003_v34  ;;  %v6167_v24 = vmul.f32 %v3406_v45, %v6023_v18  ;;  %v6170_v55 = vmul.f32 %v3406_v45, %v6043_v56 }
 0x256   : > { %6725 = vst [vmem:[#allocation12_spill] sm:$0xff] %v6149_v10  ;;  %6726 = vst [vmem:[#allocation13_spill] sm:$0xff] %v6158_v16  ;;  %v3332_v29 = vmul.f32 %v3324_v46, %v6080_v27  ;;  %v3402_v0 = vrot.slane %v3324_v46, %v5421_v39  ;;  %v3326_v60 = vmul.f32 %v4554_v54, %v3303_v35 }
 0x257   : > { %6727 = vst [vmem:[#allocation14_spill] sm:$0xff] %v6161_v40  ;;  %6728 = vst [vmem:[#allocation15_spill] sm:$0xff] %v6164_v20 }
 0x258   : > { %6729 = vst [vmem:[#allocation16_spill] sm:$0xff] %v6167_v24  ;;  %6730 = vst [vmem:[#allocation17_spill] sm:$0xff] %v6170_v55  ;;  %v3345_v25 = vcombine.low %v3331_v21, %v3332_v29  ;;  %v6175_v32 = vmul.f32 %v3402_v0, %v5925_v51  ;;  %v6178_v14 = vmul.f32 %v3402_v0, %v5949_v61 }
 0x259   : > { %v6181_v34 = vmul.f32 %v3402_v0, %v5971_v2  ;;  %v6184_v18 = vmul.f32 %v3402_v0, %v5988_v3  ;;  %v6187_v56 = vmul.f32 %v3402_v0, %v6011_v17  ;;  %v6190_v27 = vmul.f32 %v3402_v0, %v6028_v57 }
 0x25a   : > { %v6193_v43 = vmul.f32 %v3402_v0, %v6053_v41  ;;  %v3334_v51 = vmul.f32 %v3326_v60, %v6088_v31  ;;  %v3410_v61 = vrot.slane %v3326_v60, %v5421_v39  ;;  %v6198_v6 = vrot.slane %v3345_v25, %v5441_v62 }
 0x25b   : > { %6731 = vst [vmem:[#allocation18_spill] sm:$0xff] %v6181_v34  ;;  %6732 = vst [vmem:[#allocation19_spill] sm:$0xff] %v6184_v18 }
 0x25c   : > { %6733 = vst [vmem:[#allocation20_spill] sm:$0xff] %v6187_v56  ;;  %6734 = vst [vmem:[#allocation21_spill] sm:$0xff] %v6190_v27  ;;  %v3346_v2 = vcombine.low %v3333_v19, %v3334_v51  ;;  %v6201_v3 = vmul.f32 %v3410_v61, %v5927_v63  ;;  %v6204_v17 = vmul.f32 %v3410_v61, %v5951_v13 }
 0x25d   : > { %6735 = vst [vmem:[#allocation22_spill] sm:$0xff] %v6193_v43  ;;  %v6207_v57 = vmul.f32 %v3410_v61, %v5973_v52  ;;  %v6210_v41 = vmul.f32 %v3410_v61, %v5990_v47  ;;  %v6213_v31 = vmul.f32 %v3410_v61, %v6738_v58  ;;  %v6216_v8 = vmul.f32 %v3410_v61, %v6740_v1 }
 0x25e   : > { %v6219_v48 = vmul.f32 %v3410_v61, %v6742_v38  ;;  %v6222_v63 = vrot.slane %v3346_v2, %v5441_v62 }
 0x25f   : > { %6736 = vst [vmem:[#allocation23_spill] sm:$0xff] %v6207_v57  ;;  %6737 = vst [vmem:[#allocation24_spill] sm:$0xff] %v6210_v41 }
 0x260   : > { %6739 = vst [vmem:[#allocation5_spill] sm:$0xff] %v6213_v31  ;;  %6741 = vst [vmem:[#allocation6_spill] sm:$0xff] %v6216_v8 }
 0x261   : > { %6743 = vst [vmem:[#allocation7_spill] sm:$0xff] %v6219_v48 }
 0x263   : > { %v2983_v52 = vpop.f32.mrb[32].mxu1 }
 0x264   : > { %v6227_v7 = vadd.f32 %v6090_v49, %v2983_v52  ;;  %v2985_v47 = vpop.f32.mrb[33].mxu1 }
 0x265   : > { %v2986_v21 = vpop.f32.mrb[34].mxu1 }
 0x266   : > { %v6230_v33 = vadd.f32 %v6092_v26, %v2986_v21  ;;  %v2988_v19 = vpop.f32.mrb[35].mxu1  ;;  %v3117_v45 = vmul.f32 %v6227_v7, %v6227_v7 }
 0x268   : > { %v3091_v46 = vadd.f32 %v6230_v33, %v6227_v7  ;;  %v3124_v35 = vmul.f32 %v6230_v33, %v6230_v33 }
 0x26a   : > { %v3238_v54 = vadd.f32 %v3124_v35, %v3117_v45 }
 0x26b   : > { %v2991_v29 = vpop.f32.mrb[36].mxu1 }
 0x26c   : > { %v6239_v49 = vadd.f32 %v6102_v9, %v2991_v29  ;;  %v2993_v0 = vpop.f32.mrb[37].mxu1 }
 0x26d   : > { %v2994_v60 = vpop.f32.mrb[38].mxu1 }
 0x26e   : > { %v3092_v26 = vadd.f32 %v3091_v46, %v6239_v49  ;;  %v3131_v25 = vmul.f32 %v6239_v49, %v6239_v49  ;;  %v6245_v51 = vadd.f32 %v6104_v12, %v2994_v60  ;;  %v2996_v61 = vpop.f32.mrb[39].mxu1 }
 0x270   : > { %v3239_v2 = vadd.f32 %v3238_v54, %v3131_v25  ;;  %v3093_v58 = vadd.f32 %v3092_v26, %v6245_v51  ;;  %v3138_v1 = vmul.f32 %v6245_v51, %v6245_v51 }
 0x272   : > { %v3240_v38 = vadd.f32 %v3239_v2, %v3138_v1 }
 0x273   : > { %v2999_v9 = vpop.f32.mrb[40].mxu1 }
 0x274   : > { %v6251_v52 = vadd.f32 %v6110_v59, %v2999_v9  ;;  %v3001_v47 = vpop.f32.mrb[41].mxu1 }
 0x275   : > { %v3002_v21 = vpop.f32.mrb[42].mxu1 }
 0x276   : > { %v3094_v19 = vadd.f32 %v3093_v58, %v6251_v52  ;;  %v3145_v12 = vmul.f32 %v6251_v52, %v6251_v52  ;;  %v6257_v45 = vadd.f32 %v6114_v4, %v3002_v21  ;;  %v3004_v46 = vpop.f32.mrb[43].mxu1 }
 0x278   : > { %v3241_v35 = vadd.f32 %v3240_v38, %v3145_v12  ;;  %v3095_v54 = vadd.f32 %v3094_v19, %v6257_v45  ;;  %v3152_v29 = vmul.f32 %v6257_v45, %v6257_v45 }
 0x27a   : > { %v3242_v0 = vadd.f32 %v3241_v35, %v3152_v29 }
 0x27b   : > { %v3007_v59 = vpop.f32.mrb[44].mxu1 }
 0x27c   : > { %v6263_v60 = vadd.f32 %v6122_v42, %v3007_v59  ;;  %v3009_v26 = vpop.f32.mrb[45].mxu1 }
 0x27d   : > { %v3010_v25 = vpop.f32.mrb[46].mxu1 }
 0x27e   : > { %v3096_v61 = vsel %vm822_vm1, %v6263_v60, 0.0  ;;  %v3159_v4 = vmul.f32 %v6263_v60, %v6263_v60  ;;  %v3011_v2 = vpop.f32.mrb[47].mxu1 }
 0x27f   : > { %v3097_v58 = vadd.f32 %v3096_v61, %v3095_v54 }
 0x280   : > { %v3243_v1 = vsel %vm822_vm1, %v3159_v4, 0.0 }
 0x281   : > { %v3098_v38 = vrot.slane %v3097_v58, 4  ;;  %v3244_v9 = vadd.f32 %v3243_v1, %v3242_v0 }
 0x283   : > { %v3099_v47 = vadd.f32 %v3098_v38, %v3097_v58  ;;  %v3245_v21 = vrot.slane %v3244_v9, 4  ;;  %v6270_v19 = vpop.f32.mrb[16].mxu0 }
 0x284   : > { %v6272_v42 = vpop.f32.mrb[17].mxu0  ;;  %v3115_v29 = vmul.f32 %v6270_v19, %v6270_v19 }
 0x285   : > { %v3100_v12 = vrot.slane %v3099_v47, 2  ;;  %v3246_v46 = vadd.f32 %v3245_v21, %v3244_v9  ;;  %v6274_v35 = vpop.f32.mrb[18].mxu0  ;;  %v3116_v54 = vmul.f32 %v6272_v42, %v6272_v42 }
 0x286   : > { %v3065_v59 = vadd.f32 %v6274_v35, %v6270_v19  ;;  %v3122_v0 = vmul.f32 %v6274_v35, %v6274_v35  ;;  %v6284_v26 = vpop.f32.mrb[19].mxu0 }
 0x287   : > { %v3101_v25 = vadd.f32 %v3100_v12, %v3099_v47  ;;  %v3247_v61 = vrot.slane %v3246_v46, 2  ;;  %v3078_v4 = vadd.f32 %v6284_v26, %v6272_v42  ;;  %v3123_v2 = vmul.f32 %v6284_v26, %v6284_v26 }
 0x288   : > { %v3212_v58 = vadd.f32 %v3122_v0, %v3115_v29 }
 0x289   : > { %v3102_v1 = vrot.slane %v3101_v25, 1  ;;  %v3248_v38 = vadd.f32 %v3247_v61, %v3246_v46  ;;  %v3225_v9 = vadd.f32 %v3123_v2, %v3116_v54 }
 0x28b   : > { %v3103_v21 = vadd.f32 %v3102_v1, %v3101_v25  ;;  %v3249_v13 = vrot.slane %v3248_v38, 1  ;;  %v6290_v48 = vpop.f32.mrb[20].mxu0 }
 0x28c   : > { %v3066_v55 = vadd.f32 %v3065_v59, %v6290_v48  ;;  %v3129_v47 = vmul.f32 %v6290_v48, %v6290_v48  ;;  %v6295_v12 = vpop.f32.mrb[21].mxu0 }
 0x28d   : > { %v3110_v43 = vmul.f32 0.020408163, %v3103_v21  ;;  %v3250_v10 = vadd.f32 %v3249_v13, %v3248_v38  ;;  %v3079_v8 = vadd.f32 %v3078_v4, %v6295_v12  ;;  %v3130_v29 = vmul.f32 %v6295_v12, %v6295_v12  ;;  %v6300_v46 = vpop.f32.mrb[22].mxu0 }
 0x28e   : > { %v3213_v54 = vadd.f32 %v3212_v58, %v3129_v47  ;;  %v3067_v0 = vadd.f32 %v3066_v55, %v6300_v46  ;;  %v3136_v59 = vmul.f32 %v6300_v46, %v6300_v46  ;;  %v6305_v25 = vpop.f32.mrb[23].mxu0 }
 0x28f   : > { %v3257_v61 = vmul.f32 0.020408163, %v3250_v10  ;;  %v3264_v2 = vmul.f32 %v3110_v43, %v3110_v43  ;;  %v3226_v1 = vadd.f32 %v3225_v9, %v3130_v29  ;;  %v3080_v13 = vadd.f32 %v3079_v8, %v6305_v25 }
 0x290   : > { %v3214_v38 = vadd.f32 %v3213_v54, %v3136_v59  ;;  %v3137_v4 = vmul.f32 %v6305_v25, %v6305_v25 }
 0x291   : > { %v3271_v21 = vsub.f32 %v3257_v61, %v3264_v2 }
 0x292   : > { %v3227_v24 = vadd.f32 %v3226_v1, %v3137_v4  ;;  %v6744_v1 = vld [vmem:[#allocation4_spill] sm:$0xff] }
 0x293   : > { %v3278_v27 = vadd.f32 1e-05, %v3271_v21  ;;  %v6310_v58 = vpop.f32.mrb[24].mxu0 }
 0x294   : > { %v3068_v55 = vadd.f32 %v3067_v0, %v6310_v58  ;;  %v3143_v47 = vmul.f32 %v6310_v58, %v6310_v58  ;;  %v6315_v5 = vpop.f32.mrb[25].mxu0 }
 0x295   : > { %4555 = vrsqrt.f32 %v3278_v27  ;;  %v3081_v10 = vadd.f32 %v3080_v13, %v6315_v5  ;;  %v3144_v8 = vmul.f32 %v6315_v5, %v6315_v5  ;;  %v6320_v9 = vpop.f32.mrb[26].mxu0  ;;  %v6714_v13 = vsub.s32 6, %v6744_v1 }
 0x296   : > { %v3215_v29 = vadd.f32 %v3214_v38, %v3143_v47  ;;  %v3069_v54 = vadd.f32 %v3068_v55, %v6320_v9  ;;  %v3150_v59 = vmul.f32 %v6320_v9, %v6320_v9  ;;  %v6325_v0 = vpop.f32.mrb[27].mxu0 }
 0x297   : > { %v3228_v61 = vadd.f32 %v3227_v24, %v3144_v8  ;;  %v3082_v2 = vadd.f32 %v3081_v10, %v6325_v0  ;;  %v3151_v27 = vmul.f32 %v6325_v0, %v6325_v0  ;;  %v3315_v38 = vrot.slane %v6112_v37, %v6714_v13 }
 0x298   : > { %v3216_v4 = vadd.f32 %v3215_v29, %v3150_v59 }
 0x299   : > { %v3229_v21 = vadd.f32 %v3228_v61, %v3151_v27 }
 0x29b   : > { %v6331_v31 = vpop.f32.mrb[28].mxu0 }
 0x29c   : > { %v3070_v55 = vsel %vm822_vm1, %v6331_v31, 0.0  ;;  %v3157_v24 = vmul.f32 %v6331_v31, %v6331_v31  ;;  %v6340_v47 = vpop.f32.mrb[29].mxu0 }
 0x29d   : > { %v3071_v10 = vadd.f32 %v3070_v55, %v3069_v54  ;;  %v3083_v8 = vsel %vm822_vm1, %v6340_v47, 0.0  ;;  %v3158_v29 = vmul.f32 %v6340_v47, %v6340_v47  ;;  %v2882_v59 = vpop.f32.mrb[30].mxu0 }
 0x29e   : > { %v3217_v61 = vsel %vm822_vm1, %v3157_v24, 0.0  ;;  %v3084_v27 = vadd.f32 %v3083_v8, %v3082_v2  ;;  %v2883_v13 = vpop.f32.mrb[31].mxu0 }
 0x29f   : > { %v4556_v20 = vpop.eup %4555  ;;  %v3072_v56 = vrot.slane %v3071_v10, 4  ;;  %v3218_v22 = vadd.f32 %v3217_v61, %v3216_v4  ;;  %v3230_v41 = vsel %vm822_vm1, %v3158_v29, 0.0 }
 0x2a0   : > { %v3329_v40 = vmul.f32 %v4556_v20, %v3315_v38  ;;  %v3085_v18 = vrot.slane %v3084_v27, 4  ;;  %v3231_v53 = vadd.f32 %v3230_v41, %v3229_v21 }
 0x2a1   : > { %v3073_v54 = vadd.f32 %v3072_v56, %v3071_v10  ;;  %v3219_v55 = vrot.slane %v3218_v22, 4 }
 0x2a2   : > { %v6348_v57 = vmul.f32 %v3329_v40, %v3110_v43  ;;  %v3422_v16 = vrot.slane %v3329_v40, %v5421_v39  ;;  %v3086_v34 = vadd.f32 %v3085_v18, %v3084_v27  ;;  %v3232_v59 = vrot.slane %v3231_v53, 4 }
 0x2a3   : > { %v3074_v36 = vrot.slane %v3073_v54, 2  ;;  %v3220_v24 = vadd.f32 %v3219_v55, %v3218_v22 }
 0x2a4   : > { %v6352_v2 = vmul.f32 %v3422_v16, %v6227_v7  ;;  %v6355_v13 = vmul.f32 %v3422_v16, %v6230_v33  ;;  %v6358_v20 = vmul.f32 %v3422_v16, %v6239_v49  ;;  %v6361_v56 = vmul.f32 %v3422_v16, %v6245_v51 }
 0x2a5   : > { %v6364_v43 = vmul.f32 %v3422_v16, %v6251_v52  ;;  %v6367_v40 = vmul.f32 %v3422_v16, %v6257_v45  ;;  %v6370_v22 = vmul.f32 %v3422_v16, %v6263_v60  ;;  %v3075_v18 = vadd.f32 %v3074_v36, %v3073_v54 }
 0x2a6   : > { %v3221_v41 = vrot.slane %v3220_v24, 2  ;;  %v3087_v7 = vrot.slane %v3086_v34, 2  ;;  %v3233_v33 = vadd.f32 %v3232_v59, %v3231_v53 }
 0x2a7   : > { %6745 = vst [vmem:[#allocation4_spill] sm:$0xff] %v6367_v40  ;;  %6746 = vst [vmem:[#allocation25_spill] sm:$0xff] %v6370_v22  ;;  %v3076_v4 = vrot.slane %v3075_v18, 1 }
 0x2a8   : > { %v3222_v21 = vadd.f32 %v3221_v41, %v3220_v24  ;;  %v3088_v49 = vadd.f32 %v3087_v7, %v3086_v34  ;;  %v3234_v38 = vrot.slane %v3233_v33, 2  ;;  %v3306_v24 = vsub.s32 4, %v6744_v1 }
 0x2a9   : > { %v3077_v10 = vadd.f32 %v3076_v4, %v3075_v18  ;;  %v3310_v18 = vsub.s32 5, %v6744_v1 }
 0x2aa   : > { %v3223_v51 = vrot.slane %v3222_v21, 1  ;;  %v3089_v8 = vrot.slane %v3088_v49, 1  ;;  %v3235_v29 = vadd.f32 %v3234_v38, %v3233_v33  ;;  %v3307_v41 = vrot.slane %v6112_v37, %v3306_v24 }
 0x2ab   : > { %v3108_v52 = vmul.f32 0.020408163, %v3077_v10  ;;  %v3311_v7 = vrot.slane %v6112_v37, %v3310_v18 }
 0x2ac   : > { %v3224_v61 = vadd.f32 %v3223_v51, %v3222_v21  ;;  %v3090_v27 = vadd.f32 %v3089_v8, %v3088_v49  ;;  %v3236_v45 = vrot.slane %v3235_v29, 1 }
 0x2ad   : > { %v3262_v40 = vmul.f32 %v3108_v52, %v3108_v52 }
 0x2ae   : > { %v3255_v55 = vmul.f32 0.020408163, %v3224_v61  ;;  %v3109_v16 = vmul.f32 0.020408163, %v3090_v27  ;;  %v3237_v60 = vadd.f32 %v3236_v45, %v3235_v29 }
 0x2b0   : > { %v3269_v36 = vsub.f32 %v3255_v55, %v3262_v40  ;;  %v3256_v54 = vmul.f32 0.020408163, %v3237_v60  ;;  %v3263_v22 = vmul.f32 %v3109_v16, %v3109_v16 }
 0x2b2   : > { %v3276_v53 = vadd.f32 1e-05, %v3269_v36  ;;  %v3270_v59 = vsub.f32 %v3256_v54, %v3263_v22 }
 0x2b4   : > { %4557 = vrsqrt.f32 %v3276_v53  ;;  %v3277_v34 = vadd.f32 1e-05, %v3270_v59 }
 0x2b6   : > { %4559 = vrsqrt.f32 %v3277_v34 }
 0x2be   : > { %v4558_v33 = vpop.eup %4557 }
 0x2bf   : > { %v3327_v4 = vmul.f32 %v4558_v33, %v3307_v41  ;;  %v6751_v41 = vld [vmem:[#allocation13_spill] sm:$0xff]  ;;  %v6752_v33 = vld [vmem:[#allocation23_spill] sm:$0xff] }
 0x2c0   : > { %v4560_v21 = vpop.eup %4559 }
 0x2c1   : > { %v3335_v49 = vmul.f32 %v3327_v4, %v3108_v52  ;;  %v3414_v40 = vrot.slane %v3327_v4, %v5421_v39  ;;  %v3328_v38 = vmul.f32 %v4560_v21, %v3311_v7 }
 0x2c3   : > { %v3427_v22 = vmul.f32 %v3414_v40, %v6270_v19  ;;  %v3434_v10 = vmul.f32 %v3414_v40, %v6274_v35  ;;  %v3441_v51 = vmul.f32 %v3414_v40, %v6290_v48  ;;  %v6381_v8 = vmul.f32 %v3414_v40, %v6300_v46 }
 0x2c4   : > { %v6384_v29 = vmul.f32 %v3414_v40, %v6310_v58  ;;  %v6387_v37 = vmul.f32 %v3414_v40, %v6320_v9  ;;  %v6390_v52 = vmul.f32 %v3414_v40, %v6331_v31  ;;  %v3336_v61 = vmul.f32 %v3328_v38, %v3109_v16  ;;  %v6753_v40 = vld [vmem:[#allocation9_spill] sm:$0xff] }
 0x2c5   : > { %v3418_v19 = vrot.slane %v3328_v38, %v5421_v39  ;;  %v3375_v35 = vrot.slane %v6348_v57, %v5441_v62 }
 0x2c6   : > { %v3347_v48 = vcombine.low %v3335_v49, %v3336_v61 }
 0x2c7   : > { %v3428_v46 = vmul.f32 %v3418_v19, %v6272_v42  ;;  %v3435_v27 = vmul.f32 %v3418_v19, %v6284_v26  ;;  %v3442_v58 = vmul.f32 %v3418_v19, %v6295_v12  ;;  %v6399_v9 = vmul.f32 %v3418_v19, %v6305_v25 }
 0x2c8   : > { %v3368_v31 = vrot.slane %v3347_v48, %v5441_v62  ;;  %v6403_v45 = vmul.f32 %v3418_v19, %v6315_v5  ;;  %v6406_v55 = vmul.f32 %v3418_v19, %v6325_v0  ;;  %v6409_v57 = vmul.f32 %v3418_v19, %v6340_v47  ;;  %v3330_v5 = vld [vmem:[%s785_s10] sm:$0xff]  ;;  %v6756_v19 = vld [vmem:[#allocation24_spill] sm:$0xff] }
 0x2c9   : > { %v6747_v26 = vcombine.low %v6198_v6, %v6222_v63  ;;  %v6748_v63 = vsub.s32 6, %v6744_v1 }
 0x2ca   : > { %v3377_v42 = vcombine.low %v3368_v31, %v3375_v35  ;;  %v6758_v31 = vld [vmem:[#allocation20_spill] sm:$0xff] }
 0x2cb   : > { %v3384_v12 = vrot.slane %v6747_v26, %v5441_v62  ;;  %v6760_v26 = vld [vmem:[#allocation5_spill] sm:$0xff] }
 0x2cc   : > { %v3391_v25 = vrot.slane %v3377_v42, %v5441_v62  ;;  %v6759_v42 = vld [vmem:[#allocation15_spill] sm:$0xff] }
 0x2ce   : > { %v3392_v16 = vcombine.low %v3384_v12, %v3391_v25 }
 0x2d0   : > { %v3394_v0 = vsub.f32 %v3330_v5, %v3392_v16  ;;  %v6761_v16 = vld [vmem:[#allocation11_spill] sm:$0xff] }
 0x2d2   : > { %v6423_v47 = vrot.slane %v3394_v0, %v5421_v39  ;;  %v6426_v60 = vrot.slane %v3394_v0, %v5427_v28  ;;  %v6429_v36 = vrot.slane %v3394_v0, %v5431_v44  ;;  %v6432_v54 = vrot.slane %v3394_v0, %v5436_v30 }
 0x2d3   : > { %v6434_v6 = vrot.slane %v3394_v0, %v3306_v24  ;;  %v6436_v62 = vrot.slane %v3394_v0, %v3310_v18  ;;  %v6440_v53 = vrot.slane %v3394_v0, %v6748_v63  ;;  %v6762_v63 = vld [vmem:[#allocation21_spill] sm:$0xff] }
 0x2d4   : > { %v3508_v39 = vadd.f32 %v6423_v47, %v6131_v23  ;;  %v3509_v28 = vadd.f32 %v6426_v60, %v6175_v32  ;;  %v3510_v44 = vadd.f32 %v6429_v36, %v6152_v50  ;;  %v3511_v30 = vadd.f32 %v6432_v54, %v6201_v3 }
 0x2d5   : > { %v3512_v59 = vadd.f32 %v6434_v6, %v3427_v22  ;;  %v3513_v34 = vadd.f32 %v6436_v62, %v3428_v46  ;;  %v3514_v1 = vadd.f32 %v6440_v53, %v6352_v2  ;;  %v3515_v24 = vadd.f32 %v6423_v47, %v6134_v11  ;;  %v6750_v2 = vld [vmem:[#allocation18_spill] sm:$0xff]  ;;  %v6754_v22 = vld [vmem:[#allocation19_spill] sm:$0xff] }
 0x2d6   : > { %v3516_v23 = vadd.f32 %v6426_v60, %v6178_v14  ;;  %v3517_v32 = vadd.f32 %v6429_v36, %v6155_v15  ;;  %v3518_v50 = vadd.f32 %v6432_v54, %v6204_v17  ;;  %v3519_v3 = vadd.f32 %v6434_v6, %v3434_v10  ;;  %3557 = vst [vmem:[%s6463_s24] sm:$0xff] %v3508_v39  ;;  %v6749_v14 = vld [vmem:[#allocation8_spill] sm:$0xff] }
 0x2d7   : > { %3558 = vst [vmem:[%s6463_s24 + $0x8] sm:$0xff] %v3509_v28  ;;  %3559 = vst [vmem:[%s6463_s24 + $0x10] sm:$0xff] %v3510_v44  ;;  %v3520_v11 = vadd.f32 %v6436_v62, %v3435_v27  ;;  %v3521_v15 = vadd.f32 %v6440_v53, %v6355_v13  ;;  %v3522_v17 = vadd.f32 %v6423_v47, %v6749_v14  ;;  %v6757_v27 = vld [vmem:[#allocation10_spill] sm:$0xff]  ;;  %v6763_v39 = vld [vmem:[#allocation16_spill] sm:$0xff] }
 0x2d8   : > { %3560 = vst [vmem:[%s6463_s24 + $0x18] sm:$0xff] %v3511_v30  ;;  %v3523_v18 = vadd.f32 %v6426_v60, %v6750_v2  ;;  %3561 = vst [vmem:[%s6463_s24 + $0x20] sm:$0xff] %v3512_v59  ;;  %v3524_v7 = vadd.f32 %v6429_v36, %v6751_v41  ;;  %v3525_v13 = vadd.f32 %v6432_v54, %v6752_v33  ;;  %v6764_v28 = vld [vmem:[#allocation6_spill] sm:$0xff]  ;;  %v6765_v59 = vld [vmem:[#allocation4_spill] sm:$0xff] }
 0x2d9   : > { %3562 = vst [vmem:[%s6463_s24 + $0x28] sm:$0xff] %v3513_v34  ;;  %3563 = vst [vmem:[%s6463_s24 + $0x30] sm:$0xff] %v3514_v1  ;;  %v3526_v4 = vadd.f32 %v6434_v6, %v3441_v51  ;;  %v3527_v21 = vadd.f32 %v6436_v62, %v3442_v58  ;;  %v3528_v49 = vadd.f32 %v6440_v53, %v6358_v20  ;;  %v6755_v51 = vld [vmem:[#allocation14_spill] sm:$0xff]  ;;  %v6766_v1 = vld [vmem:[#allocation12_spill] sm:$0xff] }
 0x2da   : > { %3564 = vst [vmem:[%s6463_s24 + $0x38] sm:$0xff] %v3515_v24  ;;  %3565 = vst [vmem:[%s6463_s24 + $0x40] sm:$0xff] %v3516_v23  ;;  %v3529_v38 = vadd.f32 %v6423_v47, %v6753_v40  ;;  %v3530_v10 = vadd.f32 %v6426_v60, %v6754_v22  ;;  %v3531_v61 = vadd.f32 %v6429_v36, %v6755_v51  ;;  %v6767_v23 = vld [vmem:[#allocation22_spill] sm:$0xff] }
 0x2db   : > { %3566 = vst [vmem:[%s6463_s24 + $0x48] sm:$0xff] %v3517_v32  ;;  %3567 = vst [vmem:[%s6463_s24 + $0x50] sm:$0xff] %v3518_v50  ;;  %v3532_v20 = vadd.f32 %v6432_v54, %v6756_v19  ;;  %v3533_v35 = vadd.f32 %v6434_v6, %v6381_v8  ;;  %v3534_v48 = vadd.f32 %v6436_v62, %v6399_v9  ;;  %v6769_v50 = vld [vmem:[#allocation7_spill] sm:$0xff] }
 0x2dc   : > { %3568 = vst [vmem:[%s6463_s24 + $0x58] sm:$0xff] %v3519_v3  ;;  %3569 = vst [vmem:[%s6463_s24 + $0x60] sm:$0xff] %v3520_v11  ;;  %v3535_v46 = vadd.f32 %v6440_v53, %v6361_v56  ;;  %v3536_v58 = vadd.f32 %v6423_v47, %v6757_v27  ;;  %v3537_v8 = vadd.f32 %v6426_v60, %v6758_v31  ;;  %v6770_v11 = vld [vmem:[#allocation25_spill] sm:$0xff] }
 0x2dd   : > { %3570 = vst [vmem:[%s6463_s24 + $0x68] sm:$0xff] %v3521_v15  ;;  %3571 = vst [vmem:[%s6463_s24 + $0x70] sm:$0xff] %v3522_v17  ;;  %v3538_v9 = vadd.f32 %v6429_v36, %v6759_v42  ;;  %v3539_v56 = vadd.f32 %v6432_v54, %v6760_v26  ;;  %v3540_v12 = vadd.f32 %v6434_v6, %v6384_v29 }
 0x2de   : > { %3572 = vst [vmem:[%s6463_s24 + $0x78] sm:$0xff] %v3523_v18  ;;  %3573 = vst [vmem:[%s6463_s24 + $0x80] sm:$0xff] %v3524_v7  ;;  %v3541_v25 = vadd.f32 %v6436_v62, %v6403_v45  ;;  %v3542_v5 = vadd.f32 %v6440_v53, %v6364_v43  ;;  %v3543_v0 = vadd.f32 %v6423_v47, %v6761_v16 }
 0x2df   : > { %3574 = vst [vmem:[%s6463_s24 + $0x88] sm:$0xff] %v3525_v13  ;;  %3575 = vst [vmem:[%s6463_s24 + $0x90] sm:$0xff] %v3526_v4  ;;  %v3544_v29 = vadd.f32 %v6426_v60, %v6762_v63  ;;  %v3545_v45 = vadd.f32 %v6429_v36, %v6763_v39  ;;  %v3546_v43 = vadd.f32 %v6432_v54, %v6764_v28 }
 0x2e0   : > { %3576 = vst [vmem:[%s6463_s24 + $0x98] sm:$0xff] %v3527_v21  ;;  %3577 = vst [vmem:[%s6463_s24 + $0xa0] sm:$0xff] %v3528_v49  ;;  %v3547_v44 = vadd.f32 %v6434_v6, %v6387_v37  ;;  %v3548_v30 = vadd.f32 %v6436_v62, %v6406_v55  ;;  %v3549_v34 = vadd.f32 %v6440_v53, %v6765_v59  ;;  %v6768_v55 = vld [vmem:[#allocation17_spill] sm:$0xff] }
 0x2e1   : > { %3578 = vst [vmem:[%s6463_s24 + $0xa8] sm:$0xff] %v3529_v38  ;;  %3579 = vst [vmem:[%s6463_s24 + $0xb0] sm:$0xff] %v3530_v10  ;;  %v3550_v24 = vadd.f32 %v6423_v47, %v6766_v1  ;;  %v3551_v37 = vadd.f32 %v6426_v60, %v6767_v23  ;;  %v3552_v32 = vadd.f32 %v6429_v36, %v6768_v55  ;;  %v3632_v36 = vld [vmem:[%s6463_s24 + $0x10] sm:$0xff] (%p4668_p5)  ;;  %v3642_v14 = vld [vmem:[%s6463_s24 + $0x38] sm:$0xff] (%p4668_p5) }
 0x2e2   : > { %3580 = vst [vmem:[%s6463_s24 + $0xb8] sm:$0xff] %v3531_v61  ;;  %3581 = vst [vmem:[%s6463_s24 + $0xc0] sm:$0xff] %v3532_v20  ;;  %v3553_v47 = vadd.f32 %v6432_v54, %v6769_v50  ;;  %v3554_v60 = vadd.f32 %v6434_v6, %v6390_v52  ;;  %v3555_v3 = vadd.f32 %v6436_v62, %v6409_v57  ;;  %v3628_v52 = vld [vmem:[%s6463_s24] sm:$0xff] (%p4668_p5)  ;;  %v3630_v57 = vld [vmem:[%s6463_s24 + $0x8] sm:$0xff] (%p4668_p5) }
 0x2e3   : > { %3582 = vst [vmem:[%s6463_s24 + $0xc8] sm:$0xff] %v3533_v35  ;;  %3583 = vst [vmem:[%s6463_s24 + $0xd0] sm:$0xff] %v3534_v48  ;;  %v3556_v15 = vadd.f32 %v6440_v53, %v6770_v11  ;;  %v3634_v54 = vld [vmem:[%s6463_s24 + $0x18] sm:$0xff] (%p4668_p5)  ;;  %v3636_v6 = vld [vmem:[%s6463_s24 + $0x20] sm:$0xff] (%p4668_p5) }
 0x2e4   : > { %3584 = vst [vmem:[%s6463_s24 + $0xd8] sm:$0xff] %v3535_v46  ;;  %3585 = vst [vmem:[%s6463_s24 + $0xe0] sm:$0xff] %v3536_v58  ;;  %v3638_v62 = vld [vmem:[%s6463_s24 + $0x28] sm:$0xff] (%p4668_p5)  ;;  %v3640_v53 = vld [vmem:[%s6463_s24 + $0x30] sm:$0xff] (%p4668_p5) }
 0x2e5   : > { %3586 = vst [vmem:[%s6463_s24 + $0xe8] sm:$0xff] %v3537_v8  ;;  %3587 = vst [vmem:[%s6463_s24 + $0xf0] sm:$0xff] %v3538_v9  ;;  %v3644_v17 = vld [vmem:[%s6463_s24 + $0x40] sm:$0xff] (%p4668_p5)  ;;  %v3646_v2 = vld [vmem:[%s6463_s24 + $0x48] sm:$0xff] (%p4668_p5) }
 0x2e6   : > { %3588 = vst [vmem:[%s6463_s24 + $0xf8] sm:$0xff] %v3539_v56  ;;  %3589 = vst [vmem:[%s6463_s24 + $0x100] sm:$0xff] %v3540_v12  ;;  %v3648_v18 = vld [vmem:[%s6463_s24 + $0x50] sm:$0xff] (%p4668_p5)  ;;  %v3650_v41 = vld [vmem:[%s6463_s24 + $0x58] sm:$0xff] (%p4668_p5) }
 0x2e7   : > { %3590 = vst [vmem:[%s6463_s24 + $0x108] sm:$0xff] %v3541_v25  ;;  %3591 = vst [vmem:[%s6463_s24 + $0x110] sm:$0xff] %v3542_v5  ;;  %v3652_v7 = vld [vmem:[%s6463_s24 + $0x60] sm:$0xff] (%p4668_p5)  ;;  %v3654_v33 = vld [vmem:[%s6463_s24 + $0x68] sm:$0xff] (%p4668_p5) }
 0x2e8   : > { %3592 = vst [vmem:[%s6463_s24 + $0x118] sm:$0xff] %v3543_v0  ;;  %3593 = vst [vmem:[%s6463_s24 + $0x120] sm:$0xff] %v3544_v29  ;;  %3612 = sbr.rel (!%p4668_p5) target bundleno = 776 (0x308), region = 78  ;;  %v3656_v13 = vld [vmem:[%s6463_s24 + $0x70] sm:$0xff] (%p4668_p5)  ;;  %v3658_v4 = vld [vmem:[%s6463_s24 + $0x78] sm:$0xff] (%p4668_p5) }
 0x2e9   : > { %3594 = vst [vmem:[%s6463_s24 + $0x128] sm:$0xff] %v3545_v45  ;;  %3595 = vst [vmem:[%s6463_s24 + $0x130] sm:$0xff] %v3546_v43  ;;  %v3660_v21 = vld [vmem:[%s6463_s24 + $0x80] sm:$0xff] (%p4668_p5)  ;;  %v3662_v49 = vld [vmem:[%s6463_s24 + $0x88] sm:$0xff] (%p4668_p5) }
 0x2ea   : > { %3596 = vst [vmem:[%s6463_s24 + $0x138] sm:$0xff] %v3547_v44  ;;  %3597 = vst [vmem:[%s6463_s24 + $0x140] sm:$0xff] %v3548_v30  ;;  %v3664_v40 = vld [vmem:[%s6463_s24 + $0x90] sm:$0xff] (%p4668_p5)  ;;  %v3666_v38 = vld [vmem:[%s6463_s24 + $0x98] sm:$0xff] (%p4668_p5) }
 0x2eb   : > { %3598 = vst [vmem:[%s6463_s24 + $0x148] sm:$0xff] %v3549_v34  ;;  %3599 = vst [vmem:[%s6463_s24 + $0x150] sm:$0x1] %v3550_v24  ;;  %v3668_v22 = vld [vmem:[%s6463_s24 + $0xa0] sm:$0xff] (%p4668_p5)  ;;  %v3670_v10 = vld [vmem:[%s6463_s24 + $0xa8] sm:$0xff] (%p4668_p5) }
 0x2ec   : > { %3600 = vst [vmem:[%s6463_s24 + $0x158] sm:$0x1] %v3551_v37  ;;  %3601 = vst [vmem:[%s6463_s24 + $0x160] sm:$0x1] %v3552_v32  ;;  %v3672_v51 = vld [vmem:[%s6463_s24 + $0xb0] sm:$0xff] (%p4668_p5)  ;;  %v3674_v61 = vld [vmem:[%s6463_s24 + $0xb8] sm:$0xff] (%p4668_p5) }
 0x2ed   : > { %3602 = vst [vmem:[%s6463_s24 + $0x168] sm:$0x1] %v3553_v47  ;;  %3603 = vst [vmem:[%s6463_s24 + $0x170] sm:$0x1] %v3554_v60  ;;  %v3676_v19 = vld [vmem:[%s6463_s24 + $0xc0] sm:$0xff] (%p4668_p5)  ;;  %v3678_v20 = vld [vmem:[%s6463_s24 + $0xc8] sm:$0xff] (%p4668_p5) }
 0x2ee   : > { %3604 = vst [vmem:[%s6463_s24 + $0x178] sm:$0x1] %v3555_v3  ;;  %3605 = vst [vmem:[%s6463_s24 + $0x180] sm:$0x1] %v3556_v15  ;;  %v3680_v35 = vld [vmem:[%s6463_s24 + $0xd0] sm:$0xff] (%p4668_p5)  ;;  %v3682_v48 = vld [vmem:[%s6463_s24 + $0xd8] sm:$0xff] (%p4668_p5) }
 0x2ef   : > { %3629 = vst [vmem:[%s6597_s13] sm:$0xff] %v3628_v52  ;;  %3631 = vst [vmem:[%s6597_s13 + $0x8] sm:$0xff] %v3630_v57  ;;  %v3684_v46 = vld [vmem:[%s6463_s24 + $0xe0] sm:$0xff]  ;;  %v3686_v27 = vld [vmem:[%s6463_s24 + $0xe8] sm:$0xff] }
 0x2f0   : > { %3633 = vst [vmem:[%s6597_s13 + $0x10] sm:$0xff] %v3632_v36  ;;  %3635 = vst [vmem:[%s6597_s13 + $0x18] sm:$0xff] %v3634_v54  ;;  %v3688_v58 = vld [vmem:[%s6463_s24 + $0xf0] sm:$0xff]  ;;  %v3690_v31 = vld [vmem:[%s6463_s24 + $0xf8] sm:$0xff] }
 0x2f1   : > { %3637 = vst [vmem:[%s6597_s13 + $0x20] sm:$0xff] %v3636_v6  ;;  %3639 = vst [vmem:[%s6597_s13 + $0x28] sm:$0xff] %v3638_v62  ;;  %v3692_v8 = vld [vmem:[%s6463_s24 + $0x100] sm:$0xff]  ;;  %v3694_v42 = vld [vmem:[%s6463_s24 + $0x108] sm:$0xff] }
 0x2f2   : > { %3641 = vst [vmem:[%s6597_s13 + $0x30] sm:$0xff] %v3640_v53  ;;  %3643 = vst [vmem:[%s6597_s13 + $0x70] sm:$0xff] %v3642_v14  ;;  %v3696_v9 = vld [vmem:[%s6463_s24 + $0x110] sm:$0xff]  ;;  %v3698_v26 = vld [vmem:[%s6463_s24 + $0x118] sm:$0xff] }
 0x2f3   : > { %3645 = vst [vmem:[%s6597_s13 + $0x78] sm:$0xff] %v3644_v17  ;;  %3647 = vst [vmem:[%s6597_s13 + $0x80] sm:$0xff] %v3646_v2  ;;  %v3700_v56 = vld [vmem:[%s6463_s24 + $0x120] sm:$0xff]  ;;  %v3702_v12 = vld [vmem:[%s6463_s24 + $0x128] sm:$0xff] }
 0x2f4   : > { %3649 = vst [vmem:[%s6597_s13 + $0x88] sm:$0xff] %v3648_v18  ;;  %3651 = vst [vmem:[%s6597_s13 + $0x90] sm:$0xff] %v3650_v41  ;;  %v3704_v25 = vld [vmem:[%s6463_s24 + $0x130] sm:$0xff]  ;;  %v3706_v5 = vld [vmem:[%s6463_s24 + $0x138] sm:$0xff] }
 0x2f5   : > { %3653 = vst [vmem:[%s6597_s13 + $0x98] sm:$0xff] %v3652_v7  ;;  %3655 = vst [vmem:[%s6597_s13 + $0xa0] sm:$0xff] %v3654_v33  ;;  %v3708_v16 = vld [vmem:[%s6463_s24 + $0x140] sm:$0xff]  ;;  %v3710_v0 = vld [vmem:[%s6463_s24 + $0x148] sm:$0xff] }
 0x2f6   : > { %3657 = vst [vmem:[%s6597_s13 + $0xe0] sm:$0xff] %v3656_v13  ;;  %3659 = vst [vmem:[%s6597_s13 + $0xe8] sm:$0xff] %v3658_v4  ;;  %v3712_v63 = vld [vmem:[%s6463_s24 + $0x150] sm:$0xff]  ;;  %v3714_v29 = vld [vmem:[%s6463_s24 + $0x158] sm:$0xff] }
 0x2f7   : > { %3661 = vst [vmem:[%s6597_s13 + $0xf0] sm:$0xff] %v3660_v21  ;;  %3663 = vst [vmem:[%s6597_s13 + $0xf8] sm:$0xff] %v3662_v49  ;;  %v3716_v39 = vld [vmem:[%s6463_s24 + $0x160] sm:$0xff]  ;;  %v3718_v45 = vld [vmem:[%s6463_s24 + $0x168] sm:$0xff] }
 0x2f8   : > { %3665 = vst [vmem:[%s6597_s13 + $0x100] sm:$0xff] %v3664_v40  ;;  %3667 = vst [vmem:[%s6597_s13 + $0x108] sm:$0xff] %v3666_v38  ;;  %v3720_v28 = vld [vmem:[%s6463_s24 + $0x170] sm:$0xff]  ;;  %v3722_v43 = vld [vmem:[%s6463_s24 + $0x178] sm:$0xff] }
 0x2f9   : > { %3669 = vst [vmem:[%s6597_s13 + $0x110] sm:$0xff] %v3668_v22  ;;  %3671 = vst [vmem:[%s6597_s13 + $0x150] sm:$0xff] %v3670_v10  ;;  %v3724_v44 = vld [vmem:[%s6463_s24 + $0x180] sm:$0xff] }
 0x2fa   : > { %3673 = vst [vmem:[%s6597_s13 + $0x158] sm:$0xff] %v3672_v51  ;;  %3675 = vst [vmem:[%s6597_s13 + $0x160] sm:$0xff] %v3674_v61 }
 0x2fb   : > { %3677 = vst [vmem:[%s6597_s13 + $0x168] sm:$0xff] %v3676_v19  ;;  %3679 = vst [vmem:[%s6597_s13 + $0x170] sm:$0xff] %v3678_v20 }
 0x2fc   : > { %3681 = vst [vmem:[%s6597_s13 + $0x178] sm:$0xff] %v3680_v35  ;;  %3683 = vst [vmem:[%s6597_s13 + $0x180] sm:$0xff] %v3682_v48 }
 0x2fd   : > { %3685 = vst [vmem:[%s6597_s13 + $0x1c0] sm:$0xff] %v3684_v46  ;;  %3687 = vst [vmem:[%s6597_s13 + $0x1c8] sm:$0xff] %v3686_v27 }
 0x2fe   : > { %3689 = vst [vmem:[%s6597_s13 + $0x1d0] sm:$0xff] %v3688_v58  ;;  %3691 = vst [vmem:[%s6597_s13 + $0x1d8] sm:$0xff] %v3690_v31 }
 0x2ff   : > { %3693 = vst [vmem:[%s6597_s13 + $0x1e0] sm:$0xff] %v3692_v8  ;;  %3695 = vst [vmem:[%s6597_s13 + $0x1e8] sm:$0xff] %v3694_v42 }
 0x300   : > { %3697 = vst [vmem:[%s6597_s13 + $0x1f0] sm:$0xff] %v3696_v9  ;;  %3699 = vst [vmem:[%s6597_s13 + $0x230] sm:$0xff] %v3698_v26 }
 0x301   : > { %3701 = vst [vmem:[%s6597_s13 + $0x238] sm:$0xff] %v3700_v56  ;;  %3703 = vst [vmem:[%s6597_s13 + $0x240] sm:$0xff] %v3702_v12 }
 0x302   : > { %3705 = vst [vmem:[%s6597_s13 + $0x248] sm:$0xff] %v3704_v25  ;;  %3707 = vst [vmem:[%s6597_s13 + $0x250] sm:$0xff] %v3706_v5 }
 0x303   : > { %3709 = vst [vmem:[%s6597_s13 + $0x258] sm:$0xff] %v3708_v16  ;;  %3711 = vst [vmem:[%s6597_s13 + $0x260] sm:$0xff] %v3710_v0 }
 0x304   : > { %3713 = vst [vmem:[%s6597_s13 + $0x2a0] sm:$0xff] %v3712_v63  ;;  %3715 = vst [vmem:[%s6597_s13 + $0x2a8] sm:$0xff] %v3714_v29 }
 0x305   : > { %3717 = vst [vmem:[%s6597_s13 + $0x2b0] sm:$0xff] %v3716_v39  ;;  %3719 = vst [vmem:[%s6597_s13 + $0x2b8] sm:$0xff] %v3718_v45 }
 0x306   : > { %3721 = vst [vmem:[%s6597_s13 + $0x2c0] sm:$0xff] %v3720_v28  ;;  %3723 = vst [vmem:[%s6597_s13 + $0x2c8] sm:$0xff] %v3722_v43 }
 0x307   : > { %3725 = vst [vmem:[%s6597_s13 + $0x2d0] sm:$0xff] %v3724_v44 }
 0x308 PF: > { %p14_p11 = scmp.ge.s32.totalorder %s4656_s28, 4   ;;  %s6771_s24 = smov %s4589_s25 }
 0x309   : > { %s6772_s25 = smov %s4666_s8  ;;  %s6773_s26 = smov %s4656_s28 }
 0x30a   :  { %16 = sbr.rel (!%p14_p11) target bundleno = 2 (0x2), region = 144 }

</bundles_post_ra>
